<compile_context>
chip_gen: v5e
topology: v5e:2x2
jax: 0.10.0
libtpu: 0.0.40
codegen_flags: <defaults>
</compile_context>

<pallas_src>
import functools

import jax
import jax.numpy as jnp
from jax import lax
from jax.experimental import pallas as pl
from jax.experimental.pallas import tpu as pltpu


# ----------------------------------------------------------------------------
# Fused Pallas kernel: lstm1 -> lstm2 -> attention -> softmax -> normalize
# ----------------------------------------------------------------------------
def _fused_bilstm_kernel(x_ref,
                         w1_ih_ref, w1_hh_ref, b1_ref,
                         w2_ih_ref, w2_hh_ref, b2_ref,
                         w_att_ref,
                         out_ref,
                         hs1_ref):
    """One batch tile of the whole forward pass.

    Block shapes (BT = batch tile = one sublane tile of the matmul dtype):
      x_ref:     (T, BT, D)    time-major input tile, matmul dtype (f32 / bf16)
      w*_ih_ref: (Din, 8H)     packed input->gate weights, columns
                               [i_f, i_b, f_f, f_b, 2g_f, 2g_b, o_f, o_b]
      w*_hh_ref: (2H, 8H)      packed block hidden->gate weights (g cols pre-scaled by 2)
      b*_ref:    (1, 8H)       packed bias (b_ih + b_hh), f32
      w_att_ref: (1, 2*H2)     attention weight (bias cancels in softmax over seq)
      out_ref:   (T, BT, 2*H2) L2-normalized context, time-major, f32
    Scratch:
      hs1_ref:   (T*BT, 2*H1)  layer-1 per-step hidden states; after the in-place
                               flip of the backward half it IS the layer-1 output y1
    """
    T, BT, _ = x_ref.shape
    H1 = w1_hh_ref.shape[0] // 2
    H2 = w2_hh_ref.shape[0] // 2

    def project_and_merge(x2d, w_ih_ref, b_ref, gm_ref, H):
        # One hoisted MXU matmul for both directions over the whole tile, then an
        # in-place pre-merge of the two time streams: row-block s ends up holding
        # forward-gate columns from time s and backward-gate columns from time
        # T-1-s.  Removes the per-step second load + select from the recurrence.
        gm_ref[...] = (jnp.dot(x2d, w_ih_ref[...],
                               preferred_element_type=jnp.float32) + b_ref[...])
        col = lax.broadcasted_iota(jnp.int32, (1, 8 * H), 1)
        is_fwd = (col % (2 * H)) < H            # interleaved [*_f | *_b] gate blocks
        for s in range((T + 1) // 2):           # vectorized, off the serial chain
            s2 = T - 1 - s
            a = gm_ref[s * BT:(s + 1) * BT, :]
            b = gm_ref[s2 * BT:(s2 + 1) * BT, :]
            gm_ref[s * BT:(s + 1) * BT, :] = jnp.where(is_fwd, a, b)
            gm_ref[s2 * BT:(s2 + 1) * BT, :] = jnp.where(is_fwd, b, a)

    def bidir_recurrence(gm_ref, w_hh_ref, hs_ref, H):
        # Merged fwd/bwd recurrence: step s advances the forward chain at time s
        # and the backward chain at time T-1-s.  Per step: ONE contiguous gate
        # load, ONE MXU matmul, ONE full-width sigmoid, ONE contiguous store.
        w_hh = w_hh_ref[...]
        h = jnp.zeros((BT, 2 * H), jnp.float32)   # [h_f | h_b]
        c = jnp.zeros((BT, 2 * H), jnp.float32)   # [c_f | c_b]
        for s in range(T):   # fully unrolled; fine at small static T (switch to
                             # lax.fori_loop(..., unroll=k) once T grows)
            gates = (gm_ref[s * BT:(s + 1) * BT, :]
                     + jnp.dot(h.astype(w_hh.dtype), w_hh,
                               preferred_element_type=jnp.float32))
            sg = jax.nn.sigmoid(gates)            # one EUP pass over all 8 gate blocks
            i_g = sg[:, 0:2 * H]
            f_g = sg[:, 2 * H:4 * H]
            g_g = 2.0 * sg[:, 4 * H:6 * H] - 1.0  # tanh via g-columns pre-scaled by 2
            o_g = sg[:, 6 * H:8 * H]
            c = f_g * c + i_g * g_g
            h = o_g * jnp.tanh(c)
            hs_ref[s * BT:(s + 1) * BT, :] = h    # contiguous (BT, 2H) store
        # Post-loop: time-reverse the backward half in place; afterwards
        # hs_ref[t] = [h_f(t) | h_b(t)] is the layer output in time order.
        for s in range((T + 1) // 2):
            s2 = T - 1 - s
            a = hs_ref[s * BT:(s + 1) * BT, H:]
            b = hs_ref[s2 * BT:(s2 + 1) * BT, H:]
            hs_ref[s * BT:(s + 1) * BT, H:] = b
            hs_ref[s2 * BT:(s2 + 1) * BT, H:] = a

    # ---- layer 1 (gate scratch only lives in this scope; layer 2 reuses the VMEM)
    def layer1(g1_ref):
        x2d = x_ref[...].reshape(T * BT, x_ref.shape[2])   # sublane-aligned collapse
        project_and_merge(x2d, w1_ih_ref, b1_ref, g1_ref, H1)
        bidir_recurrence(g1_ref, w1_hh_ref, hs1_ref, H1)

    pl.run_scoped(layer1, pltpu.VMEM((T * BT, 8 * H1), jnp.float32))

    # ---- layer 2 + attention -> softmax(seq) -> weights*y -> F.normalize(dim=seq)
    def layer2(g2_ref, hs2_ref):
        y1 = hs1_ref[...].astype(w2_ih_ref.dtype)
        project_and_merge(y1, w2_ih_ref, b2_ref, g2_ref, H2)
        bidir_recurrence(g2_ref, w2_hh_ref, hs2_ref, H2)

        y2 = hs2_ref[...].reshape(T, BT, 2 * H2)
        wa = w_att_ref[...].reshape(1, 1, 2 * H2)
        scores = jnp.sum(y2 * wa, axis=-1, keepdims=True)       # (T, BT, 1)
        m = jnp.max(scores, axis=0, keepdims=True)
        e = jnp.exp(scores - m)
        attn = e / jnp.sum(e, axis=0, keepdims=True)             # softmax over seq
        ctx = attn * y2
        # F.normalize(p=2, dim=seq, eps=1e-12): x / max(||x||, eps)
        sumsq = jnp.sum(ctx * ctx, axis=0, keepdims=True)
        out_ref[...] = ctx * lax.rsqrt(jnp.maximum(sumsq, 1e-24))

    pl.run_scoped(layer2,
                  pltpu.VMEM((T * BT, 8 * H2), jnp.float32),
                  pltpu.VMEM((T * BT, 2 * H2), jnp.float32))


# ----------------------------------------------------------------------------
# Weight packing (wrapper-side, plain JAX; runs once / is constant-folded)
# ----------------------------------------------------------------------------
def _pack_gate_cols(wf, wb):
    """Interleave the two directions' gate blocks along the last axis:
    [i_f, i_b, f_f, f_b, 2*g_f, 2*g_b, o_f, o_b] (source gate order i,f,g,o;
    g blocks pre-scaled by 2 for the tanh(x) = 2*sigmoid(2x) - 1 trick)."""
    H = wf.shape[-1] // 4
    blocks = []
    for k in range(4):
        s = 2.0 if k == 2 else 1.0
        blocks.append(s * wf[..., k * H:(k + 1) * H])
        blocks.append(s * wb[..., k * H:(k + 1) * H])
    return jnp.concatenate(blocks, axis=-1)


def _pack_hidden_weights(whh_f, whh_b):
    """(2H, 8H) block weight so that [h_f | h_b] @ W gives both directions'
    recurrent gate pre-activations in the interleaved column layout."""
    H = whh_f.shape[0]
    Z = jnp.zeros((H, H), whh_f.dtype)
    top, bot = [], []
    for k in range(4):
        s = 2.0 if k == 2 else 1.0
        top += [s * whh_f[:, k * H:(k + 1) * H], Z]
        bot += [Z, s * whh_b[:, k * H:(k + 1) * H]]
    return jnp.concatenate([jnp.concatenate(top, axis=-1),
                            jnp.concatenate(bot, axis=-1)], axis=0)


def _pack_layer(p, mm_dtype):
    w_ih = _pack_gate_cols(p["wih_f"], p["wih_b"]).astype(mm_dtype)
    w_hh = _pack_hidden_weights(p["whh_f"], p["whh_b"]).astype(mm_dtype)
    b = _pack_gate_cols(p["b_f"], p["b_b"])            # bias stays f32
    return w_ih, w_hh, b


# ----------------------------------------------------------------------------
# JAX wrapper: one pallas_call for the whole forward pass
# ----------------------------------------------------------------------------
@functools.partial(jax.jit, static_argnames=("matmul_dtype",))
def bilstm_forward(params, sketch_seq, matmul_dtype=jnp.float32):
    """Full BiLSTM.forward: (B, T, input_dim) -> (B, T, 64)."""
    B, T, D = sketch_seq.shape
    H1 = params["lstm1"]["whh_f"].shape[0]
    H2 = params["lstm2"]["whh_f"].shape[0]
    w1_ih, w1_hh, b1 = _pack_layer(params["lstm1"], matmul_dtype)
    w2_ih, w2_hh, b2 = _pack_layer(params["lstm2"], matmul_dtype)

    # Batch tile = one native sublane tile of the matmul dtype (8 rows f32,
    # 16 rows bf16).  Padding is free in cycles (the HW pads sublanes anyway)
    # and fills the MXU with useful rows.
    bt = 8 * (4 // jnp.dtype(matmul_dtype).itemsize)
    b_pad = ((B + bt - 1) // bt) * bt

    x = jnp.transpose(sketch_seq, (1, 0, 2))                     # (T, B, D) time-major
    x = jnp.pad(x, ((0, 0), (0, b_pad - B), (0, 0))).astype(matmul_dtype)

    out_tm = pl.pallas_call(
        _fused_bilstm_kernel,
        out_shape=jax.ShapeDtypeStruct((T, b_pad, 2 * H2), jnp.float32),
        grid=(b_pad // bt,),                                     # parallel batch tiles
        in_specs=[
            pl.BlockSpec((T, bt, D), lambda i: (0, i, 0)),       # x: per batch tile
            pl.BlockSpec((D, 8 * H1), lambda i: (0, 0)),         # resident weights
            pl.BlockSpec((2 * H1, 8 * H1), lambda i: (0, 0)),
            pl.BlockSpec((1, 8 * H1), lambda i: (0, 0)),
            pl.BlockSpec((2 * H1, 8 * H2), lambda i: (0, 0)),
            pl.BlockSpec((2 * H2, 8 * H2), lambda i: (0, 0)),
            pl.BlockSpec((1, 8 * H2), lambda i: (0, 0)),
            pl.BlockSpec((1, 2 * H2), lambda i: (0, 0)),
        ],
        out_specs=pl.BlockSpec((T, bt, 2 * H2), lambda i: (0, i, 0)),
        scratch_shapes=[pltpu.VMEM((T * bt, 2 * H1), jnp.float32)],  # y1, spans layers
        compiler_params=pltpu.CompilerParams(
            dimension_semantics=("parallel",),    # ~2x on v7x's two TensorCores
            vmem_limit_bytes=32 * 1024 * 1024),
    )(x, w1_ih, w1_hh, b1, w2_ih, w2_hh, b2, params["w_att"].astype(jnp.float32))

    # Kernel emits time-major; one small relayout back to batch-first.
    # NOTE: emitting batch-major in-kernel would need a major-dim transpose of the
    # tiny epilogue tensor; the wrapper relayout of the 64-wide output is cheap.
    return jnp.transpose(out_tm[:, :B, :], (1, 0, 2))


# ----------------------------------------------------------------------------
# Deterministic parameter init (synthetic weights, PyTorch-like uniform scale)
# ----------------------------------------------------------------------------
def init_lstm_dir(key, d_in, h):
    k1, k2, k3 = jax.random.split(key, 3)
    s = 1.0 / jnp.sqrt(h)
    return {
        "wih": jax.random.uniform(k1, (d_in, 4 * h), jnp.float32, -s, s),
        "whh": jax.random.uniform(k2, (h, 4 * h), jnp.float32, -s, s),
        "b":   jax.random.uniform(k3, (1, 4 * h), jnp.float32, -s, s),
    }


def init_bilstm_layer(key, d_in, h):
    kf, kb = jax.random.split(key)
    f = init_lstm_dir(kf, d_in, h)
    b = init_lstm_dir(kb, d_in, h)
    return {"wih_f": f["wih"], "whh_f": f["whh"], "b_f": f["b"],
            "wih_b": b["wih"], "whh_b": b["whh"], "b_b": b["b"]}


def init_params(key, input_dim, hidden_dim):
    k1, k2, k3, k4 = jax.random.split(key, 4)
    return {
        "lstm1": init_bilstm_layer(k1, input_dim, hidden_dim),
        "lstm2": init_bilstm_layer(k2, 2 * hidden_dim, 32),   # hidden=32 hardcoded in module
        "w_att": jax.random.uniform(k3, (1, 64), jnp.float32, -0.125, 0.125),
        "b_att": jax.random.uniform(k4, (1, 1), jnp.float32, -0.125, 0.125),
    }


# ----------------------------------------------------------------------------
# Pure-JAX reference (raw, unpacked params -> also checks the packing).
# mm_dtype=float32 gives the exact module semantics; mm_dtype=bfloat16 mirrors
# the kernel's bf16 MXU-operand configuration (f32 accumulation & elementwise).
# ----------------------------------------------------------------------------
def _lstm_dir_ref(x, wih, whh, b, reverse, mm_dtype):
    Bb, T, _ = x.shape
    H = whh.shape[0]
    wih_c = wih.astype(mm_dtype)
    whh_c = whh.astype(mm_dtype)
    xs = jnp.transpose(x, (1, 0, 2))
    if reverse:
        xs = xs[::-1]

    def step(carry, x_t):
        h, c = carry
        g = (jnp.dot(x_t.astype(mm_dtype), wih_c, preferred_element_type=jnp.float32)
             + jnp.dot(h.astype(mm_dtype), whh_c, preferred_element_type=jnp.float32)
             + b)
        i = jax.nn.sigmoid(g[:, :H])
        f = jax.nn.sigmoid(g[:, H:2 * H])
        gg = jnp.tanh(g[:, 2 * H:3 * H])
        o = jax.nn.sigmoid(g[:, 3 * H:])
        c = f * c + i * gg
        h = o * jnp.tanh(c)
        return (h, c), h

    _, hs = lax.scan(step, (jnp.zeros((Bb, H), jnp.float32),
                            jnp.zeros((Bb, H), jnp.float32)), xs)
    if reverse:
        hs = hs[::-1]
    return jnp.transpose(hs, (1, 0, 2))


def _bilstm_layer_ref(x, p, mm_dtype):
    f = _lstm_dir_ref(x, p["wih_f"], p["whh_f"], p["b_f"], False, mm_dtype)
    b = _lstm_dir_ref(x, p["wih_b"], p["whh_b"], p["b_b"], True, mm_dtype)
    return jnp.concatenate([f, b], axis=-1)


def bilstm_forward_ref(params, x, mm_dtype=jnp.float32):
    y1 = _bilstm_layer_ref(x, params["lstm1"], mm_dtype)
    y2 = _bilstm_layer_ref(y1, params["lstm2"], mm_dtype)
    scores = jnp.sum(y2 * params["w_att"][None, :, :], axis=-1, keepdims=True) \
        + params["b_att"][0, 0]
    attn = jax.nn.softmax(scores, axis=1)
    ctx = attn * y2
    norm = jnp.sqrt(jnp.sum(ctx * ctx, axis=1, keepdims=True))
    return ctx / jnp.maximum(norm, 1e-12)


# ----------------------------------------------------------------------------
if __name__ == "__main__":
    # Small shapes consistent with the module (module dims scaled down):
    # batch=2, seq_len=8, input_dim=64, hidden_dim=32; the second LSTM hidden=32
    # and attention_fc in_features=64 are hardcoded by the module.
    B, T, INPUT_DIM, HIDDEN_DIM = 2, 8, 64, 32

    key = jax.random.PRNGKey(0)
    k_param, k_x = jax.random.split(key)
    params = init_params(k_param, INPUT_DIM, HIDDEN_DIM)
    sketch_seq = jax.random.normal(k_x, (B, T, INPUT_DIM), jnp.float32)

    # 1) exact-semantics check: f32 MXU operands vs. exact PyTorch-equivalent ref.
    out = jax.block_until_ready(bilstm_forward(params, sketch_seq,
                                               matmul_dtype=jnp.float32))
    ref = jax.block_until_ready(bilstm_forward_ref(params, sketch_seq, jnp.float32))
    assert out.shape == (B, T, 64), out.shape
    assert jnp.allclose(out, ref, rtol=1e-3, atol=1e-4), \
        f"f32 max abs err {jnp.max(jnp.abs(out - ref))}"

    # 2) perf config: bf16 MXU operands (full-rate MXU path), checked against a
    #    reference that casts the same matmul operands to bf16.
    out_bf = jax.block_until_ready(bilstm_forward(params, sketch_seq,
                                                  matmul_dtype=jnp.bfloat16))
    ref_bf = jax.block_until_ready(bilstm_forward_ref(params, sketch_seq,
                                                      jnp.bfloat16))
    assert jnp.allclose(out_bf, ref_bf, rtol=1e-2, atol=1e-3), \
        f"bf16 max abs err {jnp.max(jnp.abs(out_bf - ref_bf))}"

    print("KERNEL_OK")
</pallas_src>

<mosaic_0001>
module attributes {stable_mosaic.version = 11 : i64} {
  func.func @_fused_bilstm_kernel(%arg0: i32, %arg1: memref<8x8x64xf32, #tpu.memory_space<vmem>>, %arg2: memref<64x256xf32, #tpu.memory_space<vmem>>, %arg3: memref<64x256xf32, #tpu.memory_space<vmem>>, %arg4: memref<1x256xf32, #tpu.memory_space<vmem>>, %arg5: memref<64x256xf32, #tpu.memory_space<vmem>>, %arg6: memref<64x256xf32, #tpu.memory_space<vmem>>, %arg7: memref<1x256xf32, #tpu.memory_space<vmem>>, %arg8: memref<1x64xf32, #tpu.memory_space<vmem>>, %arg9: memref<8x8x64xf32, #tpu.memory_space<vmem>>, %arg10: memref<64x64xf32, #tpu.memory_space<vmem>>) attributes {dimension_semantics = [#tpu.dimension_semantics<parallel>], iteration_bounds = array<i64: 1>, scalar_prefetch = 0 : i64, scratch_operands = 1 : i64, tpu.core_type = #tpu.core_type<tc>, window_params = [{transform_indices = @transform_0, window_bounds = array<i64: 8, 8, 64>}, {pipeline_mode = #tpu.pipeline_mode<synchronous>, transform_indices = @transform_1, window_bounds = array<i64: 64, 256>}, {pipeline_mode = #tpu.pipeline_mode<synchronous>, transform_indices = @transform_2, window_bounds = array<i64: 64, 256>}, {pipeline_mode = #tpu.pipeline_mode<synchronous>, transform_indices = @transform_3, window_bounds = array<i64: 1, 256>}, {pipeline_mode = #tpu.pipeline_mode<synchronous>, transform_indices = @transform_4, window_bounds = array<i64: 64, 256>}, {pipeline_mode = #tpu.pipeline_mode<synchronous>, transform_indices = @transform_5, window_bounds = array<i64: 64, 256>}, {pipeline_mode = #tpu.pipeline_mode<synchronous>, transform_indices = @transform_6, window_bounds = array<i64: 1, 256>}, {pipeline_mode = #tpu.pipeline_mode<synchronous>, transform_indices = @transform_7, window_bounds = array<i64: 1, 64>}, {transform_indices = @transform_8, window_bounds = array<i64: 8, 8, 64>}]} {
    "tpu.region"() ({
      %alloca = memref.alloca() : memref<64x256xf32, #tpu.memory_space<vmem>>
      %c0 = arith.constant 0 : index
      %c0_0 = arith.constant 0 : index
      %c0_1 = arith.constant 0 : index
      %0 = vector.load %arg1[%c0, %c0_0, %c0_1] : memref<8x8x64xf32, #tpu.memory_space<vmem>>, vector<8x8x64xf32>
      %1 = vector.shape_cast %0 : vector<8x8x64xf32> to vector<64x64xf32>
      %c0_2 = arith.constant 0 : index
      %c0_3 = arith.constant 0 : index
      %2 = vector.load %arg2[%c0_2, %c0_3] : memref<64x256xf32, #tpu.memory_space<vmem>>, vector<64x256xf32>
      %cst = arith.constant dense<0.000000e+00> : vector<64x256xf32>
      %3 = tpu.matmul %1, %2, %cst {dimension_numbers = #tpu.dot_dimension_numbers<[1], [0], [0], [1], [0, 0, 1, 1], [], []>} : vector<64x64xf32>, vector<64x256xf32>, vector<64x256xf32> -> vector<64x256xf32>
      %c0_4 = arith.constant 0 : index
      %c0_5 = arith.constant 0 : index
      %4 = vector.load %arg4[%c0_4, %c0_5] : memref<1x256xf32, #tpu.memory_space<vmem>>, vector<1x256xf32>
      %5 = vector.broadcast %4 : vector<1x256xf32> to vector<64x256xf32>
      %6 = arith.addf %3, %5 : vector<64x256xf32>
      %c0_6 = arith.constant 0 : index
      %c0_7 = arith.constant 0 : index
      %7 = vector.load %alloca[%c0_6, %c0_7] : memref<64x256xf32, #tpu.memory_space<vmem>>, vector<64x256xf32>
      tpu.vector_store %alloca[%c0_6, %c0_7], %6 {strides = array<i32>} : memref<64x256xf32, #tpu.memory_space<vmem>>, vector<64x256xf32>,
      %8 = tpu.iota {dimensions = array<i32: 1>} : vector<1x256xi32>
      %c64_i32 = arith.constant 64 : i32
      %c0_i32 = arith.constant 0 : i32
      %9 = arith.cmpi eq, %c64_i32, %c0_i32 : i32
      %c1_i32 = arith.constant 1 : i32
      %10 = arith.select %9, %c1_i32, %c64_i32 : i32
      %11 = vector.broadcast %10 : i32 to vector<1x256xi32>
      %12 = arith.remsi %8, %11 : vector<1x256xi32>
      %c0_i32_8 = arith.constant 0 : i32
      %13 = vector.broadcast %c0_i32_8 : i32 to vector<1x256xi32>
      %14 = arith.cmpi ne, %12, %13 : vector<1x256xi32>
      %c0_i32_9 = arith.constant 0 : i32
      %15 = vector.broadcast %c0_i32_9 : i32 to vector<1x256xi32>
      %16 = arith.cmpi slt, %12, %15 : vector<1x256xi32>
      %c0_i32_10 = arith.constant 0 : i32
      %17 = arith.cmpi slt, %10, %c0_i32_10 : i32
      %18 = vector.broadcast %17 : i1 to vector<1x256xi1>
      %19 = vector.broadcast %18 : vector<1x256xi1> to vector<1x256xi1>
      %20 = arith.xori %16, %19 : vector<1x256xi1>
      %21 = arith.andi %20, %14 : vector<1x256xi1>
      %22 = vector.broadcast %10 : i32 to vector<1x256xi32>
      %23 = arith.addi %12, %22 : vector<1x256xi32>
      %24 = arith.select %21, %23, %12 : vector<1x256xi1>, vector<1x256xi32>
      %c32_i32 = arith.constant 32 : i32
      %25 = vector.broadcast %c32_i32 : i32 to vector<1x256xi32>
      %26 = arith.cmpi slt, %24, %25 : vector<1x256xi32>
      %c0_11 = arith.constant 0 : index
      %c0_12 = arith.constant 0 : index
      %27 = vector.load %alloca[%c0_11, %c0_12] : memref<64x256xf32, #tpu.memory_space<vmem>>, vector<8x256xf32>
      %c56 = arith.constant 56 : index
      %c0_13 = arith.constant 0 : index
      %28 = vector.load %alloca[%c56, %c0_13] : memref<64x256xf32, #tpu.memory_space<vmem>>, vector<8x256xf32>
      %29 = vector.shape_cast %26 : vector<1x256xi1> to vector<1x256xi1>
      %30 = vector.broadcast %29 : vector<1x256xi1> to vector<8x256xi1>
      %31 = arith.select %30, %27, %28 : vector<8x256xi1>, vector<8x256xf32>
      %c0_14 = arith.constant 0 : index
      %c0_15 = arith.constant 0 : index
      %32 = vector.load %alloca[%c0_14, %c0_15] : memref<64x256xf32, #tpu.memory_space<vmem>>, vector<8x256xf32>
      tpu.vector_store %alloca[%c0_14, %c0_15], %31 {strides = array<i32>} : memref<64x256xf32, #tpu.memory_space<vmem>>, vector<8x256xf32>,
      %33 = vector.shape_cast %26 : vector<1x256xi1> to vector<1x256xi1>
      %34 = vector.broadcast %33 : vector<1x256xi1> to vector<8x256xi1>
      %35 = arith.select %34, %28, %27 : vector<8x256xi1>, vector<8x256xf32>
      %c56_16 = arith.constant 56 : index
      %c0_17 = arith.constant 0 : index
      %36 = vector.load %alloca[%c56_16, %c0_17] : memref<64x256xf32, #tpu.memory_space<vmem>>, vector<8x256xf32>
      tpu.vector_store %alloca[%c56_16, %c0_17], %35 {strides = array<i32>} : memref<64x256xf32, #tpu.memory_space<vmem>>, vector<8x256xf32>,
      %c8 = arith.constant 8 : index
      %c0_18 = arith.constant 0 : index
      %37 = vector.load %alloca[%c8, %c0_18] : memref<64x256xf32, #tpu.memory_space<vmem>>, vector<8x256xf32>
      %c48 = arith.constant 48 : index
      %c0_19 = arith.constant 0 : index
      %38 = vector.load %alloca[%c48, %c0_19] : memref<64x256xf32, #tpu.memory_space<vmem>>, vector<8x256xf32>
      %39 = vector.shape_cast %26 : vector<1x256xi1> to vector<1x256xi1>
      %40 = vector.broadcast %39 : vector<1x256xi1> to vector<8x256xi1>
      %41 = arith.select %40, %37, %38 : vector<8x256xi1>, vector<8x256xf32>
      %c8_20 = arith.constant 8 : index
      %c0_21 = arith.constant 0 : index
      %42 = vector.load %alloca[%c8_20, %c0_21] : memref<64x256xf32, #tpu.memory_space<vmem>>, vector<8x256xf32>
      tpu.vector_store %alloca[%c8_20, %c0_21], %41 {strides = array<i32>} : memref<64x256xf32, #tpu.memory_space<vmem>>, vector<8x256xf32>,
      %43 = vector.shape_cast %26 : vector<1x256xi1> to vector<1x256xi1>
      %44 = vector.broadcast %43 : vector<1x256xi1> to vector<8x256xi1>
      %45 = arith.select %44, %38, %37 : vector<8x256xi1>, vector<8x256xf32>
      %c48_22 = arith.constant 48 : index
      %c0_23 = arith.constant 0 : index
      %46 = vector.load %alloca[%c48_22, %c0_23] : memref<64x256xf32, #tpu.memory_space<vmem>>, vector<8x256xf32>
      tpu.vector_store %alloca[%c48_22, %c0_23], %45 {strides = array<i32>} : memref<64x256xf32, #tpu.memory_space<vmem>>, vector<8x256xf32>,
      %c16 = arith.constant 16 : index
      %c0_24 = arith.constant 0 : index
      %47 = vector.load %alloca[%c16, %c0_24] : memref<64x256xf32, #tpu.memory_space<vmem>>, vector<8x256xf32>
      %c40 = arith.constant 40 : index
      %c0_25 = arith.constant 0 : index
      %48 = vector.load %alloca[%c40, %c0_25] : memref<64x256xf32, #tpu.memory_space<vmem>>, vector<8x256xf32>
      %49 = vector.shape_cast %26 : vector<1x256xi1> to vector<1x256xi1>
      %50 = vector.broadcast %49 : vector<1x256xi1> to vector<8x256xi1>
      %51 = arith.select %50, %47, %48 : vector<8x256xi1>, vector<8x256xf32>
      %c16_26 = arith.constant 16 : index
      %c0_27 = arith.constant 0 : index
      %52 = vector.load %alloca[%c16_26, %c0_27] : memref<64x256xf32, #tpu.memory_space<vmem>>, vector<8x256xf32>
      tpu.vector_store %alloca[%c16_26, %c0_27], %51 {strides = array<i32>} : memref<64x256xf32, #tpu.memory_space<vmem>>, vector<8x256xf32>,
      %53 = vector.shape_cast %26 : vector<1x256xi1> to vector<1x256xi1>
      %54 = vector.broadcast %53 : vector<1x256xi1> to vector<8x256xi1>
      %55 = arith.select %54, %48, %47 : vector<8x256xi1>, vector<8x256xf32>
      %c40_28 = arith.constant 40 : index
      %c0_29 = arith.constant 0 : index
      %56 = vector.load %alloca[%c40_28, %c0_29] : memref<64x256xf32, #tpu.memory_space<vmem>>, vector<8x256xf32>
      tpu.vector_store %alloca[%c40_28, %c0_29], %55 {strides = array<i32>} : memref<64x256xf32, #tpu.memory_space<vmem>>, vector<8x256xf32>,
      %c24 = arith.constant 24 : index
      %c0_30 = arith.constant 0 : index
      %57 = vector.load %alloca[%c24, %c0_30] : memref<64x256xf32, #tpu.memory_space<vmem>>, vector<8x256xf32>
      %c32 = arith.constant 32 : index
      %c0_31 = arith.constant 0 : index
      %58 = vector.load %alloca[%c32, %c0_31] : memref<64x256xf32, #tpu.memory_space<vmem>>, vector<8x256xf32>
      %59 = vector.shape_cast %26 : vector<1x256xi1> to vector<1x256xi1>
      %60 = vector.broadcast %59 : vector<1x256xi1> to vector<8x256xi1>
      %61 = arith.select %60, %57, %58 : vector<8x256xi1>, vector<8x256xf32>
      %c24_32 = arith.constant 24 : index
      %c0_33 = arith.constant 0 : index
      %62 = vector.load %alloca[%c24_32, %c0_33] : memref<64x256xf32, #tpu.memory_space<vmem>>, vector<8x256xf32>
      tpu.vector_store %alloca[%c24_32, %c0_33], %61 {strides = array<i32>} : memref<64x256xf32, #tpu.memory_space<vmem>>, vector<8x256xf32>,
      %63 = vector.shape_cast %26 : vector<1x256xi1> to vector<1x256xi1>
      %64 = vector.broadcast %63 : vector<1x256xi1> to vector<8x256xi1>
      %65 = arith.select %64, %58, %57 : vector<8x256xi1>, vector<8x256xf32>
      %c32_34 = arith.constant 32 : index
      %c0_35 = arith.constant 0 : index
      %66 = vector.load %alloca[%c32_34, %c0_35] : memref<64x256xf32, #tpu.memory_space<vmem>>, vector<8x256xf32>
      tpu.vector_store %alloca[%c32_34, %c0_35], %65 {strides = array<i32>} : memref<64x256xf32, #tpu.memory_space<vmem>>, vector<8x256xf32>,
      %c0_36 = arith.constant 0 : index
      %c0_37 = arith.constant 0 : index
      %67 = vector.load %arg3[%c0_36, %c0_37] : memref<64x256xf32, #tpu.memory_space<vmem>>, vector<64x256xf32>
      %cst_38 = arith.constant 0.000000e+00 : f32
      %68 = vector.broadcast %cst_38 : f32 to vector<8x64xf32>
      %cst_39 = arith.constant 0.000000e+00 : f32
      %69 = vector.broadcast %cst_39 : f32 to vector<8x64xf32>
      %c0_40 = arith.constant 0 : index
      %c0_41 = arith.constant 0 : index
      %70 = vector.load %alloca[%c0_40, %c0_41] : memref<64x256xf32, #tpu.memory_space<vmem>>, vector<8x256xf32>
      %cst_42 = arith.constant dense<0.000000e+00> : vector<8x256xf32>
      %71 = tpu.matmul %68, %67, %cst_42 {dimension_numbers = #tpu.dot_dimension_numbers<[1], [0], [0], [1], [0, 0, 1, 1], [], []>} : vector<8x64xf32>, vector<64x256xf32>, vector<8x256xf32> -> vector<8x256xf32>
      %72 = arith.addf %70, %71 : vector<8x256xf32>
      %73 = arith.negf %72 : vector<8x256xf32>
      %74 = math.exp %73 : vector<8x256xf32>
      %cst_43 = arith.constant 1.000000e+00 : f32
      %75 = vector.broadcast %cst_43 : f32 to vector<8x256xf32>
      %76 = arith.addf %75, %74 : vector<8x256xf32>
      %77 = arith.divf %75, %76 : vector<8x256xf32>
      %78 = vector.extract_strided_slice %77 {offsets = [0, 0], sizes = [8, 64], strides = [1, 1]} : vector<8x256xf32> to vector<8x64xf32>
      %79 = vector.extract_strided_slice %77 {offsets = [0, 64], sizes = [8, 64], strides = [1, 1]} : vector<8x256xf32> to vector<8x64xf32>
      %80 = vector.extract_strided_slice %77 {offsets = [0, 128], sizes = [8, 64], strides = [1, 1]} : vector<8x256xf32> to vector<8x64xf32>
      %cst_44 = arith.constant 2.000000e+00 : f32
      %81 = vector.broadcast %cst_44 : f32 to vector<8x64xf32>
      %82 = arith.mulf %81, %80 : vector<8x64xf32>
      %cst_45 = arith.constant 1.000000e+00 : f32
      %83 = vector.broadcast %cst_45 : f32 to vector<8x64xf32>
      %84 = arith.subf %82, %83 : vector<8x64xf32>
      %85 = vector.extract_strided_slice %77 {offsets = [0, 192], sizes = [8, 64], strides = [1, 1]} : vector<8x256xf32> to vector<8x64xf32>
      %86 = arith.mulf %79, %69 : vector<8x64xf32>
      %87 = arith.mulf %78, %84 : vector<8x64xf32>
      %88 = arith.addf %86, %87 : vector<8x64xf32>
      %89 = math.tanh %88 : vector<8x64xf32>
      %90 = arith.mulf %85, %89 : vector<8x64xf32>
      %c0_46 = arith.constant 0 : index
      %c0_47 = arith.constant 0 : index
      %91 = vector.load %arg10[%c0_46, %c0_47] : memref<64x64xf32, #tpu.memory_space<vmem>>, vector<8x64xf32>
      tpu.vector_store %arg10[%c0_46, %c0_47], %90 {strides = array<i32>} : memref<64x64xf32, #tpu.memory_space<vmem>>, vector<8x64xf32>,
      %c8_48 = arith.constant 8 : index
      %c0_49 = arith.constant 0 : index
      %92 = vector.load %alloca[%c8_48, %c0_49] : memref<64x256xf32, #tpu.memory_space<vmem>>, vector<8x256xf32>
      %cst_50 = arith.constant dense<0.000000e+00> : vector<8x256xf32>
      %93 = tpu.matmul %90, %67, %cst_50 {dimension_numbers = #tpu.dot_dimension_numbers<[1], [0], [0], [1], [0, 0, 1, 1], [], []>} : vector<8x64xf32>, vector<64x256xf32>, vector<8x256xf32> -> vector<8x256xf32>
      %94 = arith.addf %92, %93 : vector<8x256xf32>
      %95 = arith.negf %94 : vector<8x256xf32>
      %96 = math.exp %95 : vector<8x256xf32>
      %cst_51 = arith.constant 1.000000e+00 : f32
      %97 = vector.broadcast %cst_51 : f32 to vector<8x256xf32>
      %98 = arith.addf %97, %96 : vector<8x256xf32>
      %99 = arith.divf %97, %98 : vector<8x256xf32>
      %100 = vector.extract_strided_slice %99 {offsets = [0, 0], sizes = [8, 64], strides = [1, 1]} : vector<8x256xf32> to vector<8x64xf32>
      %101 = vector.extract_strided_slice %99 {offsets = [0, 64], sizes = [8, 64], strides = [1, 1]} : vector<8x256xf32> to vector<8x64xf32>
      %102 = vector.extract_strided_slice %99 {offsets = [0, 128], sizes = [8, 64], strides = [1, 1]} : vector<8x256xf32> to vector<8x64xf32>
      %cst_52 = arith.constant 2.000000e+00 : f32
      %103 = vector.broadcast %cst_52 : f32 to vector<8x64xf32>
      %104 = arith.mulf %103, %102 : vector<8x64xf32>
      %cst_53 = arith.constant 1.000000e+00 : f32
      %105 = vector.broadcast %cst_53 : f32 to vector<8x64xf32>
      %106 = arith.subf %104, %105 : vector<8x64xf32>
      %107 = vector.extract_strided_slice %99 {offsets = [0, 192], sizes = [8, 64], strides = [1, 1]} : vector<8x256xf32> to vector<8x64xf32>
      %108 = arith.mulf %101, %88 : vector<8x64xf32>
      %109 = arith.mulf %100, %106 : vector<8x64xf32>
      %110 = arith.addf %108, %109 : vector<8x64xf32>
      %111 = math.tanh %110 : vector<8x64xf32>
      %112 = arith.mulf %107, %111 : vector<8x64xf32>
      %c8_54 = arith.constant 8 : index
      %c0_55 = arith.constant 0 : index
      %113 = vector.load %arg10[%c8_54, %c0_55] : memref<64x64xf32, #tpu.memory_space<vmem>>, vector<8x64xf32>
      tpu.vector_store %arg10[%c8_54, %c0_55], %112 {strides = array<i32>} : memref<64x64xf32, #tpu.memory_space<vmem>>, vector<8x64xf32>,
      %c16_56 = arith.constant 16 : index
      %c0_57 = arith.constant 0 : index
      %114 = vector.load %alloca[%c16_56, %c0_57] : memref<64x256xf32, #tpu.memory_space<vmem>>, vector<8x256xf32>
      %cst_58 = arith.constant dense<0.000000e+00> : vector<8x256xf32>
      %115 = tpu.matmul %112, %67, %cst_58 {dimension_numbers = #tpu.dot_dimension_numbers<[1], [0], [0], [1], [0, 0, 1, 1], [], []>} : vector<8x64xf32>, vector<64x256xf32>, vector<8x256xf32> -> vector<8x256xf32>
      %116 = arith.addf %114, %115 : vector<8x256xf32>
      %117 = arith.negf %116 : vector<8x256xf32>
      %118 = math.exp %117 : vector<8x256xf32>
      %cst_59 = arith.constant 1.000000e+00 : f32
      %119 = vector.broadcast %cst_59 : f32 to vector<8x256xf32>
      %120 = arith.addf %119, %118 : vector<8x256xf32>
      %121 = arith.divf %119, %120 : vector<8x256xf32>
      %122 = vector.extract_strided_slice %121 {offsets = [0, 0], sizes = [8, 64], strides = [1, 1]} : vector<8x256xf32> to vector<8x64xf32>
      %123 = vector.extract_strided_slice %121 {offsets = [0, 64], sizes = [8, 64], strides = [1, 1]} : vector<8x256xf32> to vector<8x64xf32>
      %124 = vector.extract_strided_slice %121 {offsets = [0, 128], sizes = [8, 64], strides = [1, 1]} : vector<8x256xf32> to vector<8x64xf32>
      %cst_60 = arith.constant 2.000000e+00 : f32
      %125 = vector.broadcast %cst_60 : f32 to vector<8x64xf32>
      %126 = arith.mulf %125, %124 : vector<8x64xf32>
      %cst_61 = arith.constant 1.000000e+00 : f32
      %127 = vector.broadcast %cst_61 : f32 to vector<8x64xf32>
      %128 = arith.subf %126, %127 : vector<8x64xf32>
      %129 = vector.extract_strided_slice %121 {offsets = [0, 192], sizes = [8, 64], strides = [1, 1]} : vector<8x256xf32> to vector<8x64xf32>
      %130 = arith.mulf %123, %110 : vector<8x64xf32>
      %131 = arith.mulf %122, %128 : vector<8x64xf32>
      %132 = arith.addf %130, %131 : vector<8x64xf32>
      %133 = math.tanh %132 : vector<8x64xf32>
      %134 = arith.mulf %129, %133 : vector<8x64xf32>
      %c16_62 = arith.constant 16 : index
      %c0_63 = arith.constant 0 : index
      %135 = vector.load %arg10[%c16_62, %c0_63] : memref<64x64xf32, #tpu.memory_space<vmem>>, vector<8x64xf32>
      tpu.vector_store %arg10[%c16_62, %c0_63], %134 {strides = array<i32>} : memref<64x64xf32, #tpu.memory_space<vmem>>, vector<8x64xf32>,
      %c24_64 = arith.constant 24 : index
      %c0_65 = arith.constant 0 : index
      %136 = vector.load %alloca[%c24_64, %c0_65] : memref<64x256xf32, #tpu.memory_space<vmem>>, vector<8x256xf32>
      %cst_66 = arith.constant dense<0.000000e+00> : vector<8x256xf32>
      %137 = tpu.matmul %134, %67, %cst_66 {dimension_numbers = #tpu.dot_dimension_numbers<[1], [0], [0], [1], [0, 0, 1, 1], [], []>} : vector<8x64xf32>, vector<64x256xf32>, vector<8x256xf32> -> vector<8x256xf32>
      %138 = arith.addf %136, %137 : vector<8x256xf32>
      %139 = arith.negf %138 : vector<8x256xf32>
      %140 = math.exp %139 : vector<8x256xf32>
      %cst_67 = arith.constant 1.000000e+00 : f32
      %141 = vector.broadcast %cst_67 : f32 to vector<8x256xf32>
      %142 = arith.addf %141, %140 : vector<8x256xf32>
      %143 = arith.divf %141, %142 : vector<8x256xf32>
      %144 = vector.extract_strided_slice %143 {offsets = [0, 0], sizes = [8, 64], strides = [1, 1]} : vector<8x256xf32> to vector<8x64xf32>
      %145 = vector.extract_strided_slice %143 {offsets = [0, 64], sizes = [8, 64], strides = [1, 1]} : vector<8x256xf32> to vector<8x64xf32>
      %146 = vector.extract_strided_slice %143 {offsets = [0, 128], sizes = [8, 64], strides = [1, 1]} : vector<8x256xf32> to vector<8x64xf32>
      %cst_68 = arith.constant 2.000000e+00 : f32
      %147 = vector.broadcast %cst_68 : f32 to vector<8x64xf32>
      %148 = arith.mulf %147, %146 : vector<8x64xf32>
      %cst_69 = arith.constant 1.000000e+00 : f32
      %149 = vector.broadcast %cst_69 : f32 to vector<8x64xf32>
      %150 = arith.subf %148, %149 : vector<8x64xf32>
      %151 = vector.extract_strided_slice %143 {offsets = [0, 192], sizes = [8, 64], strides = [1, 1]} : vector<8x256xf32> to vector<8x64xf32>
      %152 = arith.mulf %145, %132 : vector<8x64xf32>
      %153 = arith.mulf %144, %150 : vector<8x64xf32>
      %154 = arith.addf %152, %153 : vector<8x64xf32>
      %155 = math.tanh %154 : vector<8x64xf32>
      %156 = arith.mulf %151, %155 : vector<8x64xf32>
      %c24_70 = arith.constant 24 : index
      %c0_71 = arith.constant 0 : index
      %157 = vector.load %arg10[%c24_70, %c0_71] : memref<64x64xf32, #tpu.memory_space<vmem>>, vector<8x64xf32>
      tpu.vector_store %arg10[%c24_70, %c0_71], %156 {strides = array<i32>} : memref<64x64xf32, #tpu.memory_space<vmem>>, vector<8x64xf32>,
      %c32_72 = arith.constant 32 : index
      %c0_73 = arith.constant 0 : index
      %158 = vector.load %alloca[%c32_72, %c0_73] : memref<64x256xf32, #tpu.memory_space<vmem>>, vector<8x256xf32>
      %cst_74 = arith.constant dense<0.000000e+00> : vector<8x256xf32>
      %159 = tpu.matmul %156, %67, %cst_74 {dimension_numbers = #tpu.dot_dimension_numbers<[1], [0], [0], [1], [0, 0, 1, 1], [], []>} : vector<8x64xf32>, vector<64x256xf32>, vector<8x256xf32> -> vector<8x256xf32>
      %160 = arith.addf %158, %159 : vector<8x256xf32>
      %161 = arith.negf %160 : vector<8x256xf32>
      %162 = math.exp %161 : vector<8x256xf32>
      %cst_75 = arith.constant 1.000000e+00 : f32
      %163 = vector.broadcast %cst_75 : f32 to vector<8x256xf32>
      %164 = arith.addf %163, %162 : vector<8x256xf32>
      %165 = arith.divf %163, %164 : vector<8x256xf32>
      %166 = vector.extract_strided_slice %165 {offsets = [0, 0], sizes = [8, 64], strides = [1, 1]} : vector<8x256xf32> to vector<8x64xf32>
      %167 = vector.extract_strided_slice %165 {offsets = [0, 64], sizes = [8, 64], strides = [1, 1]} : vector<8x256xf32> to vector<8x64xf32>
      %168 = vector.extract_strided_slice %165 {offsets = [0, 128], sizes = [8, 64], strides = [1, 1]} : vector<8x256xf32> to vector<8x64xf32>
      %cst_76 = arith.constant 2.000000e+00 : f32
      %169 = vector.broadcast %cst_76 : f32 to vector<8x64xf32>
      %170 = arith.mulf %169, %168 : vector<8x64xf32>
      %cst_77 = arith.constant 1.000000e+00 : f32
      %171 = vector.broadcast %cst_77 : f32 to vector<8x64xf32>
      %172 = arith.subf %170, %171 : vector<8x64xf32>
      %173 = vector.extract_strided_slice %165 {offsets = [0, 192], sizes = [8, 64], strides = [1, 1]} : vector<8x256xf32> to vector<8x64xf32>
      %174 = arith.mulf %167, %154 : vector<8x64xf32>
      %175 = arith.mulf %166, %172 : vector<8x64xf32>
      %176 = arith.addf %174, %175 : vector<8x64xf32>
      %177 = math.tanh %176 : vector<8x64xf32>
      %178 = arith.mulf %173, %177 : vector<8x64xf32>
      %c32_78 = arith.constant 32 : index
      %c0_79 = arith.constant 0 : index
      %179 = vector.load %arg10[%c32_78, %c0_79] : memref<64x64xf32, #tpu.memory_space<vmem>>, vector<8x64xf32>
      tpu.vector_store %arg10[%c32_78, %c0_79], %178 {strides = array<i32>} : memref<64x64xf32, #tpu.memory_space<vmem>>, vector<8x64xf32>,
      %c40_80 = arith.constant 40 : index
      %c0_81 = arith.constant 0 : index
      %180 = vector.load %alloca[%c40_80, %c0_81] : memref<64x256xf32, #tpu.memory_space<vmem>>, vector<8x256xf32>
      %cst_82 = arith.constant dense<0.000000e+00> : vector<8x256xf32>
      %181 = tpu.matmul %178, %67, %cst_82 {dimension_numbers = #tpu.dot_dimension_numbers<[1], [0], [0], [1], [0, 0, 1, 1], [], []>} : vector<8x64xf32>, vector<64x256xf32>, vector<8x256xf32> -> vector<8x256xf32>
      %182 = arith.addf %180, %181 : vector<8x256xf32>
      %183 = arith.negf %182 : vector<8x256xf32>
      %184 = math.exp %183 : vector<8x256xf32>
      %cst_83 = arith.constant 1.000000e+00 : f32
      %185 = vector.broadcast %cst_83 : f32 to vector<8x256xf32>
      %186 = arith.addf %185, %184 : vector<8x256xf32>
      %187 = arith.divf %185, %186 : vector<8x256xf32>
      %188 = vector.extract_strided_slice %187 {offsets = [0, 0], sizes = [8, 64], strides = [1, 1]} : vector<8x256xf32> to vector<8x64xf32>
      %189 = vector.extract_strided_slice %187 {offsets = [0, 64], sizes = [8, 64], strides = [1, 1]} : vector<8x256xf32> to vector<8x64xf32>
      %190 = vector.extract_strided_slice %187 {offsets = [0, 128], sizes = [8, 64], strides = [1, 1]} : vector<8x256xf32> to vector<8x64xf32>
      %cst_84 = arith.constant 2.000000e+00 : f32
      %191 = vector.broadcast %cst_84 : f32 to vector<8x64xf32>
      %192 = arith.mulf %191, %190 : vector<8x64xf32>
      %cst_85 = arith.constant 1.000000e+00 : f32
      %193 = vector.broadcast %cst_85 : f32 to vector<8x64xf32>
      %194 = arith.subf %192, %193 : vector<8x64xf32>
      %195 = vector.extract_strided_slice %187 {offsets = [0, 192], sizes = [8, 64], strides = [1, 1]} : vector<8x256xf32> to vector<8x64xf32>
      %196 = arith.mulf %189, %176 : vector<8x64xf32>
      %197 = arith.mulf %188, %194 : vector<8x64xf32>
      %198 = arith.addf %196, %197 : vector<8x64xf32>
      %199 = math.tanh %198 : vector<8x64xf32>
      %200 = arith.mulf %195, %199 : vector<8x64xf32>
      %c40_86 = arith.constant 40 : index
      %c0_87 = arith.constant 0 : index
      %201 = vector.load %arg10[%c40_86, %c0_87] : memref<64x64xf32, #tpu.memory_space<vmem>>, vector<8x64xf32>
      tpu.vector_store %arg10[%c40_86, %c0_87], %200 {strides = array<i32>} : memref<64x64xf32, #tpu.memory_space<vmem>>, vector<8x64xf32>,
      %c48_88 = arith.constant 48 : index
      %c0_89 = arith.constant 0 : index
      %202 = vector.load %alloca[%c48_88, %c0_89] : memref<64x256xf32, #tpu.memory_space<vmem>>, vector<8x256xf32>
      %cst_90 = arith.constant dense<0.000000e+00> : vector<8x256xf32>
      %203 = tpu.matmul %200, %67, %cst_90 {dimension_numbers = #tpu.dot_dimension_numbers<[1], [0], [0], [1], [0, 0, 1, 1], [], []>} : vector<8x64xf32>, vector<64x256xf32>, vector<8x256xf32> -> vector<8x256xf32>
      %204 = arith.addf %202, %203 : vector<8x256xf32>
      %205 = arith.negf %204 : vector<8x256xf32>
      %206 = math.exp %205 : vector<8x256xf32>
      %cst_91 = arith.constant 1.000000e+00 : f32
      %207 = vector.broadcast %cst_91 : f32 to vector<8x256xf32>
      %208 = arith.addf %207, %206 : vector<8x256xf32>
      %209 = arith.divf %207, %208 : vector<8x256xf32>
      %210 = vector.extract_strided_slice %209 {offsets = [0, 0], sizes = [8, 64], strides = [1, 1]} : vector<8x256xf32> to vector<8x64xf32>
      %211 = vector.extract_strided_slice %209 {offsets = [0, 64], sizes = [8, 64], strides = [1, 1]} : vector<8x256xf32> to vector<8x64xf32>
      %212 = vector.extract_strided_slice %209 {offsets = [0, 128], sizes = [8, 64], strides = [1, 1]} : vector<8x256xf32> to vector<8x64xf32>
      %cst_92 = arith.constant 2.000000e+00 : f32
      %213 = vector.broadcast %cst_92 : f32 to vector<8x64xf32>
      %214 = arith.mulf %213, %212 : vector<8x64xf32>
      %cst_93 = arith.constant 1.000000e+00 : f32
      %215 = vector.broadcast %cst_93 : f32 to vector<8x64xf32>
      %216 = arith.subf %214, %215 : vector<8x64xf32>
      %217 = vector.extract_strided_slice %209 {offsets = [0, 192], sizes = [8, 64], strides = [1, 1]} : vector<8x256xf32> to vector<8x64xf32>
      %218 = arith.mulf %211, %198 : vector<8x64xf32>
      %219 = arith.mulf %210, %216 : vector<8x64xf32>
      %220 = arith.addf %218, %219 : vector<8x64xf32>
      %221 = math.tanh %220 : vector<8x64xf32>
      %222 = arith.mulf %217, %221 : vector<8x64xf32>
      %c48_94 = arith.constant 48 : index
      %c0_95 = arith.constant 0 : index
      %223 = vector.load %arg10[%c48_94, %c0_95] : memref<64x64xf32, #tpu.memory_space<vmem>>, vector<8x64xf32>
      tpu.vector_store %arg10[%c48_94, %c0_95], %222 {strides = array<i32>} : memref<64x64xf32, #tpu.memory_space<vmem>>, vector<8x64xf32>,
      %c56_96 = arith.constant 56 : index
      %c0_97 = arith.constant 0 : index
      %224 = vector.load %alloca[%c56_96, %c0_97] : memref<64x256xf32, #tpu.memory_space<vmem>>, vector<8x256xf32>
      %cst_98 = arith.constant dense<0.000000e+00> : vector<8x256xf32>
      %225 = tpu.matmul %222, %67, %cst_98 {dimension_numbers = #tpu.dot_dimension_numbers<[1], [0], [0], [1], [0, 0, 1, 1], [], []>} : vector<8x64xf32>, vector<64x256xf32>, vector<8x256xf32> -> vector<8x256xf32>
      %226 = arith.addf %224, %225 : vector<8x256xf32>
      %227 = arith.negf %226 : vector<8x256xf32>
      %228 = math.exp %227 : vector<8x256xf32>
      %cst_99 = arith.constant 1.000000e+00 : f32
      %229 = vector.broadcast %cst_99 : f32 to vector<8x256xf32>
      %230 = arith.addf %229, %228 : vector<8x256xf32>
      %231 = arith.divf %229, %230 : vector<8x256xf32>
      %232 = vector.extract_strided_slice %231 {offsets = [0, 0], sizes = [8, 64], strides = [1, 1]} : vector<8x256xf32> to vector<8x64xf32>
      %233 = vector.extract_strided_slice %231 {offsets = [0, 64], sizes = [8, 64], strides = [1, 1]} : vector<8x256xf32> to vector<8x64xf32>
      %234 = vector.extract_strided_slice %231 {offsets = [0, 128], sizes = [8, 64], strides = [1, 1]} : vector<8x256xf32> to vector<8x64xf32>
      %cst_100 = arith.constant 2.000000e+00 : f32
      %235 = vector.broadcast %cst_100 : f32 to vector<8x64xf32>
      %236 = arith.mulf %235, %234 : vector<8x64xf32>
      %cst_101 = arith.constant 1.000000e+00 : f32
      %237 = vector.broadcast %cst_101 : f32 to vector<8x64xf32>
      %238 = arith.subf %236, %237 : vector<8x64xf32>
      %239 = vector.extract_strided_slice %231 {offsets = [0, 192], sizes = [8, 64], strides = [1, 1]} : vector<8x256xf32> to vector<8x64xf32>
      %240 = arith.mulf %233, %220 : vector<8x64xf32>
      %241 = arith.mulf %232, %238 : vector<8x64xf32>
      %242 = arith.addf %240, %241 : vector<8x64xf32>
      %243 = math.tanh %242 : vector<8x64xf32>
      %244 = arith.mulf %239, %243 : vector<8x64xf32>
      %c56_102 = arith.constant 56 : index
      %c0_103 = arith.constant 0 : index
      %245 = vector.load %arg10[%c56_102, %c0_103] : memref<64x64xf32, #tpu.memory_space<vmem>>, vector<8x64xf32>
      tpu.vector_store %arg10[%c56_102, %c0_103], %244 {strides = array<i32>} : memref<64x64xf32, #tpu.memory_space<vmem>>, vector<8x64xf32>,
      %c0_104 = arith.constant 0 : index
      %c32_105 = arith.constant 32 : index
      %246 = vector.load %arg10[%c0_104, %c32_105] : memref<64x64xf32, #tpu.memory_space<vmem>>, vector<8x32xf32>
      %c56_106 = arith.constant 56 : index
      %c32_107 = arith.constant 32 : index
      %247 = vector.load %arg10[%c56_106, %c32_107] : memref<64x64xf32, #tpu.memory_space<vmem>>, vector<8x32xf32>
      %c0_108 = arith.constant 0 : index
      %c32_109 = arith.constant 32 : index
      %248 = vector.load %arg10[%c0_108, %c32_109] : memref<64x64xf32, #tpu.memory_space<vmem>>, vector<8x32xf32>
      tpu.vector_store %arg10[%c0_108, %c32_109], %247 {strides = array<i32>} : memref<64x64xf32, #tpu.memory_space<vmem>>, vector<8x32xf32>,
      %c56_110 = arith.constant 56 : index
      %c32_111 = arith.constant 32 : index
      %249 = vector.load %arg10[%c56_110, %c32_111] : memref<64x64xf32, #tpu.memory_space<vmem>>, vector<8x32xf32>
      tpu.vector_store %arg10[%c56_110, %c32_111], %246 {strides = array<i32>} : memref<64x64xf32, #tpu.memory_space<vmem>>, vector<8x32xf32>,
      %c8_112 = arith.constant 8 : index
      %c32_113 = arith.constant 32 : index
      %250 = vector.load %arg10[%c8_112, %c32_113] : memref<64x64xf32, #tpu.memory_space<vmem>>, vector<8x32xf32>
      %c48_114 = arith.constant 48 : index
      %c32_115 = arith.constant 32 : index
      %251 = vector.load %arg10[%c48_114, %c32_115] : memref<64x64xf32, #tpu.memory_space<vmem>>, vector<8x32xf32>
      %c8_116 = arith.constant 8 : index
      %c32_117 = arith.constant 32 : index
      %252 = vector.load %arg10[%c8_116, %c32_117] : memref<64x64xf32, #tpu.memory_space<vmem>>, vector<8x32xf32>
      tpu.vector_store %arg10[%c8_116, %c32_117], %251 {strides = array<i32>} : memref<64x64xf32, #tpu.memory_space<vmem>>, vector<8x32xf32>,
      %c48_118 = arith.constant 48 : index
      %c32_119 = arith.constant 32 : index
      %253 = vector.load %arg10[%c48_118, %c32_119] : memref<64x64xf32, #tpu.memory_space<vmem>>, vector<8x32xf32>
      tpu.vector_store %arg10[%c48_118, %c32_119], %250 {strides = array<i32>} : memref<64x64xf32, #tpu.memory_space<vmem>>, vector<8x32xf32>,
      %c16_120 = arith.constant 16 : index
      %c32_121 = arith.constant 32 : index
      %254 = vector.load %arg10[%c16_120, %c32_121] : memref<64x64xf32, #tpu.memory_space<vmem>>, vector<8x32xf32>
      %c40_122 = arith.constant 40 : index
      %c32_123 = arith.constant 32 : index
      %255 = vector.load %arg10[%c40_122, %c32_123] : memref<64x64xf32, #tpu.memory_space<vmem>>, vector<8x32xf32>
      %c16_124 = arith.constant 16 : index
      %c32_125 = arith.constant 32 : index
      %256 = vector.load %arg10[%c16_124, %c32_125] : memref<64x64xf32, #tpu.memory_space<vmem>>, vector<8x32xf32>
      tpu.vector_store %arg10[%c16_124, %c32_125], %255 {strides = array<i32>} : memref<64x64xf32, #tpu.memory_space<vmem>>, vector<8x32xf32>,
      %c40_126 = arith.constant 40 : index
      %c32_127 = arith.constant 32 : index
      %257 = vector.load %arg10[%c40_126, %c32_127] : memref<64x64xf32, #tpu.memory_space<vmem>>, vector<8x32xf32>
      tpu.vector_store %arg10[%c40_126, %c32_127], %254 {strides = array<i32>} : memref<64x64xf32, #tpu.memory_space<vmem>>, vector<8x32xf32>,
      %c24_128 = arith.constant 24 : index
      %c32_129 = arith.constant 32 : index
      %258 = vector.load %arg10[%c24_128, %c32_129] : memref<64x64xf32, #tpu.memory_space<vmem>>, vector<8x32xf32>
      %c32_130 = arith.constant 32 : index
      %c32_131 = arith.constant 32 : index
      %259 = vector.load %arg10[%c32_130, %c32_131] : memref<64x64xf32, #tpu.memory_space<vmem>>, vector<8x32xf32>
      %c24_132 = arith.constant 24 : index
      %c32_133 = arith.constant 32 : index
      %260 = vector.load %arg10[%c24_132, %c32_133] : memref<64x64xf32, #tpu.memory_space<vmem>>, vector<8x32xf32>
      tpu.vector_store %arg10[%c24_132, %c32_133], %259 {strides = array<i32>} : memref<64x64xf32, #tpu.memory_space<vmem>>, vector<8x32xf32>,
      %c32_134 = arith.constant 32 : index
      %c32_135 = arith.constant 32 : index
      %261 = vector.load %arg10[%c32_134, %c32_135] : memref<64x64xf32, #tpu.memory_space<vmem>>, vector<8x32xf32>
      tpu.vector_store %arg10[%c32_134, %c32_135], %258 {strides = array<i32>} : memref<64x64xf32, #tpu.memory_space<vmem>>, vector<8x32xf32>,
      tpu.yield
    }) : () -> ()
    "tpu.region"() ({
      %alloca = memref.alloca() : memref<64x256xf32, #tpu.memory_space<vmem>>
      %alloca_0 = memref.alloca() : memref<64x64xf32, #tpu.memory_space<vmem>>
      %c0 = arith.constant 0 : index
      %c0_1 = arith.constant 0 : index
      %0 = vector.load %arg10[%c0, %c0_1] : memref<64x64xf32, #tpu.memory_space<vmem>>, vector<64x64xf32>
      %c0_2 = arith.constant 0 : index
      %c0_3 = arith.constant 0 : index
      %1 = vector.load %arg5[%c0_2, %c0_3] : memref<64x256xf32, #tpu.memory_space<vmem>>, vector<64x256xf32>
      %cst = arith.constant dense<0.000000e+00> : vector<64x256xf32>
      %2 = tpu.matmul %0, %1, %cst {dimension_numbers = #tpu.dot_dimension_numbers<[1], [0], [0], [1], [0, 0, 1, 1], [], []>} : vector<64x64xf32>, vector<64x256xf32>, vector<64x256xf32> -> vector<64x256xf32>
      %c0_4 = arith.constant 0 : index
      %c0_5 = arith.constant 0 : index
      %3 = vector.load %arg7[%c0_4, %c0_5] : memref<1x256xf32, #tpu.memory_space<vmem>>, vector<1x256xf32>
      %4 = vector.broadcast %3 : vector<1x256xf32> to vector<64x256xf32>
      %5 = arith.addf %2, %4 : vector<64x256xf32>
      %c0_6 = arith.constant 0 : index
      %c0_7 = arith.constant 0 : index
      %6 = vector.load %alloca[%c0_6, %c0_7] : memref<64x256xf32, #tpu.memory_space<vmem>>, vector<64x256xf32>
      tpu.vector_store %alloca[%c0_6, %c0_7], %5 {strides = array<i32>} : memref<64x256xf32, #tpu.memory_space<vmem>>, vector<64x256xf32>,
      %7 = tpu.iota {dimensions = array<i32: 1>} : vector<1x256xi32>
      %c64_i32 = arith.constant 64 : i32
      %c0_i32 = arith.constant 0 : i32
      %8 = arith.cmpi eq, %c64_i32, %c0_i32 : i32
      %c1_i32 = arith.constant 1 : i32
      %9 = arith.select %8, %c1_i32, %c64_i32 : i32
      %10 = vector.broadcast %9 : i32 to vector<1x256xi32>
      %11 = arith.remsi %7, %10 : vector<1x256xi32>
      %c0_i32_8 = arith.constant 0 : i32
      %12 = vector.broadcast %c0_i32_8 : i32 to vector<1x256xi32>
      %13 = arith.cmpi ne, %11, %12 : vector<1x256xi32>
      %c0_i32_9 = arith.constant 0 : i32
      %14 = vector.broadcast %c0_i32_9 : i32 to vector<1x256xi32>
      %15 = arith.cmpi slt, %11, %14 : vector<1x256xi32>
      %c0_i32_10 = arith.constant 0 : i32
      %16 = arith.cmpi slt, %9, %c0_i32_10 : i32
      %17 = vector.broadcast %16 : i1 to vector<1x256xi1>
      %18 = vector.broadcast %17 : vector<1x256xi1> to vector<1x256xi1>
      %19 = arith.xori %15, %18 : vector<1x256xi1>
      %20 = arith.andi %19, %13 : vector<1x256xi1>
      %21 = vector.broadcast %9 : i32 to vector<1x256xi32>
      %22 = arith.addi %11, %21 : vector<1x256xi32>
      %23 = arith.select %20, %22, %11 : vector<1x256xi1>, vector<1x256xi32>
      %c32_i32 = arith.constant 32 : i32
      %24 = vector.broadcast %c32_i32 : i32 to vector<1x256xi32>
      %25 = arith.cmpi slt, %23, %24 : vector<1x256xi32>
      %c0_11 = arith.constant 0 : index
      %c0_12 = arith.constant 0 : index
      %26 = vector.load %alloca[%c0_11, %c0_12] : memref<64x256xf32, #tpu.memory_space<vmem>>, vector<8x256xf32>
      %c56 = arith.constant 56 : index
      %c0_13 = arith.constant 0 : index
      %27 = vector.load %alloca[%c56, %c0_13] : memref<64x256xf32, #tpu.memory_space<vmem>>, vector<8x256xf32>
      %28 = vector.shape_cast %25 : vector<1x256xi1> to vector<1x256xi1>
      %29 = vector.broadcast %28 : vector<1x256xi1> to vector<8x256xi1>
      %30 = arith.select %29, %26, %27 : vector<8x256xi1>, vector<8x256xf32>
      %c0_14 = arith.constant 0 : index
      %c0_15 = arith.constant 0 : index
      %31 = vector.load %alloca[%c0_14, %c0_15] : memref<64x256xf32, #tpu.memory_space<vmem>>, vector<8x256xf32>
      tpu.vector_store %alloca[%c0_14, %c0_15], %30 {strides = array<i32>} : memref<64x256xf32, #tpu.memory_space<vmem>>, vector<8x256xf32>,
      %32 = vector.shape_cast %25 : vector<1x256xi1> to vector<1x256xi1>
      %33 = vector.broadcast %32 : vector<1x256xi1> to vector<8x256xi1>
      %34 = arith.select %33, %27, %26 : vector<8x256xi1>, vector<8x256xf32>
      %c56_16 = arith.constant 56 : index
      %c0_17 = arith.constant 0 : index
      %35 = vector.load %alloca[%c56_16, %c0_17] : memref<64x256xf32, #tpu.memory_space<vmem>>, vector<8x256xf32>
      tpu.vector_store %alloca[%c56_16, %c0_17], %34 {strides = array<i32>} : memref<64x256xf32, #tpu.memory_space<vmem>>, vector<8x256xf32>,
      %c8 = arith.constant 8 : index
      %c0_18 = arith.constant 0 : index
      %36 = vector.load %alloca[%c8, %c0_18] : memref<64x256xf32, #tpu.memory_space<vmem>>, vector<8x256xf32>
      %c48 = arith.constant 48 : index
      %c0_19 = arith.constant 0 : index
      %37 = vector.load %alloca[%c48, %c0_19] : memref<64x256xf32, #tpu.memory_space<vmem>>, vector<8x256xf32>
      %38 = vector.shape_cast %25 : vector<1x256xi1> to vector<1x256xi1>
      %39 = vector.broadcast %38 : vector<1x256xi1> to vector<8x256xi1>
      %40 = arith.select %39, %36, %37 : vector<8x256xi1>, vector<8x256xf32>
      %c8_20 = arith.constant 8 : index
      %c0_21 = arith.constant 0 : index
      %41 = vector.load %alloca[%c8_20, %c0_21] : memref<64x256xf32, #tpu.memory_space<vmem>>, vector<8x256xf32>
      tpu.vector_store %alloca[%c8_20, %c0_21], %40 {strides = array<i32>} : memref<64x256xf32, #tpu.memory_space<vmem>>, vector<8x256xf32>,
      %42 = vector.shape_cast %25 : vector<1x256xi1> to vector<1x256xi1>
      %43 = vector.broadcast %42 : vector<1x256xi1> to vector<8x256xi1>
      %44 = arith.select %43, %37, %36 : vector<8x256xi1>, vector<8x256xf32>
      %c48_22 = arith.constant 48 : index
      %c0_23 = arith.constant 0 : index
      %45 = vector.load %alloca[%c48_22, %c0_23] : memref<64x256xf32, #tpu.memory_space<vmem>>, vector<8x256xf32>
      tpu.vector_store %alloca[%c48_22, %c0_23], %44 {strides = array<i32>} : memref<64x256xf32, #tpu.memory_space<vmem>>, vector<8x256xf32>,
      %c16 = arith.constant 16 : index
      %c0_24 = arith.constant 0 : index
      %46 = vector.load %alloca[%c16, %c0_24] : memref<64x256xf32, #tpu.memory_space<vmem>>, vector<8x256xf32>
      %c40 = arith.constant 40 : index
      %c0_25 = arith.constant 0 : index
      %47 = vector.load %alloca[%c40, %c0_25] : memref<64x256xf32, #tpu.memory_space<vmem>>, vector<8x256xf32>
      %48 = vector.shape_cast %25 : vector<1x256xi1> to vector<1x256xi1>
      %49 = vector.broadcast %48 : vector<1x256xi1> to vector<8x256xi1>
      %50 = arith.select %49, %46, %47 : vector<8x256xi1>, vector<8x256xf32>
      %c16_26 = arith.constant 16 : index
      %c0_27 = arith.constant 0 : index
      %51 = vector.load %alloca[%c16_26, %c0_27] : memref<64x256xf32, #tpu.memory_space<vmem>>, vector<8x256xf32>
      tpu.vector_store %alloca[%c16_26, %c0_27], %50 {strides = array<i32>} : memref<64x256xf32, #tpu.memory_space<vmem>>, vector<8x256xf32>,
      %52 = vector.shape_cast %25 : vector<1x256xi1> to vector<1x256xi1>
      %53 = vector.broadcast %52 : vector<1x256xi1> to vector<8x256xi1>
      %54 = arith.select %53, %47, %46 : vector<8x256xi1>, vector<8x256xf32>
      %c40_28 = arith.constant 40 : index
      %c0_29 = arith.constant 0 : index
      %55 = vector.load %alloca[%c40_28, %c0_29] : memref<64x256xf32, #tpu.memory_space<vmem>>, vector<8x256xf32>
      tpu.vector_store %alloca[%c40_28, %c0_29], %54 {strides = array<i32>} : memref<64x256xf32, #tpu.memory_space<vmem>>, vector<8x256xf32>,
      %c24 = arith.constant 24 : index
      %c0_30 = arith.constant 0 : index
      %56 = vector.load %alloca[%c24, %c0_30] : memref<64x256xf32, #tpu.memory_space<vmem>>, vector<8x256xf32>
      %c32 = arith.constant 32 : index
      %c0_31 = arith.constant 0 : index
      %57 = vector.load %alloca[%c32, %c0_31] : memref<64x256xf32, #tpu.memory_space<vmem>>, vector<8x256xf32>
      %58 = vector.shape_cast %25 : vector<1x256xi1> to vector<1x256xi1>
      %59 = vector.broadcast %58 : vector<1x256xi1> to vector<8x256xi1>
      %60 = arith.select %59, %56, %57 : vector<8x256xi1>, vector<8x256xf32>
      %c24_32 = arith.constant 24 : index
      %c0_33 = arith.constant 0 : index
      %61 = vector.load %alloca[%c24_32, %c0_33] : memref<64x256xf32, #tpu.memory_space<vmem>>, vector<8x256xf32>
      tpu.vector_store %alloca[%c24_32, %c0_33], %60 {strides = array<i32>} : memref<64x256xf32, #tpu.memory_space<vmem>>, vector<8x256xf32>,
      %62 = vector.shape_cast %25 : vector<1x256xi1> to vector<1x256xi1>
      %63 = vector.broadcast %62 : vector<1x256xi1> to vector<8x256xi1>
      %64 = arith.select %63, %57, %56 : vector<8x256xi1>, vector<8x256xf32>
      %c32_34 = arith.constant 32 : index
      %c0_35 = arith.constant 0 : index
      %65 = vector.load %alloca[%c32_34, %c0_35] : memref<64x256xf32, #tpu.memory_space<vmem>>, vector<8x256xf32>
      tpu.vector_store %alloca[%c32_34, %c0_35], %64 {strides = array<i32>} : memref<64x256xf32, #tpu.memory_space<vmem>>, vector<8x256xf32>,
      %c0_36 = arith.constant 0 : index
      %c0_37 = arith.constant 0 : index
      %66 = vector.load %arg6[%c0_36, %c0_37] : memref<64x256xf32, #tpu.memory_space<vmem>>, vector<64x256xf32>
      %cst_38 = arith.constant 0.000000e+00 : f32
      %67 = vector.broadcast %cst_38 : f32 to vector<8x64xf32>
      %cst_39 = arith.constant 0.000000e+00 : f32
      %68 = vector.broadcast %cst_39 : f32 to vector<8x64xf32>
      %c0_40 = arith.constant 0 : index
      %c0_41 = arith.constant 0 : index
      %69 = vector.load %alloca[%c0_40, %c0_41] : memref<64x256xf32, #tpu.memory_space<vmem>>, vector<8x256xf32>
      %cst_42 = arith.constant dense<0.000000e+00> : vector<8x256xf32>
      %70 = tpu.matmul %67, %66, %cst_42 {dimension_numbers = #tpu.dot_dimension_numbers<[1], [0], [0], [1], [0, 0, 1, 1], [], []>} : vector<8x64xf32>, vector<64x256xf32>, vector<8x256xf32> -> vector<8x256xf32>
      %71 = arith.addf %69, %70 : vector<8x256xf32>
      %72 = arith.negf %71 : vector<8x256xf32>
      %73 = math.exp %72 : vector<8x256xf32>
      %cst_43 = arith.constant 1.000000e+00 : f32
      %74 = vector.broadcast %cst_43 : f32 to vector<8x256xf32>
      %75 = arith.addf %74, %73 : vector<8x256xf32>
      %76 = arith.divf %74, %75 : vector<8x256xf32>
      %77 = vector.extract_strided_slice %76 {offsets = [0, 0], sizes = [8, 64], strides = [1, 1]} : vector<8x256xf32> to vector<8x64xf32>
      %78 = vector.extract_strided_slice %76 {offsets = [0, 64], sizes = [8, 64], strides = [1, 1]} : vector<8x256xf32> to vector<8x64xf32>
      %79 = vector.extract_strided_slice %76 {offsets = [0, 128], sizes = [8, 64], strides = [1, 1]} : vector<8x256xf32> to vector<8x64xf32>
      %cst_44 = arith.constant 2.000000e+00 : f32
      %80 = vector.broadcast %cst_44 : f32 to vector<8x64xf32>
      %81 = arith.mulf %80, %79 : vector<8x64xf32>
      %cst_45 = arith.constant 1.000000e+00 : f32
      %82 = vector.broadcast %cst_45 : f32 to vector<8x64xf32>
      %83 = arith.subf %81, %82 : vector<8x64xf32>
      %84 = vector.extract_strided_slice %76 {offsets = [0, 192], sizes = [8, 64], strides = [1, 1]} : vector<8x256xf32> to vector<8x64xf32>
      %85 = arith.mulf %78, %68 : vector<8x64xf32>
      %86 = arith.mulf %77, %83 : vector<8x64xf32>
      %87 = arith.addf %85, %86 : vector<8x64xf32>
      %88 = math.tanh %87 : vector<8x64xf32>
      %89 = arith.mulf %84, %88 : vector<8x64xf32>
      %c0_46 = arith.constant 0 : index
      %c0_47 = arith.constant 0 : index
      %90 = vector.load %alloca_0[%c0_46, %c0_47] : memref<64x64xf32, #tpu.memory_space<vmem>>, vector<8x64xf32>
      tpu.vector_store %alloca_0[%c0_46, %c0_47], %89 {strides = array<i32>} : memref<64x64xf32, #tpu.memory_space<vmem>>, vector<8x64xf32>,
      %c8_48 = arith.constant 8 : index
      %c0_49 = arith.constant 0 : index
      %91 = vector.load %alloca[%c8_48, %c0_49] : memref<64x256xf32, #tpu.memory_space<vmem>>, vector<8x256xf32>
      %cst_50 = arith.constant dense<0.000000e+00> : vector<8x256xf32>
      %92 = tpu.matmul %89, %66, %cst_50 {dimension_numbers = #tpu.dot_dimension_numbers<[1], [0], [0], [1], [0, 0, 1, 1], [], []>} : vector<8x64xf32>, vector<64x256xf32>, vector<8x256xf32> -> vector<8x256xf32>
      %93 = arith.addf %91, %92 : vector<8x256xf32>
      %94 = arith.negf %93 : vector<8x256xf32>
      %95 = math.exp %94 : vector<8x256xf32>
      %cst_51 = arith.constant 1.000000e+00 : f32
      %96 = vector.broadcast %cst_51 : f32 to vector<8x256xf32>
      %97 = arith.addf %96, %95 : vector<8x256xf32>
      %98 = arith.divf %96, %97 : vector<8x256xf32>
      %99 = vector.extract_strided_slice %98 {offsets = [0, 0], sizes = [8, 64], strides = [1, 1]} : vector<8x256xf32> to vector<8x64xf32>
      %100 = vector.extract_strided_slice %98 {offsets = [0, 64], sizes = [8, 64], strides = [1, 1]} : vector<8x256xf32> to vector<8x64xf32>
      %101 = vector.extract_strided_slice %98 {offsets = [0, 128], sizes = [8, 64], strides = [1, 1]} : vector<8x256xf32> to vector<8x64xf32>
      %cst_52 = arith.constant 2.000000e+00 : f32
      %102 = vector.broadcast %cst_52 : f32 to vector<8x64xf32>
      %103 = arith.mulf %102, %101 : vector<8x64xf32>
      %cst_53 = arith.constant 1.000000e+00 : f32
      %104 = vector.broadcast %cst_53 : f32 to vector<8x64xf32>
      %105 = arith.subf %103, %104 : vector<8x64xf32>
      %106 = vector.extract_strided_slice %98 {offsets = [0, 192], sizes = [8, 64], strides = [1, 1]} : vector<8x256xf32> to vector<8x64xf32>
      %107 = arith.mulf %100, %87 : vector<8x64xf32>
      %108 = arith.mulf %99, %105 : vector<8x64xf32>
      %109 = arith.addf %107, %108 : vector<8x64xf32>
      %110 = math.tanh %109 : vector<8x64xf32>
      %111 = arith.mulf %106, %110 : vector<8x64xf32>
      %c8_54 = arith.constant 8 : index
      %c0_55 = arith.constant 0 : index
      %112 = vector.load %alloca_0[%c8_54, %c0_55] : memref<64x64xf32, #tpu.memory_space<vmem>>, vector<8x64xf32>
      tpu.vector_store %alloca_0[%c8_54, %c0_55], %111 {strides = array<i32>} : memref<64x64xf32, #tpu.memory_space<vmem>>, vector<8x64xf32>,
      %c16_56 = arith.constant 16 : index
      %c0_57 = arith.constant 0 : index
      %113 = vector.load %alloca[%c16_56, %c0_57] : memref<64x256xf32, #tpu.memory_space<vmem>>, vector<8x256xf32>
      %cst_58 = arith.constant dense<0.000000e+00> : vector<8x256xf32>
      %114 = tpu.matmul %111, %66, %cst_58 {dimension_numbers = #tpu.dot_dimension_numbers<[1], [0], [0], [1], [0, 0, 1, 1], [], []>} : vector<8x64xf32>, vector<64x256xf32>, vector<8x256xf32> -> vector<8x256xf32>
      %115 = arith.addf %113, %114 : vector<8x256xf32>
      %116 = arith.negf %115 : vector<8x256xf32>
      %117 = math.exp %116 : vector<8x256xf32>
      %cst_59 = arith.constant 1.000000e+00 : f32
      %118 = vector.broadcast %cst_59 : f32 to vector<8x256xf32>
      %119 = arith.addf %118, %117 : vector<8x256xf32>
      %120 = arith.divf %118, %119 : vector<8x256xf32>
      %121 = vector.extract_strided_slice %120 {offsets = [0, 0], sizes = [8, 64], strides = [1, 1]} : vector<8x256xf32> to vector<8x64xf32>
      %122 = vector.extract_strided_slice %120 {offsets = [0, 64], sizes = [8, 64], strides = [1, 1]} : vector<8x256xf32> to vector<8x64xf32>
      %123 = vector.extract_strided_slice %120 {offsets = [0, 128], sizes = [8, 64], strides = [1, 1]} : vector<8x256xf32> to vector<8x64xf32>
      %cst_60 = arith.constant 2.000000e+00 : f32
      %124 = vector.broadcast %cst_60 : f32 to vector<8x64xf32>
      %125 = arith.mulf %124, %123 : vector<8x64xf32>
      %cst_61 = arith.constant 1.000000e+00 : f32
      %126 = vector.broadcast %cst_61 : f32 to vector<8x64xf32>
      %127 = arith.subf %125, %126 : vector<8x64xf32>
      %128 = vector.extract_strided_slice %120 {offsets = [0, 192], sizes = [8, 64], strides = [1, 1]} : vector<8x256xf32> to vector<8x64xf32>
      %129 = arith.mulf %122, %109 : vector<8x64xf32>
      %130 = arith.mulf %121, %127 : vector<8x64xf32>
      %131 = arith.addf %129, %130 : vector<8x64xf32>
      %132 = math.tanh %131 : vector<8x64xf32>
      %133 = arith.mulf %128, %132 : vector<8x64xf32>
      %c16_62 = arith.constant 16 : index
      %c0_63 = arith.constant 0 : index
      %134 = vector.load %alloca_0[%c16_62, %c0_63] : memref<64x64xf32, #tpu.memory_space<vmem>>, vector<8x64xf32>
      tpu.vector_store %alloca_0[%c16_62, %c0_63], %133 {strides = array<i32>} : memref<64x64xf32, #tpu.memory_space<vmem>>, vector<8x64xf32>,
      %c24_64 = arith.constant 24 : index
      %c0_65 = arith.constant 0 : index
      %135 = vector.load %alloca[%c24_64, %c0_65] : memref<64x256xf32, #tpu.memory_space<vmem>>, vector<8x256xf32>
      %cst_66 = arith.constant dense<0.000000e+00> : vector<8x256xf32>
      %136 = tpu.matmul %133, %66, %cst_66 {dimension_numbers = #tpu.dot_dimension_numbers<[1], [0], [0], [1], [0, 0, 1, 1], [], []>} : vector<8x64xf32>, vector<64x256xf32>, vector<8x256xf32> -> vector<8x256xf32>
      %137 = arith.addf %135, %136 : vector<8x256xf32>
      %138 = arith.negf %137 : vector<8x256xf32>
      %139 = math.exp %138 : vector<8x256xf32>
      %cst_67 = arith.constant 1.000000e+00 : f32
      %140 = vector.broadcast %cst_67 : f32 to vector<8x256xf32>
      %141 = arith.addf %140, %139 : vector<8x256xf32>
      %142 = arith.divf %140, %141 : vector<8x256xf32>
      %143 = vector.extract_strided_slice %142 {offsets = [0, 0], sizes = [8, 64], strides = [1, 1]} : vector<8x256xf32> to vector<8x64xf32>
      %144 = vector.extract_strided_slice %142 {offsets = [0, 64], sizes = [8, 64], strides = [1, 1]} : vector<8x256xf32> to vector<8x64xf32>
      %145 = vector.extract_strided_slice %142 {offsets = [0, 128], sizes = [8, 64], strides = [1, 1]} : vector<8x256xf32> to vector<8x64xf32>
      %cst_68 = arith.constant 2.000000e+00 : f32
      %146 = vector.broadcast %cst_68 : f32 to vector<8x64xf32>
      %147 = arith.mulf %146, %145 : vector<8x64xf32>
      %cst_69 = arith.constant 1.000000e+00 : f32
      %148 = vector.broadcast %cst_69 : f32 to vector<8x64xf32>
      %149 = arith.subf %147, %148 : vector<8x64xf32>
      %150 = vector.extract_strided_slice %142 {offsets = [0, 192], sizes = [8, 64], strides = [1, 1]} : vector<8x256xf32> to vector<8x64xf32>
      %151 = arith.mulf %144, %131 : vector<8x64xf32>
      %152 = arith.mulf %143, %149 : vector<8x64xf32>
      %153 = arith.addf %151, %152 : vector<8x64xf32>
      %154 = math.tanh %153 : vector<8x64xf32>
      %155 = arith.mulf %150, %154 : vector<8x64xf32>
      %c24_70 = arith.constant 24 : index
      %c0_71 = arith.constant 0 : index
      %156 = vector.load %alloca_0[%c24_70, %c0_71] : memref<64x64xf32, #tpu.memory_space<vmem>>, vector<8x64xf32>
      tpu.vector_store %alloca_0[%c24_70, %c0_71], %155 {strides = array<i32>} : memref<64x64xf32, #tpu.memory_space<vmem>>, vector<8x64xf32>,
      %c32_72 = arith.constant 32 : index
      %c0_73 = arith.constant 0 : index
      %157 = vector.load %alloca[%c32_72, %c0_73] : memref<64x256xf32, #tpu.memory_space<vmem>>, vector<8x256xf32>
      %cst_74 = arith.constant dense<0.000000e+00> : vector<8x256xf32>
      %158 = tpu.matmul %155, %66, %cst_74 {dimension_numbers = #tpu.dot_dimension_numbers<[1], [0], [0], [1], [0, 0, 1, 1], [], []>} : vector<8x64xf32>, vector<64x256xf32>, vector<8x256xf32> -> vector<8x256xf32>
      %159 = arith.addf %157, %158 : vector<8x256xf32>
      %160 = arith.negf %159 : vector<8x256xf32>
      %161 = math.exp %160 : vector<8x256xf32>
      %cst_75 = arith.constant 1.000000e+00 : f32
      %162 = vector.broadcast %cst_75 : f32 to vector<8x256xf32>
      %163 = arith.addf %162, %161 : vector<8x256xf32>
      %164 = arith.divf %162, %163 : vector<8x256xf32>
      %165 = vector.extract_strided_slice %164 {offsets = [0, 0], sizes = [8, 64], strides = [1, 1]} : vector<8x256xf32> to vector<8x64xf32>
      %166 = vector.extract_strided_slice %164 {offsets = [0, 64], sizes = [8, 64], strides = [1, 1]} : vector<8x256xf32> to vector<8x64xf32>
      %167 = vector.extract_strided_slice %164 {offsets = [0, 128], sizes = [8, 64], strides = [1, 1]} : vector<8x256xf32> to vector<8x64xf32>
      %cst_76 = arith.constant 2.000000e+00 : f32
      %168 = vector.broadcast %cst_76 : f32 to vector<8x64xf32>
      %169 = arith.mulf %168, %167 : vector<8x64xf32>
      %cst_77 = arith.constant 1.000000e+00 : f32
      %170 = vector.broadcast %cst_77 : f32 to vector<8x64xf32>
      %171 = arith.subf %169, %170 : vector<8x64xf32>
      %172 = vector.extract_strided_slice %164 {offsets = [0, 192], sizes = [8, 64], strides = [1, 1]} : vector<8x256xf32> to vector<8x64xf32>
      %173 = arith.mulf %166, %153 : vector<8x64xf32>
      %174 = arith.mulf %165, %171 : vector<8x64xf32>
      %175 = arith.addf %173, %174 : vector<8x64xf32>
      %176 = math.tanh %175 : vector<8x64xf32>
      %177 = arith.mulf %172, %176 : vector<8x64xf32>
      %c32_78 = arith.constant 32 : index
      %c0_79 = arith.constant 0 : index
      %178 = vector.load %alloca_0[%c32_78, %c0_79] : memref<64x64xf32, #tpu.memory_space<vmem>>, vector<8x64xf32>
      tpu.vector_store %alloca_0[%c32_78, %c0_79], %177 {strides = array<i32>} : memref<64x64xf32, #tpu.memory_space<vmem>>, vector<8x64xf32>,
      %c40_80 = arith.constant 40 : index
      %c0_81 = arith.constant 0 : index
      %179 = vector.load %alloca[%c40_80, %c0_81] : memref<64x256xf32, #tpu.memory_space<vmem>>, vector<8x256xf32>
      %cst_82 = arith.constant dense<0.000000e+00> : vector<8x256xf32>
      %180 = tpu.matmul %177, %66, %cst_82 {dimension_numbers = #tpu.dot_dimension_numbers<[1], [0], [0], [1], [0, 0, 1, 1], [], []>} : vector<8x64xf32>, vector<64x256xf32>, vector<8x256xf32> -> vector<8x256xf32>
      %181 = arith.addf %179, %180 : vector<8x256xf32>
      %182 = arith.negf %181 : vector<8x256xf32>
      %183 = math.exp %182 : vector<8x256xf32>
      %cst_83 = arith.constant 1.000000e+00 : f32
      %184 = vector.broadcast %cst_83 : f32 to vector<8x256xf32>
      %185 = arith.addf %184, %183 : vector<8x256xf32>
      %186 = arith.divf %184, %185 : vector<8x256xf32>
      %187 = vector.extract_strided_slice %186 {offsets = [0, 0], sizes = [8, 64], strides = [1, 1]} : vector<8x256xf32> to vector<8x64xf32>
      %188 = vector.extract_strided_slice %186 {offsets = [0, 64], sizes = [8, 64], strides = [1, 1]} : vector<8x256xf32> to vector<8x64xf32>
      %189 = vector.extract_strided_slice %186 {offsets = [0, 128], sizes = [8, 64], strides = [1, 1]} : vector<8x256xf32> to vector<8x64xf32>
      %cst_84 = arith.constant 2.000000e+00 : f32
      %190 = vector.broadcast %cst_84 : f32 to vector<8x64xf32>
      %191 = arith.mulf %190, %189 : vector<8x64xf32>
      %cst_85 = arith.constant 1.000000e+00 : f32
      %192 = vector.broadcast %cst_85 : f32 to vector<8x64xf32>
      %193 = arith.subf %191, %192 : vector<8x64xf32>
      %194 = vector.extract_strided_slice %186 {offsets = [0, 192], sizes = [8, 64], strides = [1, 1]} : vector<8x256xf32> to vector<8x64xf32>
      %195 = arith.mulf %188, %175 : vector<8x64xf32>
      %196 = arith.mulf %187, %193 : vector<8x64xf32>
      %197 = arith.addf %195, %196 : vector<8x64xf32>
      %198 = math.tanh %197 : vector<8x64xf32>
      %199 = arith.mulf %194, %198 : vector<8x64xf32>
      %c40_86 = arith.constant 40 : index
      %c0_87 = arith.constant 0 : index
      %200 = vector.load %alloca_0[%c40_86, %c0_87] : memref<64x64xf32, #tpu.memory_space<vmem>>, vector<8x64xf32>
      tpu.vector_store %alloca_0[%c40_86, %c0_87], %199 {strides = array<i32>} : memref<64x64xf32, #tpu.memory_space<vmem>>, vector<8x64xf32>,
      %c48_88 = arith.constant 48 : index
      %c0_89 = arith.constant 0 : index
      %201 = vector.load %alloca[%c48_88, %c0_89] : memref<64x256xf32, #tpu.memory_space<vmem>>, vector<8x256xf32>
      %cst_90 = arith.constant dense<0.000000e+00> : vector<8x256xf32>
      %202 = tpu.matmul %199, %66, %cst_90 {dimension_numbers = #tpu.dot_dimension_numbers<[1], [0], [0], [1], [0, 0, 1, 1], [], []>} : vector<8x64xf32>, vector<64x256xf32>, vector<8x256xf32> -> vector<8x256xf32>
      %203 = arith.addf %201, %202 : vector<8x256xf32>
      %204 = arith.negf %203 : vector<8x256xf32>
      %205 = math.exp %204 : vector<8x256xf32>
      %cst_91 = arith.constant 1.000000e+00 : f32
      %206 = vector.broadcast %cst_91 : f32 to vector<8x256xf32>
      %207 = arith.addf %206, %205 : vector<8x256xf32>
      %208 = arith.divf %206, %207 : vector<8x256xf32>
      %209 = vector.extract_strided_slice %208 {offsets = [0, 0], sizes = [8, 64], strides = [1, 1]} : vector<8x256xf32> to vector<8x64xf32>
      %210 = vector.extract_strided_slice %208 {offsets = [0, 64], sizes = [8, 64], strides = [1, 1]} : vector<8x256xf32> to vector<8x64xf32>
      %211 = vector.extract_strided_slice %208 {offsets = [0, 128], sizes = [8, 64], strides = [1, 1]} : vector<8x256xf32> to vector<8x64xf32>
      %cst_92 = arith.constant 2.000000e+00 : f32
      %212 = vector.broadcast %cst_92 : f32 to vector<8x64xf32>
      %213 = arith.mulf %212, %211 : vector<8x64xf32>
      %cst_93 = arith.constant 1.000000e+00 : f32
      %214 = vector.broadcast %cst_93 : f32 to vector<8x64xf32>
      %215 = arith.subf %213, %214 : vector<8x64xf32>
      %216 = vector.extract_strided_slice %208 {offsets = [0, 192], sizes = [8, 64], strides = [1, 1]} : vector<8x256xf32> to vector<8x64xf32>
      %217 = arith.mulf %210, %197 : vector<8x64xf32>
      %218 = arith.mulf %209, %215 : vector<8x64xf32>
      %219 = arith.addf %217, %218 : vector<8x64xf32>
      %220 = math.tanh %219 : vector<8x64xf32>
      %221 = arith.mulf %216, %220 : vector<8x64xf32>
      %c48_94 = arith.constant 48 : index
      %c0_95 = arith.constant 0 : index
      %222 = vector.load %alloca_0[%c48_94, %c0_95] : memref<64x64xf32, #tpu.memory_space<vmem>>, vector<8x64xf32>
      tpu.vector_store %alloca_0[%c48_94, %c0_95], %221 {strides = array<i32>} : memref<64x64xf32, #tpu.memory_space<vmem>>, vector<8x64xf32>,
      %c56_96 = arith.constant 56 : index
      %c0_97 = arith.constant 0 : index
      %223 = vector.load %alloca[%c56_96, %c0_97] : memref<64x256xf32, #tpu.memory_space<vmem>>, vector<8x256xf32>
      %cst_98 = arith.constant dense<0.000000e+00> : vector<8x256xf32>
      %224 = tpu.matmul %221, %66, %cst_98 {dimension_numbers = #tpu.dot_dimension_numbers<[1], [0], [0], [1], [0, 0, 1, 1], [], []>} : vector<8x64xf32>, vector<64x256xf32>, vector<8x256xf32> -> vector<8x256xf32>
      %225 = arith.addf %223, %224 : vector<8x256xf32>
      %226 = arith.negf %225 : vector<8x256xf32>
      %227 = math.exp %226 : vector<8x256xf32>
      %cst_99 = arith.constant 1.000000e+00 : f32
      %228 = vector.broadcast %cst_99 : f32 to vector<8x256xf32>
      %229 = arith.addf %228, %227 : vector<8x256xf32>
      %230 = arith.divf %228, %229 : vector<8x256xf32>
      %231 = vector.extract_strided_slice %230 {offsets = [0, 0], sizes = [8, 64], strides = [1, 1]} : vector<8x256xf32> to vector<8x64xf32>
      %232 = vector.extract_strided_slice %230 {offsets = [0, 64], sizes = [8, 64], strides = [1, 1]} : vector<8x256xf32> to vector<8x64xf32>
      %233 = vector.extract_strided_slice %230 {offsets = [0, 128], sizes = [8, 64], strides = [1, 1]} : vector<8x256xf32> to vector<8x64xf32>
      %cst_100 = arith.constant 2.000000e+00 : f32
      %234 = vector.broadcast %cst_100 : f32 to vector<8x64xf32>
      %235 = arith.mulf %234, %233 : vector<8x64xf32>
      %cst_101 = arith.constant 1.000000e+00 : f32
      %236 = vector.broadcast %cst_101 : f32 to vector<8x64xf32>
      %237 = arith.subf %235, %236 : vector<8x64xf32>
      %238 = vector.extract_strided_slice %230 {offsets = [0, 192], sizes = [8, 64], strides = [1, 1]} : vector<8x256xf32> to vector<8x64xf32>
      %239 = arith.mulf %232, %219 : vector<8x64xf32>
      %240 = arith.mulf %231, %237 : vector<8x64xf32>
      %241 = arith.addf %239, %240 : vector<8x64xf32>
      %242 = math.tanh %241 : vector<8x64xf32>
      %243 = arith.mulf %238, %242 : vector<8x64xf32>
      %c56_102 = arith.constant 56 : index
      %c0_103 = arith.constant 0 : index
      %244 = vector.load %alloca_0[%c56_102, %c0_103] : memref<64x64xf32, #tpu.memory_space<vmem>>, vector<8x64xf32>
      tpu.vector_store %alloca_0[%c56_102, %c0_103], %243 {strides = array<i32>} : memref<64x64xf32, #tpu.memory_space<vmem>>, vector<8x64xf32>,
      %c0_104 = arith.constant 0 : index
      %c32_105 = arith.constant 32 : index
      %245 = vector.load %alloca_0[%c0_104, %c32_105] : memref<64x64xf32, #tpu.memory_space<vmem>>, vector<8x32xf32>
      %c56_106 = arith.constant 56 : index
      %c32_107 = arith.constant 32 : index
      %246 = vector.load %alloca_0[%c56_106, %c32_107] : memref<64x64xf32, #tpu.memory_space<vmem>>, vector<8x32xf32>
      %c0_108 = arith.constant 0 : index
      %c32_109 = arith.constant 32 : index
      %247 = vector.load %alloca_0[%c0_108, %c32_109] : memref<64x64xf32, #tpu.memory_space<vmem>>, vector<8x32xf32>
      tpu.vector_store %alloca_0[%c0_108, %c32_109], %246 {strides = array<i32>} : memref<64x64xf32, #tpu.memory_space<vmem>>, vector<8x32xf32>,
      %c56_110 = arith.constant 56 : index
      %c32_111 = arith.constant 32 : index
      %248 = vector.load %alloca_0[%c56_110, %c32_111] : memref<64x64xf32, #tpu.memory_space<vmem>>, vector<8x32xf32>
      tpu.vector_store %alloca_0[%c56_110, %c32_111], %245 {strides = array<i32>} : memref<64x64xf32, #tpu.memory_space<vmem>>, vector<8x32xf32>,
      %c8_112 = arith.constant 8 : index
      %c32_113 = arith.constant 32 : index
      %249 = vector.load %alloca_0[%c8_112, %c32_113] : memref<64x64xf32, #tpu.memory_space<vmem>>, vector<8x32xf32>
      %c48_114 = arith.constant 48 : index
      %c32_115 = arith.constant 32 : index
      %250 = vector.load %alloca_0[%c48_114, %c32_115] : memref<64x64xf32, #tpu.memory_space<vmem>>, vector<8x32xf32>
      %c8_116 = arith.constant 8 : index
      %c32_117 = arith.constant 32 : index
      %251 = vector.load %alloca_0[%c8_116, %c32_117] : memref<64x64xf32, #tpu.memory_space<vmem>>, vector<8x32xf32>
      tpu.vector_store %alloca_0[%c8_116, %c32_117], %250 {strides = array<i32>} : memref<64x64xf32, #tpu.memory_space<vmem>>, vector<8x32xf32>,
      %c48_118 = arith.constant 48 : index
      %c32_119 = arith.constant 32 : index
      %252 = vector.load %alloca_0[%c48_118, %c32_119] : memref<64x64xf32, #tpu.memory_space<vmem>>, vector<8x32xf32>
      tpu.vector_store %alloca_0[%c48_118, %c32_119], %249 {strides = array<i32>} : memref<64x64xf32, #tpu.memory_space<vmem>>, vector<8x32xf32>,
      %c16_120 = arith.constant 16 : index
      %c32_121 = arith.constant 32 : index
      %253 = vector.load %alloca_0[%c16_120, %c32_121] : memref<64x64xf32, #tpu.memory_space<vmem>>, vector<8x32xf32>
      %c40_122 = arith.constant 40 : index
      %c32_123 = arith.constant 32 : index
      %254 = vector.load %alloca_0[%c40_122, %c32_123] : memref<64x64xf32, #tpu.memory_space<vmem>>, vector<8x32xf32>
      %c16_124 = arith.constant 16 : index
      %c32_125 = arith.constant 32 : index
      %255 = vector.load %alloca_0[%c16_124, %c32_125] : memref<64x64xf32, #tpu.memory_space<vmem>>, vector<8x32xf32>
      tpu.vector_store %alloca_0[%c16_124, %c32_125], %254 {strides = array<i32>} : memref<64x64xf32, #tpu.memory_space<vmem>>, vector<8x32xf32>,
      %c40_126 = arith.constant 40 : index
      %c32_127 = arith.constant 32 : index
      %256 = vector.load %alloca_0[%c40_126, %c32_127] : memref<64x64xf32, #tpu.memory_space<vmem>>, vector<8x32xf32>
      tpu.vector_store %alloca_0[%c40_126, %c32_127], %253 {strides = array<i32>} : memref<64x64xf32, #tpu.memory_space<vmem>>, vector<8x32xf32>,
      %c24_128 = arith.constant 24 : index
      %c32_129 = arith.constant 32 : index
      %257 = vector.load %alloca_0[%c24_128, %c32_129] : memref<64x64xf32, #tpu.memory_space<vmem>>, vector<8x32xf32>
      %c32_130 = arith.constant 32 : index
      %c32_131 = arith.constant 32 : index
      %258 = vector.load %alloca_0[%c32_130, %c32_131] : memref<64x64xf32, #tpu.memory_space<vmem>>, vector<8x32xf32>
      %c24_132 = arith.constant 24 : index
      %c32_133 = arith.constant 32 : index
      %259 = vector.load %alloca_0[%c24_132, %c32_133] : memref<64x64xf32, #tpu.memory_space<vmem>>, vector<8x32xf32>
      tpu.vector_store %alloca_0[%c24_132, %c32_133], %258 {strides = array<i32>} : memref<64x64xf32, #tpu.memory_space<vmem>>, vector<8x32xf32>,
      %c32_134 = arith.constant 32 : index
      %c32_135 = arith.constant 32 : index
      %260 = vector.load %alloca_0[%c32_134, %c32_135] : memref<64x64xf32, #tpu.memory_space<vmem>>, vector<8x32xf32>
      tpu.vector_store %alloca_0[%c32_134, %c32_135], %257 {strides = array<i32>} : memref<64x64xf32, #tpu.memory_space<vmem>>, vector<8x32xf32>,
      %c0_136 = arith.constant 0 : index
      %c0_137 = arith.constant 0 : index
      %261 = vector.load %alloca_0[%c0_136, %c0_137] : memref<64x64xf32, #tpu.memory_space<vmem>>, vector<64x64xf32>
      %262 = vector.shape_cast %261 : vector<64x64xf32> to vector<8x8x64xf32>
      %c0_138 = arith.constant 0 : index
      %c0_139 = arith.constant 0 : index
      %263 = vector.load %arg8[%c0_138, %c0_139] : memref<1x64xf32, #tpu.memory_space<vmem>>, vector<1x64xf32>
      %264 = vector.shape_cast %263 : vector<1x64xf32> to vector<1x1x64xf32>
      %265 = vector.broadcast %264 : vector<1x1x64xf32> to vector<8x8x64xf32>
      %266 = arith.mulf %262, %265 : vector<8x8x64xf32>
      %cst_140 = arith.constant dense<0.000000e+00> : vector<8x8xf32>
      %267 = vector.multi_reduction <add>, %266, %cst_140 [2] : vector<8x8x64xf32> to vector<8x8xf32>
      %268 = vector.shape_cast %267 : vector<8x8xf32> to vector<8x8x1xf32>
      %cst_141 = arith.constant dense<0xFF800000> : vector<8x1xf32>
      %269 = vector.multi_reduction <maximumf>, %268, %cst_141 [0] : vector<8x8x1xf32> to vector<8x1xf32>
      %270 = vector.shape_cast %269 : vector<8x1xf32> to vector<1x8x1xf32>
      %271 = vector.broadcast %270 : vector<1x8x1xf32> to vector<8x8x1xf32>
      %272 = arith.subf %268, %271 : vector<8x8x1xf32>
      %273 = math.exp %272 : vector<8x8x1xf32>
      %cst_142 = arith.constant dense<0.000000e+00> : vector<8x1xf32>
      %274 = vector.multi_reduction <add>, %273, %cst_142 [0] : vector<8x8x1xf32> to vector<8x1xf32>
      %275 = vector.shape_cast %274 : vector<8x1xf32> to vector<1x8x1xf32>
      %276 = vector.broadcast %275 : vector<1x8x1xf32> to vector<8x8x1xf32>
      %277 = arith.divf %273, %276 : vector<8x8x1xf32>
      %278 = vector.broadcast %277 : vector<8x8x1xf32> to vector<8x8x64xf32>
      %279 = arith.mulf %278, %262 : vector<8x8x64xf32>
      %280 = arith.mulf %279, %279 : vector<8x8x64xf32>
      %cst_143 = arith.constant dense<0.000000e+00> : vector<8x64xf32>
      %281 = vector.multi_reduction <add>, %280, %cst_143 [0] : vector<8x8x64xf32> to vector<8x64xf32>
      %282 = vector.shape_cast %281 : vector<8x64xf32> to vector<1x8x64xf32>
      %cst_144 = arith.constant 1.000000e-24 : f32
      %283 = vector.broadcast %cst_144 : f32 to vector<1x8x64xf32>
      %284 = arith.maximumf %282, %283 : vector<1x8x64xf32>
      %285 = math.rsqrt %284 : vector<1x8x64xf32>
      %286 = vector.broadcast %285 : vector<1x8x64xf32> to vector<8x8x64xf32>
      %287 = arith.mulf %279, %286 : vector<8x8x64xf32>
      %c0_145 = arith.constant 0 : index
      %c0_146 = arith.constant 0 : index
      %c0_147 = arith.constant 0 : index
      %288 = vector.load %arg9[%c0_145, %c0_146, %c0_147] : memref<8x8x64xf32, #tpu.memory_space<vmem>>, vector<8x8x64xf32>
      tpu.vector_store %arg9[%c0_145, %c0_146, %c0_147], %287 {strides = array<i32>} : memref<8x8x64xf32, #tpu.memory_space<vmem>>, vector<8x8x64xf32>,
      tpu.yield
    }) : () -> ()
    return
  }
  func.func @transform_0(%arg0: i32) -> (i32, i32, i32) {
    %c0_i32 = arith.constant 0 : i32
    %c0_i32_0 = arith.constant 0 : i32
    %c0_i32_1 = arith.constant 0 : i32
    return %c0_i32, %arg0, %c0_i32_0 : i32, i32, i32
  }
  func.func @transform_1(%arg0: i32) -> (i32, i32) {
    %c0_i32 = arith.constant 0 : i32
    %c0_i32_0 = arith.constant 0 : i32
    %c0_i32_1 = arith.constant 0 : i32
    return %c0_i32, %c0_i32_0 : i32, i32
  }
  func.func @transform_2(%arg0: i32) -> (i32, i32) {
    %c0_i32 = arith.constant 0 : i32
    %c0_i32_0 = arith.constant 0 : i32
    %c0_i32_1 = arith.constant 0 : i32
    return %c0_i32, %c0_i32_0 : i32, i32
  }
  func.func @transform_3(%arg0: i32) -> (i32, i32) {
    %c0_i32 = arith.constant 0 : i32
    %c0_i32_0 = arith.constant 0 : i32
    %c0_i32_1 = arith.constant 0 : i32
    return %c0_i32, %c0_i32_0 : i32, i32
  }
  func.func @transform_4(%arg0: i32) -> (i32, i32) {
    %c0_i32 = arith.constant 0 : i32
    %c0_i32_0 = arith.constant 0 : i32
    %c0_i32_1 = arith.constant 0 : i32
    return %c0_i32, %c0_i32_0 : i32, i32
  }
  func.func @transform_5(%arg0: i32) -> (i32, i32) {
    %c0_i32 = arith.constant 0 : i32
    %c0_i32_0 = arith.constant 0 : i32
    %c0_i32_1 = arith.constant 0 : i32
    return %c0_i32, %c0_i32_0 : i32, i32
  }
  func.func @transform_6(%arg0: i32) -> (i32, i32) {
    %c0_i32 = arith.constant 0 : i32
    %c0_i32_0 = arith.constant 0 : i32
    %c0_i32_1 = arith.constant 0 : i32
    return %c0_i32, %c0_i32_0 : i32, i32
  }
  func.func @transform_7(%arg0: i32) -> (i32, i32) {
    %c0_i32 = arith.constant 0 : i32
    %c0_i32_0 = arith.constant 0 : i32
    %c0_i32_1 = arith.constant 0 : i32
    return %c0_i32, %c0_i32_0 : i32, i32
  }
  func.func @transform_8(%arg0: i32) -> (i32, i32, i32) {
    %c0_i32 = arith.constant 0 : i32
    %c0_i32_0 = arith.constant 0 : i32
    %c0_i32_1 = arith.constant 0 : i32
    return %c0_i32, %arg0, %c0_i32_0 : i32, i32, i32
  }
}

</mosaic_0001>

<bundles_post_ra>
// kernel: bilstm_forward.1
= control target key start
LH: loop header
LB: loop body
LE: loop exit
PB: predicated region body
PF: predicated region fallthrough
CT: control target
= control target key end

     0   :  { %vm59_vm0 = vcmask 523264   ;;  %v2624_v36 = vmov 0.0   ;;  %v182_v52 = vlaneseq  ;;  %s3800_s0 = inlined_call_operand.vmem [shape: f32[8,8,64], index: 0, kind: input, shape index: {}]   ;;  %s3801_s1 = inlined_call_operand.vmem [shape: f32[64,256], index: 1, kind: input, shape index: {}]   ;;  %s3802_s2 = inlined_call_operand.vmem [shape: f32[64,256], index: 2, kind: input, shape index: {}]   ;;  %s3803_s3 = inlined_call_operand.vmem [shape: f32[1,256], index: 3, kind: input, shape index: {}]   ;;  %s3804_s4 = inlined_call_operand.vmem [shape: f32[64,256], index: 4, kind: input, shape index: {}]   ;;  %s3805_s5 = inlined_call_operand.vmem [shape: f32[64,256], index: 5, kind: input, shape index: {}]   ;;  %s3806_s6 = inlined_call_operand.vmem [shape: f32[1,256], index: 6, kind: input, shape index: {}]   ;;  %s3807_s7 = inlined_call_operand.vmem [shape: f32[1,64], index: 7, kind: input, shape index: {}]   ;;  %s3808_s8 = inlined_call_operand.vmem [shape: f32[8,8,64], index: 8, kind: output, shape index: {}]  }
   0x1   :  { %v51_v0 = vld [vmem:[%s3801_s1 + $0x70] sm:$0xff]  ;;  %v52_v1 = vld [vmem:[%s3801_s1 + $0x78] sm:$0xff]  ;;  %v49_v2 = vld [vmem:[%s3801_s1 + $0x60] sm:$0xff] }
   0x2   :  { %92 = vmatpush.msra.mxu0 %v51_v0  ;;  %133 = vmatpush.msra.mxu1 %v52_v1  ;;  %v50_v3 = vld [vmem:[%s3801_s1 + $0x68] sm:$0xff]  ;;  %v47_v4 = vld [vmem:[%s3801_s1 + $0x50] sm:$0xff]  ;;  %v48_v5 = vld [vmem:[%s3801_s1 + $0x58] sm:$0xff]  ;;  %v183_v55 = vand.u32 127, %v182_v52 }
   0x3   :  { %v45_v6 = vld [vmem:[%s3801_s1 + $0x40] sm:$0xff]  ;;  %v46_v7 = vld [vmem:[%s3801_s1 + $0x48] sm:$0xff]  ;;  %v43_v8 = vld [vmem:[%s3801_s1 + $0x30] sm:$0xff] }
   0x4   :  { %93 = vmatpush.msra.mxu0 %v49_v2  ;;  %134 = vmatpush.msra.mxu1 %v50_v3  ;;  %v44_v9 = vld [vmem:[%s3801_s1 + $0x38] sm:$0xff]  ;;  %v41_v10 = vld [vmem:[%s3801_s1 + $0x20] sm:$0xff]  ;;  %v42_v11 = vld [vmem:[%s3801_s1 + $0x28] sm:$0xff]  ;;  %v184_v58 = vadd.s32 128, %v183_v55  ;;  %v189_v61 = vand.u32 63, %v183_v55 }
   0x5   :  { %v39_v12 = vld [vmem:[%s3801_s1 + $0x10] sm:$0xff]  ;;  %v40_v13 = vld [vmem:[%s3801_s1 + $0x18] sm:$0xff]  ;;  %v37_v14 = vld [vmem:[%s3801_s1] sm:$0xff] }
   0x6   :  { %94 = vmatpush.msra.mxu0 %v47_v4  ;;  %135 = vmatpush.msra.mxu1 %v48_v5  ;;  %v38_v15 = vld [vmem:[%s3801_s1 + $0x8] sm:$0xff]  ;;  %v29_v16 = vld [vmem:[%s3800_s0] sm:$0xff]  ;;  %v2729_v17 = vld [vmem:[%s3802_s2 + $0x70] sm:$0xff]  ;;  %v196_v62 = vand.u32 63, %v184_v58  ;;  %vm2936_vm1 = vcmp.lt.s32.totalorder %v189_v61, 32 }
   0x7   :  { %v2734_v18 = vld [vmem:[%s3802_s2 + $0x78] sm:$0xff]  ;;  %292 = vmatpush.msra.mxu2 %v2729_v17  ;;  %v30_v19 = vld [vmem:[%s3800_s0 + $0x8] sm:$0xff]  ;;  %v2746_v20 = vld [vmem:[%s3802_s2 + $0x60] sm:$0xff] }
   0x8   :  { %95 = vmatpush.msra.mxu0 %v45_v6  ;;  %136 = vmatpush.msra.mxu1 %v46_v7  ;;  %v2751_v21 = vld [vmem:[%s3802_s2 + $0x68] sm:$0xff]  ;;  %v2758_v22 = vld [vmem:[%s3802_s2 + $0x50] sm:$0xff]  ;;  %v2763_v23 = vld [vmem:[%s3802_s2 + $0x58] sm:$0xff]  ;;  %vm2940_vm2 = vcmp.lt.s32.totalorder %v196_v62, 32 }
   0x9   :  { %312 = vmatpush.msra.mxu3 %v2734_v18  ;;  %293 = vmatpush.msra.mxu2 %v2746_v20  ;;  %v2770_v24 = vld [vmem:[%s3802_s2 + $0x40] sm:$0xff]  ;;  %v2775_v25 = vld [vmem:[%s3802_s2 + $0x48] sm:$0xff]  ;;  %v2784_v26 = vld [vmem:[%s3802_s2 + $0x30] sm:$0xff] }
   0xa   :  { %96 = vmatpush.msra.mxu0 %v43_v8  ;;  %137 = vmatpush.msra.mxu1 %v44_v9  ;;  %v2789_v27 = vld [vmem:[%s3802_s2 + $0x38] sm:$0xff]  ;;  %v31_v28 = vld [vmem:[%s3800_s0 + $0x10] sm:$0xff]  ;;  %v2805_v29 = vld [vmem:[%s3802_s2 + $0x20] sm:$0xff] }
   0xb   :  { %313 = vmatpush.msra.mxu3 %v2751_v21  ;;  %294 = vmatpush.msra.mxu2 %v2758_v22  ;;  %v2810_v30 = vld [vmem:[%s3802_s2 + $0x28] sm:$0xff]  ;;  %v2817_v31 = vld [vmem:[%s3802_s2 + $0x10] sm:$0xff]  ;;  %v2822_v32 = vld [vmem:[%s3802_s2 + $0x18] sm:$0xff] }
   0xc   :  { %97 = vmatpush.msra.mxu0 %v41_v10  ;;  %138 = vmatpush.msra.mxu1 %v42_v11  ;;  %v2829_v33 = vld [vmem:[%s3802_s2] sm:$0xff]  ;;  %v2834_v34 = vld [vmem:[%s3802_s2 + $0x8] sm:$0xff]  ;;  %v32_v35 = vld [vmem:[%s3800_s0 + $0x18] sm:$0xff] }
   0xd   :  { %314 = vmatpush.msra.mxu3 %v2763_v23  ;;  %295 = vmatpush.msra.mxu2 %v2770_v24  ;;  %v33_v37 = vld [vmem:[%s3800_s0 + $0x20] sm:$0xff]  ;;  %v34_v38 = vld [vmem:[%s3800_s0 + $0x28] sm:$0xff]  ;;  %v35_v39 = vld [vmem:[%s3800_s0 + $0x30] sm:$0xff] }
   0xe   :  { %98 = vmatpush.msra.mxu0 %v39_v12  ;;  %139 = vmatpush.msra.mxu1 %v40_v13  ;;  %v36_v40 = vld [vmem:[%s3800_s0 + $0x38] sm:$0xff]  ;;  %v53_v43 = vld [vmem:[%s3803_s3] sm:$0x3]  ;;  %s2625_s0 = smov 64  }
   0xf   :  { %315 = vmatpush.msra.mxu3 %v2775_v25  ;;  %296 = vmatpush.msra.mxu2 %v2784_v26  ;;  %v55_v44 = vperm.slane %v53_v43, 0  ;;  %v56_v45 = vperm.slane %v53_v43, 1 }
  0x10   :  { %99 = vmatpush.msra.mxu0 %v37_v14  ;;  %140 = vmatpush.msra.mxu1 %v38_v15 }
  0x11   :  { %2331 = vmatmul.msk.f32.vlgmr.msra.gmra.mxu0 %vm59_vm0, %v29_v16  ;;  %2339 = vmatmul.msk.f32.vlgmr.msra.gmra.mxu1 %vm59_vm0, %v29_v16 }
  0x12   :  { %712 = vmatpush.msrb.mxu1 %v2734_v18  ;;  %692 = vmatpush.msrb.mxu0 %v2729_v17 }
  0x13   :  { %316 = vmatpush.msra.mxu3 %v2789_v27  ;;  %297 = vmatpush.msra.mxu2 %v2805_v29 }
  0x14   :  { %713 = vmatpush.msrb.mxu1 %v2751_v21  ;;  %693 = vmatpush.msrb.mxu0 %v2746_v20 }
  0x15   :  { %317 = vmatpush.msra.mxu3 %v2810_v30  ;;  %298 = vmatpush.msra.mxu2 %v2817_v31 }
  0x16   :  { %714 = vmatpush.msrb.mxu1 %v2763_v23  ;;  %694 = vmatpush.msrb.mxu0 %v2758_v22 }
  0x17   :  { %318 = vmatpush.msra.mxu3 %v2822_v32  ;;  %299 = vmatpush.msra.mxu2 %v2829_v33 }
  0x18   :  { %715 = vmatpush.msrb.mxu1 %v2775_v25  ;;  %695 = vmatpush.msrb.mxu0 %v2770_v24 }
  0x19   :  { %2332 = vmatmul.msk.f32.gmra.mxu0 %vm59_vm0, %v30_v19  ;;  %2340 = vmatmul.msk.f32.gmra.mxu1 %vm59_vm0, %v30_v19 }
  0x1a   :  { %716 = vmatpush.msrb.mxu1 %v2789_v27  ;;  %696 = vmatpush.msrb.mxu0 %v2784_v26 }
  0x1b   :  { %319 = vmatpush.msra.mxu3 %v2834_v34  ;;  %300 = vmatmul.f32.vlgmr.msra.gmra.mxu2 %v2624_v36 }
  0x1c   :  { %717 = vmatpush.msrb.mxu1 %v2810_v30  ;;  %697 = vmatpush.msrb.mxu0 %v2805_v29 }
  0x1d   :  { %320 = vmatmul.f32.vlgmr.msra.gmra.mxu3 %v2624_v36  ;;  %392 = vmatpush.msrb.mxu2 %v2729_v17 }
  0x1e   :  { %412 = vmatpush.msrb.mxu3 %v2734_v18  ;;  %718 = vmatpush.msrb.mxu1 %v2822_v32 }
  0x1f   :  { %393 = vmatpush.msrb.mxu2 %v2746_v20  ;;  %698 = vmatpush.msrb.mxu0 %v2817_v31 }
  0x20   :  { %413 = vmatpush.msrb.mxu3 %v2751_v21  ;;  %719 = vmatpush.msrb.mxu1 %v2834_v34 }
  0x21   :  { %2333 = vmatmul.msk.f32.gmra.mxu0 %vm59_vm0, %v31_v28  ;;  %2341 = vmatmul.msk.f32.gmra.mxu1 %vm59_vm0, %v31_v28 }
  0x22   :  { %394 = vmatpush.msrb.mxu2 %v2758_v22  ;;  %414 = vmatpush.msrb.mxu3 %v2763_v23 }
  0x23   :  { %699 = vmatpush.msrb.mxu0 %v2829_v33  ;;  %912 = vmatpush.msra.mxu1 %v2734_v18 }
  0x24   :  { %395 = vmatpush.msrb.mxu2 %v2770_v24  ;;  %415 = vmatpush.msrb.mxu3 %v2775_v25 }
  0x25   :  { %892 = vmatpush.msra.mxu0 %v2729_v17  ;;  %913 = vmatpush.msra.mxu1 %v2751_v21 }
  0x26   :  { %396 = vmatpush.msrb.mxu2 %v2784_v26  ;;  %416 = vmatpush.msrb.mxu3 %v2789_v27 }
  0x27   :  { %893 = vmatpush.msra.mxu0 %v2746_v20  ;;  %914 = vmatpush.msra.mxu1 %v2763_v23 }
  0x28   :  { %397 = vmatpush.msrb.mxu2 %v2805_v29  ;;  %417 = vmatpush.msrb.mxu3 %v2810_v30 }
  0x29   :  { %2334 = vmatmul.msk.f32.gmra.mxu0 %vm59_vm0, %v32_v35  ;;  %2342 = vmatmul.msk.f32.gmra.mxu1 %vm59_vm0, %v32_v35 }
  0x2a   :  { %398 = vmatpush.msrb.mxu2 %v2817_v31  ;;  %418 = vmatpush.msrb.mxu3 %v2822_v32 }
  0x2b   :  { %894 = vmatpush.msra.mxu0 %v2758_v22  ;;  %915 = vmatpush.msra.mxu1 %v2775_v25 }
  0x2c   :  { %399 = vmatpush.msrb.mxu2 %v2829_v33  ;;  %419 = vmatpush.msrb.mxu3 %v2834_v34 }
  0x2d   :  { %895 = vmatpush.msra.mxu0 %v2770_v24  ;;  %916 = vmatpush.msra.mxu1 %v2789_v27 }
  0x2e   :  { %492 = vmatpush.msra.mxu2 %v2729_v17  ;;  %512 = vmatpush.msra.mxu3 %v2734_v18 }
  0x2f   :  { %896 = vmatpush.msra.mxu0 %v2784_v26  ;;  %917 = vmatpush.msra.mxu1 %v2810_v30 }
  0x30   :  { %493 = vmatpush.msra.mxu2 %v2746_v20  ;;  %513 = vmatpush.msra.mxu3 %v2751_v21 }
  0x31   :  { %2335 = vmatmul.msk.f32.gmra.mxu0 %vm59_vm0, %v33_v37  ;;  %2343 = vmatmul.msk.f32.gmra.mxu1 %vm59_vm0, %v33_v37 }
  0x32   :  { %494 = vmatpush.msra.mxu2 %v2758_v22  ;;  %514 = vmatpush.msra.mxu3 %v2763_v23 }
  0x33   :  { %897 = vmatpush.msra.mxu0 %v2805_v29  ;;  %918 = vmatpush.msra.mxu1 %v2822_v32 }
  0x34   :  { %495 = vmatpush.msra.mxu2 %v2770_v24  ;;  %515 = vmatpush.msra.mxu3 %v2775_v25 }
  0x35   :  { %898 = vmatpush.msra.mxu0 %v2817_v31  ;;  %919 = vmatpush.msra.mxu1 %v2834_v34 }
  0x36   :  { %496 = vmatpush.msra.mxu2 %v2784_v26  ;;  %516 = vmatpush.msra.mxu3 %v2789_v27 }
  0x37   :  { %899 = vmatpush.msra.mxu0 %v2829_v33 }
  0x38   :  { %497 = vmatpush.msra.mxu2 %v2805_v29  ;;  %517 = vmatpush.msra.mxu3 %v2810_v30 }
  0x39   :  { %2336 = vmatmul.msk.f32.gmra.mxu0 %vm59_vm0, %v34_v38  ;;  %2344 = vmatmul.msk.f32.gmra.mxu1 %vm59_vm0, %v34_v38 }
  0x3a   :  { %498 = vmatpush.msra.mxu2 %v2817_v31  ;;  %518 = vmatpush.msra.mxu3 %v2822_v32 }
  0x3c   :  { %499 = vmatpush.msra.mxu2 %v2829_v33  ;;  %519 = vmatpush.msra.mxu3 %v2834_v34 }
  0x41   :  { %2337 = vmatmul.msk.f32.gmra.mxu0 %vm59_vm0, %v35_v39  ;;  %2345 = vmatmul.msk.f32.gmra.mxu1 %vm59_vm0, %v35_v39 }
  0x49   :  { %2338 = vmatmul.msk.f32.gmra.mxu0 %vm59_vm0, %v36_v40  ;;  %2346 = vmatmul.msk.f32.gmra.mxu1 %vm59_vm0, %v36_v40 }
  0x8e   :  { %v101_v41 = vpop.f32.mrf.mxu0  ;;  %v142_v42 = vpop.f32.mrf.mxu1 }
  0x96   :  { %v104_v46 = vpop.f32.mrf.mxu0  ;;  %v145_v47 = vpop.f32.mrf.mxu1 }
  0x97   :  { %v2924_v48 = vadd.f32 %v104_v46, %v55_v44  ;;  %v2926_v49 = vadd.f32 %v145_v47, %v56_v45  ;;  %v3004_v47 = vadd.f32 %v101_v41, %v55_v44 }
  0x9e   :  { %v107_v50 = vpop.f32.mrf.mxu0  ;;  %v148_v51 = vpop.f32.mrf.mxu1 }
  0x9f   :  { %v2928_v53 = vadd.f32 %v107_v50, %v55_v44  ;;  %v2930_v54 = vadd.f32 %v148_v51, %v56_v45  ;;  %v3006_v50 = vadd.f32 %v142_v42, %v56_v45  ;;  %v301_v55 = vpop.f32.mrf.mxu2 }
  0xa6   :  { %v110_v56 = vpop.f32.mrf.mxu0  ;;  %v151_v57 = vpop.f32.mrf.mxu1 }
  0xa7   :  { %v2932_v59 = vadd.f32 %v110_v56, %v55_v44  ;;  %v2934_v60 = vadd.f32 %v151_v57, %v56_v45  ;;  %v321_v56 = vpop.f32.mrf.mxu3 }
  0xae   :  { %v113_v63 = vpop.f32.mrf.mxu0  ;;  %v154_v0 = vpop.f32.mrf.mxu1 }
  0xaf   :  { %v2944_v3 = vadd.f32 %v113_v63, %v55_v44  ;;  %v2946_v4 = vadd.f32 %v154_v0, %v56_v45 }
  0xb1   :  { %v255_v5 = vsel %vm2936_vm1, %v2932_v59, %v2944_v3  ;;  %v256_v6 = vsel %vm2940_vm2, %v2934_v60, %v2946_v4  ;;  %v259_v7 = vsel %vm2936_vm1, %v2944_v3, %v2932_v59  ;;  %v260_v8 = vsel %vm2940_vm2, %v2946_v4, %v2934_v60 }
  0xb6   :  { %v116_v9 = vpop.f32.mrf.mxu0  ;;  %v157_v10 = vpop.f32.mrf.mxu1 }
  0xb7   :  { %v2964_v11 = vadd.f32 %v116_v9, %v55_v44  ;;  %v2966_v12 = vadd.f32 %v157_v10, %v56_v45 }
  0xb9   :  { %v243_v13 = vsel %vm2936_vm1, %v2928_v53, %v2964_v11  ;;  %v244_v14 = vsel %vm2940_vm2, %v2930_v54, %v2966_v12  ;;  %v247_v15 = vsel %vm2936_vm1, %v2964_v11, %v2928_v53 }
  0xbe   :  { %v119_v19 = vpop.f32.mrf.mxu0  ;;  %v160_v28 = vpop.f32.mrf.mxu1 }
  0xbf   :  { %v2984_v35 = vadd.f32 %v119_v19, %v55_v44  ;;  %v2986_v36 = vadd.f32 %v160_v28, %v56_v45 }
  0xc1   :  { %v231_v37 = vsel %vm2936_vm1, %v2924_v48, %v2984_v35  ;;  %v232_v38 = vsel %vm2940_vm2, %v2926_v49, %v2986_v36 }
  0xc6   :  { %v122_v43 = vpop.f32.mrf.mxu0  ;;  %v163_v46 = vpop.f32.mrf.mxu1 }
  0xc7   :  { %v3008_v51 = vadd.f32 %v122_v43, %v55_v44  ;;  %v3010_v52 = vadd.f32 %v163_v46, %v56_v45 }
  0xc9   :  { %v219_v57 = vsel %vm2936_vm1, %v3004_v47, %v3008_v51  ;;  %v220_v58 = vsel %vm2940_vm2, %v3006_v50, %v3010_v52 }
  0xca   :  { %v324_v44 = vadd.f32 %v301_v55, %v219_v57  ;;  %v325_v45 = vadd.f32 %v321_v56, %v220_v58 }
  0xcc   :  { %v2347_v61 = vmul.f32 -1.442695, %v324_v44  ;;  %v2348_v62 = vmul.f32 -1.442695, %v325_v45 }
  0xce   :  { %2443 = vpow2.f32 %v2347_v61 }
  0xcf   :  { %2445 = vpow2.f32 %v2348_v62 }
  0xd4   :  { %v2444_v63 = vpop.eup %2443 }
  0xd5   :  { %v2446_v0 = vpop.eup %2445  ;;  %v332_v9 = vadd.f32 1.0, %v2444_v63 }
  0xd6   :  { %v333_v10 = vadd.f32 1.0, %v2446_v0 }
  0xd7   :  { %2447 = vrcp.f32 %v332_v9  ;;  %v345_v44 = vand.u32 2147483648, %v332_v9  ;;  %vm339_vm7 = vweird.f32 %v332_v9  ;;  %v343_v61 = vand.u32 2147483647, %v332_v9 }
  0xd8   :  { %2449 = vrcp.f32 %v333_v10  ;;  %v360_v42 = vand.u32 2147483648, %v333_v10  ;;  %v358_v56 = vand.u32 2147483647, %v333_v10  ;;  %vm354_vm5 = vweird.f32 %v333_v10 }
  0xd9   :  { %vm344_vm10 = vcmp.eq.f32.partialorder %v343_v61, 8.507059e+37 }
  0xda   :  { %v361_v45 = vor.u32 1.1754944e-38, %v360_v42  ;;  %vm359_vm8 = vcmp.eq.f32.partialorder %v358_v56, 8.507059e+37 }
  0xdd   :  { %v2448_v19 = vpop.eup %2447 }
  0xde   :  { %v2450_v28 = vpop.eup %2449  ;;  %v335_v43 = vmul.f32 %v2448_v19, %v332_v9  ;;  %vm340_vm4 = vweird.f32 %v2448_v19 }
  0xdf   :  { %v350_v46 = vmul.f32 %v2450_v28, %v333_v10  ;;  %vm355_vm3 = vweird.f32 %v2450_v28  ;;  %vm341_vm9 = vmor %vm339_vm7, %vm340_vm4 }
  0xe0   :  { %v336_v41 = vsub.f32 1.0, %v335_v43  ;;  %vm356_vm6 = vmor %vm354_vm5, %vm355_vm3 }
  0xe1   :  { %v351_v40 = vsub.f32 1.0, %v350_v46 }
  0xe2   :  { %v337_v39 = vmul.f32 %v2448_v19, %v336_v41  ;;  %v346_v41 = vor.u32 1.1754944e-38, %v345_v44 }
  0xe3   :  { %v352_v55 = vmul.f32 %v2450_v28, %v351_v40 }
  0xe4   :  { %v338_v57 = vadd.f32 %v2448_v19, %v337_v39 }
  0xe5   :  { %v353_v58 = vadd.f32 %v2450_v28, %v352_v55 }
  0xe6   :  { %v342_v0 = vsel %vm341_vm9, %v2448_v19, %v338_v57 }
  0xe7   :  { %v357_v62 = vsel %vm356_vm6, %v2450_v28, %v353_v58  ;;  %v347_v46 = vsel %vm344_vm10, %v346_v41, %v342_v0 }
  0xe8   :  { %v362_v63 = vsel %vm359_vm8, %v361_v45, %v357_v62  ;;  %v366_v39 = vmul.f32 0.0, %v347_v46 }
  0xe9   :  { %v364_v43 = vmul.f32 2.0, %v362_v63 }
  0xeb   :  { %v2349_v40 = vadd.f32 -1.0, %v364_v43 }
  0xed   :  { %v367_v16 = vmul.f32 %v2349_v40, %v347_v46 }
  0xef   :  { %369 = vrot.lane.b32.xlu0 %v367_v16, %s2625_s0 }
 0x161   :  { %v370_v10 = vpop.permute.xlu0 %369 }
 0x162   :  { %v3029_v55 = vadd.f32 %v370_v10, %v366_v39 }
 0x164   :  { %2451 = vtanh.f32 %v3029_v55 }
 0x16a   :  { %v2452_v42 = vpop.eup %2451 }
 0x16b   :  { %v374_v9 = vmul.f32 %v2452_v42, %v362_v63 }
 0x16d   :  { %376 = vrot.lane.b32.xlu0 %v374_v9, %s2625_s0 }
 0x1df   :  { %v377_v19 = vpop.permute.xlu0 %376 }
 0x1e0   :  { %379 = vst.msk [vmem:[#allocation2] sm:$0xff] %vm59_vm0, %v377_v19  ;;  %2350 = vmatmul.msk.f32.vlgmr.msrb.gmra.mxu2 %vm59_vm0, %v377_v19  ;;  %2351 = vmatmul.msk.f32.vlgmr.msrb.gmra.mxu3 %vm59_vm0, %v377_v19 }
 0x1e1   :  { %592 = vmatpush.msrb.mxu2 %v2729_v17  ;;  %612 = vmatpush.msrb.mxu3 %v2734_v18 }
 0x1e3   :  { %593 = vmatpush.msrb.mxu2 %v2746_v20  ;;  %613 = vmatpush.msrb.mxu3 %v2751_v21 }
 0x1e5   :  { %594 = vmatpush.msrb.mxu2 %v2758_v22  ;;  %614 = vmatpush.msrb.mxu3 %v2763_v23 }
 0x1e7   :  { %595 = vmatpush.msrb.mxu2 %v2770_v24  ;;  %615 = vmatpush.msrb.mxu3 %v2775_v25 }
 0x1e9   :  { %596 = vmatpush.msrb.mxu2 %v2784_v26  ;;  %616 = vmatpush.msrb.mxu3 %v2789_v27 }
 0x1eb   :  { %597 = vmatpush.msrb.mxu2 %v2805_v29  ;;  %617 = vmatpush.msrb.mxu3 %v2810_v30 }
 0x1ed   :  { %598 = vmatpush.msrb.mxu2 %v2817_v31  ;;  %618 = vmatpush.msrb.mxu3 %v2822_v32 }
 0x1ef   :  { %599 = vmatpush.msrb.mxu2 %v2829_v33  ;;  %619 = vmatpush.msrb.mxu3 %v2834_v34 }
 0x263   :  { %v401_v16 = vpop.f32.mrf.mxu2  ;;  %v421_v28 = vpop.f32.mrf.mxu3 }
 0x264   :  { %v424_v56 = vadd.f32 %v401_v16, %v231_v37  ;;  %v425_v57 = vadd.f32 %v421_v28, %v232_v38 }
 0x266   :  { %v2352_v58 = vmul.f32 -1.442695, %v424_v56  ;;  %v2353_v44 = vmul.f32 -1.442695, %v425_v57 }
 0x268   :  { %2453 = vpow2.f32 %v2352_v58 }
 0x269   :  { %2455 = vpow2.f32 %v2353_v44 }
 0x26e   :  { %v2454_v45 = vpop.eup %2453 }
 0x26f   :  { %v2456_v61 = vpop.eup %2455  ;;  %v432_v62 = vadd.f32 1.0, %v2454_v45 }
 0x270   :  { %v433_v63 = vadd.f32 1.0, %v2456_v61 }
 0x271   :  { %2457 = vrcp.f32 %v432_v62  ;;  %v445_v16 = vand.u32 2147483648, %v432_v62  ;;  %vm439_vm15 = vweird.f32 %v432_v62  ;;  %v443_v56 = vand.u32 2147483647, %v432_v62 }
 0x272   :  { %2459 = vrcp.f32 %v433_v63  ;;  %v460_v10 = vand.u32 2147483648, %v433_v63  ;;  %v458_v38 = vand.u32 2147483647, %v433_v63  ;;  %vm454_vm13 = vweird.f32 %v433_v63 }
 0x273   :  { %v446_v61 = vor.u32 1.1754944e-38, %v445_v16  ;;  %vm444_vm5 = vcmp.eq.f32.partialorder %v443_v56, 8.507059e+37 }
 0x274   :  { %v461_v28 = vor.u32 1.1754944e-38, %v460_v10  ;;  %vm459_vm3 = vcmp.eq.f32.partialorder %v458_v38, 8.507059e+37 }
 0x277   :  { %v2458_v0 = vpop.eup %2457 }
 0x278   :  { %v2460_v43 = vpop.eup %2459  ;;  %v435_v41 = vmul.f32 %v2458_v0, %v432_v62  ;;  %vm440_vm12 = vweird.f32 %v2458_v0 }
 0x279   :  { %v450_v37 = vmul.f32 %v2460_v43, %v433_v63  ;;  %vm455_vm11 = vweird.f32 %v2460_v43  ;;  %vm441_vm4 = vmor %vm439_vm15, %vm440_vm12 }
 0x27a   :  { %v436_v40 = vsub.f32 1.0, %v435_v41  ;;  %vm456_vm14 = vmor %vm454_vm13, %vm455_vm11 }
 0x27b   :  { %v451_v46 = vsub.f32 1.0, %v450_v37 }
 0x27c   :  { %v437_v39 = vmul.f32 %v2458_v0, %v436_v40 }
 0x27d   :  { %v452_v42 = vmul.f32 %v2460_v43, %v451_v46 }
 0x27e   :  { %v438_v9 = vadd.f32 %v2458_v0, %v437_v39 }
 0x27f   :  { %v453_v19 = vadd.f32 %v2460_v43, %v452_v42 }
 0x280   :  { %v442_v44 = vsel %vm441_vm4, %v2458_v0, %v438_v9 }
 0x281   :  { %v457_v57 = vsel %vm456_vm14, %v2460_v43, %v453_v19  ;;  %v447_v37 = vsel %vm444_vm5, %v446_v61, %v442_v44 }
 0x282   :  { %v462_v58 = vsel %vm459_vm3, %v461_v28, %v457_v57  ;;  %v466_v63 = vmul.f32 %v447_v37, %v3029_v55 }
 0x283   :  { %v464_v45 = vmul.f32 2.0, %v462_v58 }
 0x285   :  { %v2354_v41 = vadd.f32 -1.0, %v464_v45 }
 0x287   :  { %v467_v40 = vmul.f32 %v2354_v41, %v447_v37 }
 0x289   :  { %469 = vrot.lane.b32.xlu1 %v467_v40, %s2625_s0 }
 0x2fb   :  { %v470_v46 = vpop.permute.xlu1 %469 }
 0x2fc   :  { %v3064_v39 = vadd.f32 %v470_v46, %v466_v63 }
 0x2fe   :  { %2461 = vtanh.f32 %v3064_v39 }
 0x304   :  { %v2462_v62 = vpop.eup %2461 }
 0x305   :  { %v474_v43 = vmul.f32 %v2462_v62, %v462_v58 }
 0x307   :  { %476 = vrot.lane.b32.xlu1 %v474_v43, %s2625_s0 }
 0x379   :  { %v477_v0 = vpop.permute.xlu1 %476 }
 0x37a   :  { %479 = vst.msk [vmem:[#allocation2 + $0x8] sm:$0xff] %vm59_vm0, %v477_v0  ;;  %2355 = vmatmul.msk.f32.vlgmr.msra.gmra.mxu2 %vm59_vm0, %v477_v0  ;;  %2356 = vmatmul.msk.f32.vlgmr.msra.gmra.mxu3 %vm59_vm0, %v477_v0 }
 0x37b   :  { %792 = vmatpush.msra.mxu2 %v2729_v17  ;;  %812 = vmatpush.msra.mxu3 %v2734_v18 }
 0x37d   :  { %793 = vmatpush.msra.mxu2 %v2746_v20  ;;  %813 = vmatpush.msra.mxu3 %v2751_v21 }
 0x37f   :  { %794 = vmatpush.msra.mxu2 %v2758_v22  ;;  %814 = vmatpush.msra.mxu3 %v2763_v23 }
 0x381   :  { %795 = vmatpush.msra.mxu2 %v2770_v24  ;;  %815 = vmatpush.msra.mxu3 %v2775_v25 }
 0x383   :  { %796 = vmatpush.msra.mxu2 %v2784_v26  ;;  %816 = vmatpush.msra.mxu3 %v2789_v27 }
 0x385   :  { %797 = vmatpush.msra.mxu2 %v2805_v29  ;;  %817 = vmatpush.msra.mxu3 %v2810_v30 }
 0x387   :  { %798 = vmatpush.msra.mxu2 %v2817_v31  ;;  %818 = vmatpush.msra.mxu3 %v2822_v32 }
 0x389   :  { %799 = vmatpush.msra.mxu2 %v2829_v33  ;;  %819 = vmatpush.msra.mxu3 %v2834_v34 }
 0x3fd   :  { %v501_v55 = vpop.f32.mrf.mxu2  ;;  %v521_v10 = vpop.f32.mrf.mxu3 }
 0x3fe   :  { %v524_v42 = vadd.f32 %v501_v55, %v243_v13  ;;  %v525_v38 = vadd.f32 %v521_v10, %v244_v14 }
 0x400   :  { %v2357_v9 = vmul.f32 -1.442695, %v524_v42  ;;  %v2358_v19 = vmul.f32 -1.442695, %v525_v38 }
 0x402   :  { %2463 = vpow2.f32 %v2357_v9 }
 0x403   :  { %2465 = vpow2.f32 %v2358_v19 }
 0x408   :  { %v2464_v16 = vpop.eup %2463 }
 0x409   :  { %v2466_v28 = vpop.eup %2465  ;;  %v532_v56 = vadd.f32 1.0, %v2464_v16 }
 0x40a   :  { %v533_v57 = vadd.f32 1.0, %v2466_v28 }
 0x40b   :  { %2467 = vrcp.f32 %v532_v56  ;;  %v545_v43 = vand.u32 2147483648, %v532_v56  ;;  %vm539_vm10 = vweird.f32 %v532_v56  ;;  %v543_v55 = vand.u32 2147483647, %v532_v56 }
 0x40c   :  { %2469 = vrcp.f32 %v533_v57  ;;  %v560_v40 = vand.u32 2147483648, %v533_v57  ;;  %v558_v14 = vand.u32 2147483647, %v533_v57  ;;  %vm554_vm8 = vweird.f32 %v533_v57 }
 0x40d   :  { %v546_v19 = vor.u32 1.1754944e-38, %v545_v43  ;;  %vm544_vm13 = vcmp.eq.f32.partialorder %v543_v55, 8.507059e+37 }
 0x40e   :  { %v561_v0 = vor.u32 1.1754944e-38, %v560_v40  ;;  %vm559_vm11 = vcmp.eq.f32.partialorder %v558_v14, 8.507059e+37 }
 0x411   :  { %v2468_v58 = vpop.eup %2467 }
 0x412   :  { %v2470_v44 = vpop.eup %2469  ;;  %v535_v45 = vmul.f32 %v2468_v58, %v532_v56  ;;  %vm540_vm7 = vweird.f32 %v2468_v58 }
 0x413   :  { %v550_v13 = vmul.f32 %v2470_v44, %v533_v57  ;;  %vm555_vm6 = vweird.f32 %v2470_v44  ;;  %vm541_vm12 = vmor %vm539_vm10, %vm540_vm7 }
 0x414   :  { %v536_v61 = vsub.f32 1.0, %v535_v45  ;;  %vm556_vm9 = vmor %vm554_vm8, %vm555_vm6 }
 0x415   :  { %v551_v41 = vsub.f32 1.0, %v550_v13 }
 0x416   :  { %v537_v37 = vmul.f32 %v2468_v58, %v536_v61 }
 0x417   :  { %v552_v63 = vmul.f32 %v2470_v44, %v551_v41 }
 0x418   :  { %v538_v46 = vadd.f32 %v2468_v58, %v537_v37 }
 0x419   :  { %v553_v62 = vadd.f32 %v2470_v44, %v552_v63 }
 0x41a   :  { %v542_v38 = vsel %vm541_vm12, %v2468_v58, %v538_v46 }
 0x41b   :  { %v557_v10 = vsel %vm556_vm9, %v2470_v44, %v553_v62  ;;  %v547_v28 = vsel %vm544_vm13, %v546_v19, %v542_v38 }
 0x41c   :  { %v562_v42 = vsel %vm559_vm11, %v561_v0, %v557_v10  ;;  %v566_v57 = vmul.f32 %v547_v28, %v3064_v39 }
 0x41d   :  { %v564_v9 = vmul.f32 2.0, %v562_v42 }
 0x41f   :  { %v2359_v16 = vadd.f32 -1.0, %v564_v9 }
 0x421   :  { %v567_v45 = vmul.f32 %v2359_v16, %v547_v28 }
 0x423   :  { %569 = vrot.lane.b32.xlu2 %v567_v45, %s2625_s0 }
 0x47d   :  { %v570_v13 = vpop.permute.xlu2 %569 }
 0x47e   :  { %v3099_v61 = vadd.f32 %v570_v13, %v566_v57 }
 0x480   :  { %2471 = vtanh.f32 %v3099_v61 }
 0x486   :  { %v2472_v56 = vpop.eup %2471 }
 0x487   :  { %v574_v44 = vmul.f32 %v2472_v56, %v562_v42 }
 0x489   :  { %576 = vrot.lane.b32.xlu2 %v574_v44, %s2625_s0 }
 0x4e3   :  { %v577_v58 = vpop.permute.xlu2 %576 }
 0x4e4   :  { %579 = vst.msk [vmem:[#allocation2 + $0x10] sm:$0xff] %vm59_vm0, %v577_v58  ;;  %2360 = vmatmul.msk.f32.vlgmr.msrb.gmra.mxu2 %vm59_vm0, %v577_v58  ;;  %2361 = vmatmul.msk.f32.vlgmr.msrb.gmra.mxu3 %vm59_vm0, %v577_v58 }
 0x4e5   :  { %992 = vmatpush.msrb.mxu2 %v2729_v17  ;;  %1012 = vmatpush.msrb.mxu3 %v2734_v18 }
 0x4e7   :  { %993 = vmatpush.msrb.mxu2 %v2746_v20  ;;  %1013 = vmatpush.msrb.mxu3 %v2751_v21 }
 0x4e9   :  { %994 = vmatpush.msrb.mxu2 %v2758_v22  ;;  %1014 = vmatpush.msrb.mxu3 %v2763_v23 }
 0x4eb   :  { %995 = vmatpush.msrb.mxu2 %v2770_v24  ;;  %1015 = vmatpush.msrb.mxu3 %v2775_v25 }
 0x4ed   :  { %996 = vmatpush.msrb.mxu2 %v2784_v26  ;;  %1016 = vmatpush.msrb.mxu3 %v2789_v27 }
 0x4ef   :  { %997 = vmatpush.msrb.mxu2 %v2805_v29  ;;  %1017 = vmatpush.msrb.mxu3 %v2810_v30 }
 0x4f1   :  { %998 = vmatpush.msrb.mxu2 %v2817_v31  ;;  %1018 = vmatpush.msrb.mxu3 %v2822_v32 }
 0x4f3   :  { %999 = vmatpush.msrb.mxu2 %v2829_v33  ;;  %1019 = vmatpush.msrb.mxu3 %v2834_v34 }
 0x567   :  { %v601_v17 = vpop.f32.mrf.mxu2  ;;  %v621_v18 = vpop.f32.mrf.mxu3 }
 0x568   :  { %v624_v20 = vadd.f32 %v601_v17, %v255_v5  ;;  %v625_v21 = vadd.f32 %v621_v18, %v256_v6 }
 0x56a   :  { %v2362_v22 = vmul.f32 -1.442695, %v624_v20  ;;  %v2363_v23 = vmul.f32 -1.442695, %v625_v21 }
 0x56c   :  { %2473 = vpow2.f32 %v2362_v22 }
 0x56d   :  { %2475 = vpow2.f32 %v2363_v23 }
 0x572   :  { %v2474_v24 = vpop.eup %2473 }
 0x573   :  { %v2476_v25 = vpop.eup %2475  ;;  %v632_v26 = vadd.f32 1.0, %v2474_v24 }
 0x574   :  { %v633_v27 = vadd.f32 1.0, %v2476_v25 }
 0x575   :  { %2477 = vrcp.f32 %v632_v26  ;;  %v645_v63 = vand.u32 2147483648, %v632_v26  ;;  %vm639_vm5 = vweird.f32 %v632_v26  ;;  %v643_v46 = vand.u32 2147483647, %v632_v26 }
 0x576   :  { %2479 = vrcp.f32 %v633_v27  ;;  %v660_v39 = vand.u32 2147483648, %v633_v27  ;;  %v658_v6 = vand.u32 2147483647, %v633_v27  ;;  %vm654_vm3 = vweird.f32 %v633_v27 }
 0x577   :  { %v646_v10 = vor.u32 1.1754944e-38, %v645_v63  ;;  %vm644_vm8 = vcmp.eq.f32.partialorder %v643_v46, 8.507059e+37 }
 0x578   :  { %v661_v14 = vor.u32 1.1754944e-38, %v660_v39  ;;  %vm659_vm6 = vcmp.eq.f32.partialorder %v658_v6, 8.507059e+37 }
 0x57b   :  { %v2478_v29 = vpop.eup %2477 }
 0x57c   :  { %v2480_v30 = vpop.eup %2479  ;;  %v635_v31 = vmul.f32 %v2478_v29, %v632_v26  ;;  %vm640_vm15 = vweird.f32 %v2478_v29 }
 0x57d   :  { %v650_v32 = vmul.f32 %v2480_v30, %v633_v27  ;;  %vm655_vm14 = vweird.f32 %v2480_v30  ;;  %vm641_vm7 = vmor %vm639_vm5, %vm640_vm15 }
 0x57e   :  { %v636_v33 = vsub.f32 1.0, %v635_v31  ;;  %vm656_vm4 = vmor %vm654_vm3, %vm655_vm14 }
 0x57f   :  { %v651_v34 = vsub.f32 1.0, %v650_v32 }
 0x580   :  { %v637_v5 = vmul.f32 %v2478_v29, %v636_v33 }
 0x581   :  { %v652_v41 = vmul.f32 %v2480_v30, %v651_v34 }
 0x582   :  { %v638_v37 = vadd.f32 %v2478_v29, %v637_v5 }
 0x583   :  { %v653_v40 = vadd.f32 %v2480_v30, %v652_v41 }
 0x584   :  { %v642_v0 = vsel %vm641_vm7, %v2478_v29, %v638_v37 }
 0x585   :  { %v657_v62 = vsel %vm656_vm4, %v2480_v30, %v653_v40  ;;  %v647_v38 = vsel %vm644_vm8, %v646_v10, %v642_v0  ;;  %vm1082_vm4 = vcmask 523520  }
 0x586   :  { %v662_v43 = vsel %vm659_vm6, %v661_v14, %v657_v62  ;;  %v666_v19 = vmul.f32 %v647_v38, %v3099_v61 }
 0x587   :  { %v664_v55 = vmul.f32 2.0, %v662_v43 }
 0x589   :  { %v2364_v42 = vadd.f32 -1.0, %v664_v55 }
 0x58b   :  { %v667_v9 = vmul.f32 %v2364_v42, %v647_v38 }
 0x58d   :  { %669 = vrot.lane.b32.xlu0 %v667_v9, %s2625_s0 }
 0x5ff   :  { %v670_v16 = vpop.permute.xlu0 %669 }
 0x600   :  { %v672_v28 = vadd.f32 %v670_v16, %v666_v19  ;;  %v3813_v16 = vsel %vm2940_vm2, %v2966_v12, %v2930_v54 }
 0x602   :  { %2481 = vtanh.f32 %v672_v28 }
 0x608   :  { %v2482_v45 = vpop.eup %2481 }
 0x609   :  { %v674_v57 = vmul.f32 %v2482_v45, %v662_v43 }
 0x60b   :  { %676 = vrot.lane.b32.xlu1 %v674_v57, %s2625_s0 }
 0x67d   :  { %v677_v13 = vpop.permute.xlu1 %676 }
 0x67e   :  { %679 = vst.msk [vmem:[#allocation2 + $0x18] sm:$0xff] %vm59_vm0, %v677_v13  ;;  %2365 = vmatmul.msk.f32.vlgmr.msrb.gmra.mxu0 %vm59_vm0, %v677_v13  ;;  %2366 = vmatmul.msk.f32.vlgmr.msrb.gmra.mxu1 %vm59_vm0, %v677_v13 }
 0x685   :  { %v1093_v10 = vld [vmem:[#allocation2 + $0x18] sm:$0xff] }
 0x6fb   :  { %v701_v56 = vpop.f32.mrf.mxu0  ;;  %v721_v44 = vpop.f32.mrf.mxu1 }
 0x6fc   :  { %v724_v61 = vadd.f32 %v701_v56, %v259_v7  ;;  %v725_v58 = vadd.f32 %v721_v44, %v260_v8 }
 0x6fe   :  { %v2367_v17 = vmul.f32 -1.442695, %v724_v61  ;;  %v2368_v18 = vmul.f32 -1.442695, %v725_v58 }
 0x700   :  { %2483 = vpow2.f32 %v2367_v17 }
 0x701   :  { %2485 = vpow2.f32 %v2368_v18 }
 0x706   :  { %v2484_v20 = vpop.eup %2483 }
 0x707   :  { %v2486_v21 = vpop.eup %2485  ;;  %v732_v22 = vadd.f32 1.0, %v2484_v20 }
 0x708   :  { %v733_v23 = vadd.f32 1.0, %v2486_v21 }
 0x709   :  { %2487 = vrcp.f32 %v732_v22  ;;  %v745_v31 = vand.u32 2147483648, %v732_v22  ;;  %vm739_vm13 = vweird.f32 %v732_v22  ;;  %v743_v33 = vand.u32 2147483647, %v732_v22 }
 0x70a   :  { %2489 = vrcp.f32 %v733_v23  ;;  %v760_v29 = vand.u32 2147483648, %v733_v23  ;;  %v758_v4 = vand.u32 2147483647, %v733_v23  ;;  %vm754_vm11 = vweird.f32 %v733_v23 }
 0x70b   :  { %v746_v6 = vor.u32 1.1754944e-38, %v745_v31  ;;  %vm744_vm3 = vcmp.eq.f32.partialorder %v743_v33, 8.507059e+37 }
 0x70c   :  { %v761_v32 = vor.u32 1.1754944e-38, %v760_v29  ;;  %vm759_vm14 = vcmp.eq.f32.partialorder %v758_v4, 8.507059e+37 }
 0x70f   :  { %v2488_v24 = vpop.eup %2487 }
 0x710   :  { %v2490_v25 = vpop.eup %2489  ;;  %v735_v59 = vmul.f32 %v2488_v24, %v732_v22  ;;  %vm740_vm10 = vweird.f32 %v2488_v24 }
 0x711   :  { %v750_v3 = vmul.f32 %v2490_v25, %v733_v23  ;;  %vm755_vm9 = vweird.f32 %v2490_v25  ;;  %vm741_vm15 = vmor %vm739_vm13, %vm740_vm10 }
 0x712   :  { %v736_v7 = vsub.f32 1.0, %v735_v59  ;;  %vm756_vm12 = vmor %vm754_vm11, %vm755_vm9 }
 0x713   :  { %v751_v26 = vsub.f32 1.0, %v750_v3 }
 0x714   :  { %v737_v27 = vmul.f32 %v2488_v24, %v736_v7 }
 0x715   :  { %v752_v60 = vmul.f32 %v2490_v25, %v751_v26 }
 0x716   :  { %v738_v8 = vadd.f32 %v2488_v24, %v737_v27 }
 0x717   :  { %v753_v30 = vadd.f32 %v2490_v25, %v752_v60 }
 0x718   :  { %v742_v39 = vsel %vm741_vm15, %v2488_v24, %v738_v8 }
 0x719   :  { %v757_v34 = vsel %vm756_vm12, %v2490_v25, %v753_v30  ;;  %v747_v40 = vsel %vm744_vm3, %v746_v6, %v742_v39  ;;  %v1089_v39 = vld [vmem:[#allocation2 + $0x10] sm:$0xff] }
 0x71a   :  { %v762_v5 = vsel %vm759_vm14, %v761_v32, %v757_v34  ;;  %v766_v14 = vmul.f32 %v747_v40, %v672_v28 }
 0x71b   :  { %v764_v41 = vmul.f32 2.0, %v762_v5 }
 0x71d   :  { %v2369_v37 = vadd.f32 -1.0, %v764_v41 }
 0x71f   :  { %v767_v63 = vmul.f32 %v2369_v37, %v747_v40  ;;  %v3814_v40 = vsel %vm2936_vm1, %v2984_v35, %v2924_v48 }
 0x721   :  { %769 = vrot.lane.b32.xlu2 %v767_v63, %s2625_s0 }
 0x77b   :  { %v770_v46 = vpop.permute.xlu2 %769 }
 0x77c   :  { %v772_v62 = vadd.f32 %v770_v46, %v766_v14  ;;  %v3815_v14 = vsel %vm2940_vm2, %v2986_v36, %v2926_v49 }
 0x77e   :  { %2491 = vtanh.f32 %v772_v62 }
 0x784   :  { %v2492_v43 = vpop.eup %2491 }
 0x785   :  { %v774_v0 = vmul.f32 %v2492_v43, %v762_v5 }
 0x787   :  { %776 = vrot.lane.b32.xlu0 %v774_v0, %s2625_s0 }
 0x7f9   :  { %v777_v55 = vpop.permute.xlu0 %776 }
 0x7fa   :  { %779 = vst.msk [vmem:[#allocation2 + $0x20] sm:$0xff] %vm59_vm0, %v777_v55  ;;  %2370 = vmatmul.msk.f32.vlgmr.msra.gmra.mxu2 %vm59_vm0, %v777_v55  ;;  %2371 = vmatmul.msk.f32.vlgmr.msra.gmra.mxu3 %vm59_vm0, %v777_v55 }
 0x801   :  { %v1094_v42 = vld [vmem:[#allocation2 + $0x20] sm:$0xff] }
 0x802   :  { %1095 = vst.msk [vmem:[#allocation2 + $0x18] sm:$0xff] %vm1082_vm4, %v1094_v42 }
 0x803   :  { %1096 = vst.msk [vmem:[#allocation2 + $0x20] sm:$0xff] %vm1082_vm4, %v1093_v10 }
 0x87d   :  { %v801_v38 = vpop.f32.mrf.mxu2  ;;  %v821_v9 = vpop.f32.mrf.mxu3 }
 0x87e   :  { %v824_v19 = vadd.f32 %v801_v38, %v247_v15  ;;  %v825_v28 = vadd.f32 %v821_v9, %v3813_v16 }
 0x880   :  { %v2372_v45 = vmul.f32 -1.442695, %v824_v19  ;;  %v2373_v57 = vmul.f32 -1.442695, %v825_v28 }
 0x882   :  { %2493 = vpow2.f32 %v2372_v45 }
 0x883   :  { %2495 = vpow2.f32 %v2373_v57 }
 0x888   :  { %v2494_v13 = vpop.eup %2493 }
 0x889   :  { %v2496_v56 = vpop.eup %2495  ;;  %v832_v44 = vadd.f32 1.0, %v2494_v13 }
 0x88a   :  { %v833_v61 = vadd.f32 1.0, %v2496_v56 }
 0x88b   :  { %2497 = vrcp.f32 %v832_v44  ;;  %v845_v24 = vand.u32 2147483648, %v832_v44  ;;  %vm839_vm9 = vweird.f32 %v832_v44  ;;  %v843_v59 = vand.u32 2147483647, %v832_v44 }
 0x88c   :  { %2499 = vrcp.f32 %v833_v61  ;;  %v860_v21 = vand.u32 2147483648, %v833_v61  ;;  %v858_v12 = vand.u32 2147483647, %v833_v61  ;;  %vm854_vm7 = vweird.f32 %v833_v61 }
 0x88d   :  { %v846_v29 = vor.u32 1.1754944e-38, %v845_v24  ;;  %vm844_vm12 = vcmp.eq.f32.partialorder %v843_v59, 8.507059e+37  ;;  %v1085_v59 = vld [vmem:[#allocation2 + $0x8] sm:$0xff] }
 0x88e   :  { %v861_v25 = vor.u32 1.1754944e-38, %v860_v21  ;;  %vm859_vm10 = vcmp.eq.f32.partialorder %v858_v12, 8.507059e+37 }
 0x891   :  { %v2498_v58 = vpop.eup %2497 }
 0x892   :  { %v2500_v17 = vpop.eup %2499  ;;  %v835_v53 = vmul.f32 %v2498_v58, %v832_v44  ;;  %vm840_vm6 = vweird.f32 %v2498_v58 }
 0x893   :  { %v850_v11 = vmul.f32 %v2500_v17, %v833_v61  ;;  %vm855_vm5 = vweird.f32 %v2500_v17  ;;  %vm841_vm11 = vmor %vm839_vm9, %vm840_vm6 }
 0x894   :  { %v836_v15 = vsub.f32 1.0, %v835_v53  ;;  %vm856_vm8 = vmor %vm854_vm7, %vm855_vm5 }
 0x895   :  { %v851_v18 = vsub.f32 1.0, %v850_v11 }
 0x896   :  { %v837_v20 = vmul.f32 %v2498_v58, %v836_v15 }
 0x897   :  { %v852_v54 = vmul.f32 %v2500_v17, %v851_v18 }
 0x898   :  { %v838_v22 = vadd.f32 %v2498_v58, %v837_v20 }
 0x899   :  { %v853_v23 = vadd.f32 %v2500_v17, %v852_v54 }
 0x89a   :  { %v842_v26 = vsel %vm841_vm11, %v2498_v58, %v838_v22 }
 0x89b   :  { %v857_v3 = vsel %vm856_vm8, %v2500_v17, %v853_v23  ;;  %v847_v4 = vsel %vm844_vm12, %v846_v29, %v842_v26 }
 0x89c   :  { %v862_v7 = vsel %vm859_vm10, %v861_v25, %v857_v3  ;;  %v866_v30 = vmul.f32 %v847_v4, %v772_v62 }
 0x89d   :  { %v864_v27 = vmul.f32 2.0, %v862_v7 }
 0x89f   :  { %v2374_v60 = vadd.f32 -1.0, %v864_v27  ;;  %v3816_v27 = vsel %vm2936_vm1, %v3008_v51, %v3004_v47 }
 0x8a1   :  { %v867_v8 = vmul.f32 %v2374_v60, %v847_v4  ;;  %v3817_v60 = vsel %vm2940_vm2, %v3010_v52, %v3006_v50 }
 0x8a3   :  { %869 = vrot.lane.b32.xlu1 %v867_v8, %s2625_s0 }
 0x915   :  { %v870_v31 = vpop.permute.xlu1 %869 }
 0x916   :  { %v872_v32 = vadd.f32 %v870_v31, %v866_v30 }
 0x918   :  { %2501 = vtanh.f32 %v872_v32 }
 0x91e   :  { %v2502_v33 = vpop.eup %2501 }
 0x91f   :  { %v874_v34 = vmul.f32 %v2502_v33, %v862_v7 }
 0x921   :  { %876 = vrot.lane.b32.xlu2 %v874_v34, %s2625_s0 }
 0x97b   :  { %v877_v5 = vpop.permute.xlu2 %876 }
 0x97c   :  { %879 = vst.msk [vmem:[#allocation2 + $0x28] sm:$0xff] %vm59_vm0, %v877_v5  ;;  %2375 = vmatmul.msk.f32.vlgmr.msra.gmra.mxu0 %vm59_vm0, %v877_v5  ;;  %2376 = vmatmul.msk.f32.vlgmr.msra.gmra.mxu1 %vm59_vm0, %v877_v5 }
 0x983   :  { %v1090_v41 = vld [vmem:[#allocation2 + $0x28] sm:$0xff] }
 0x984   :  { %1091 = vst.msk [vmem:[#allocation2 + $0x10] sm:$0xff] %vm1082_vm4, %v1090_v41 }
 0x985   :  { %1092 = vst.msk [vmem:[#allocation2 + $0x28] sm:$0xff] %vm1082_vm4, %v1089_v39 }
 0x9f9   :  { %v901_v6 = vpop.f32.mrf.mxu0  ;;  %v921_v37 = vpop.f32.mrf.mxu1 }
 0x9fa   :  { %v924_v63 = vadd.f32 %v901_v6, %v3814_v40  ;;  %v925_v46 = vadd.f32 %v921_v37, %v3815_v14 }
 0x9fc   :  { %v2377_v62 = vmul.f32 -1.442695, %v924_v63  ;;  %v2378_v43 = vmul.f32 -1.442695, %v925_v46 }
 0x9fe   :  { %2503 = vpow2.f32 %v2377_v62 }
 0x9ff   :  { %2505 = vpow2.f32 %v2378_v43 }
 0xa04   :  { %v2504_v0 = vpop.eup %2503 }
 0xa05   :  { %v2506_v55 = vpop.eup %2505  ;;  %v932_v10 = vadd.f32 1.0, %v2504_v0 }
 0xa06   :  { %v933_v42 = vadd.f32 1.0, %v2506_v55 }
 0xa07   :  { %2507 = vrcp.f32 %v932_v10  ;;  %v945_v56 = vand.u32 2147483648, %v932_v10  ;;  %vm939_vm5 = vweird.f32 %v932_v10  ;;  %v943_v61 = vand.u32 2147483647, %v932_v10 }
 0xa08   :  { %2509 = vrcp.f32 %v933_v42  ;;  %v960_v45 = vand.u32 2147483648, %v933_v42  ;;  %v958_v36 = vand.u32 2147483647, %v933_v42  ;;  %vm954_vm15 = vweird.f32 %v933_v42 }
 0xa09   :  { %v946_v15 = vor.u32 1.1754944e-38, %v945_v56  ;;  %vm944_vm8 = vcmp.eq.f32.partialorder %v943_v61, 8.507059e+37 }
 0xa0a   :  { %v961_v44 = vor.u32 1.1754944e-38, %v960_v45  ;;  %vm959_vm6 = vcmp.eq.f32.partialorder %v958_v36, 8.507059e+37 }
 0xa0d   :  { %v2508_v38 = vpop.eup %2507 }
 0xa0e   :  { %v2510_v9 = vpop.eup %2509  ;;  %v935_v48 = vmul.f32 %v2508_v38, %v932_v10  ;;  %vm940_vm14 = vweird.f32 %v2508_v38 }
 0xa0f   :  { %v950_v35 = vmul.f32 %v2510_v9, %v933_v42  ;;  %vm955_vm13 = vweird.f32 %v2510_v9  ;;  %vm941_vm7 = vmor %vm939_vm5, %vm940_vm14 }
 0xa10   :  { %v936_v19 = vsub.f32 1.0, %v935_v48  ;;  %vm956_vm3 = vmor %vm954_vm15, %vm955_vm13 }
 0xa11   :  { %v951_v16 = vsub.f32 1.0, %v950_v35 }
 0xa12   :  { %v937_v28 = vmul.f32 %v2508_v38, %v936_v19 }
 0xa13   :  { %v952_v49 = vmul.f32 %v2510_v9, %v951_v16 }
 0xa14   :  { %v938_v57 = vadd.f32 %v2508_v38, %v937_v28 }
 0xa15   :  { %v953_v13 = vadd.f32 %v2510_v9, %v952_v49 }
 0xa16   :  { %v942_v53 = vsel %vm941_vm7, %v2508_v38, %v938_v57  ;;  %v1080_v57 = vld [vmem:[#allocation2] sm:$0xff] }
 0xa17   :  { %v957_v58 = vsel %vm956_vm3, %v2510_v9, %v953_v13  ;;  %v947_v20 = vsel %vm944_vm8, %v946_v15, %v942_v53 }
 0xa18   :  { %v962_v17 = vsel %vm959_vm6, %v961_v44, %v957_v58  ;;  %v966_v54 = vmul.f32 %v947_v20, %v872_v32 }
 0xa19   :  { %v964_v11 = vmul.f32 2.0, %v962_v17 }
 0xa1b   :  { %v2379_v18 = vadd.f32 -1.0, %v964_v11 }
 0xa1d   :  { %v967_v21 = vmul.f32 %v2379_v18, %v947_v20 }
 0xa1f   :  { %969 = vrot.lane.b32.xlu0 %v967_v21, %s2625_s0 }
 0xa91   :  { %v970_v12 = vpop.permute.xlu0 %969 }
 0xa92   :  { %v972_v22 = vadd.f32 %v970_v12, %v966_v54 }
 0xa94   :  { %2511 = vtanh.f32 %v972_v22 }
 0xa9a   :  { %v2512_v23 = vpop.eup %2511 }
 0xa9b   :  { %v974_v24 = vmul.f32 %v2512_v23, %v962_v17 }
 0xa9d   :  { %976 = vrot.lane.b32.xlu1 %v974_v24, %s2625_s0 }
 0xb0f   :  { %v977_v25 = vpop.permute.xlu1 %976 }
 0xb10   :  { %979 = vst.msk [vmem:[#allocation2 + $0x30] sm:$0xff] %vm59_vm0, %v977_v25  ;;  %2380 = vmatmul.msk.f32.vlgmr.msrb.gmra.mxu2 %vm59_vm0, %v977_v25  ;;  %2381 = vmatmul.msk.f32.vlgmr.msrb.gmra.mxu3 %vm59_vm0, %v977_v25 }
 0xb17   :  { %v1086_v3 = vld [vmem:[#allocation2 + $0x30] sm:$0xff] }
 0xb18   :  { %1087 = vst.msk [vmem:[#allocation2 + $0x8] sm:$0xff] %vm1082_vm4, %v1086_v3 }
 0xb19   :  { %1088 = vst.msk [vmem:[#allocation2 + $0x30] sm:$0xff] %vm1082_vm4, %v1085_v59 }
 0xb93   :  { %v1001_v7 = vpop.f32.mrf.mxu2  ;;  %v1021_v26 = vpop.f32.mrf.mxu3 }
 0xb94   :  { %v1024_v29 = vadd.f32 %v1001_v7, %v3816_v27  ;;  %v1025_v4 = vadd.f32 %v1021_v26, %v3817_v60 }
 0xb96   :  { %v2382_v8 = vmul.f32 -1.442695, %v1024_v29  ;;  %v2383_v30 = vmul.f32 -1.442695, %v1025_v4 }
 0xb98   :  { %2513 = vpow2.f32 %v2382_v8 }
 0xb99   :  { %2515 = vpow2.f32 %v2383_v30 }
 0xb9e   :  { %v2514_v31 = vpop.eup %2513 }
 0xb9f   :  { %v2516_v32 = vpop.eup %2515  ;;  %v1032_v33 = vadd.f32 1.0, %v2514_v31 }
 0xba0   :  { %v1033_v34 = vadd.f32 1.0, %v2516_v32 }
 0xba1   :  { %2517 = vrcp.f32 %v1032_v33  ;;  %v1045_v46 = vand.u32 2147483648, %v1032_v33  ;;  %vm1039_vm13 = vweird.f32 %v1032_v33  ;;  %v1043_v43 = vand.u32 2147483647, %v1032_v33 }
 0xba2   :  { %2519 = vrcp.f32 %v1033_v34  ;;  %v1060_v40 = vand.u32 2147483648, %v1033_v34  ;;  %v1058_v52 = vand.u32 2147483647, %v1033_v34  ;;  %vm1054_vm11 = vweird.f32 %v1033_v34 }
 0xba3   :  { %v1046_v38 = vor.u32 1.1754944e-38, %v1045_v46  ;;  %vm1044_vm3 = vcmp.eq.f32.partialorder %v1043_v43, 8.507059e+37 }
 0xba4   :  { %v1061_v62 = vor.u32 1.1754944e-38, %v1060_v40  ;;  %vm1059_vm14 = vcmp.eq.f32.partialorder %v1058_v52, 8.507059e+37 }
 0xba7   :  { %v2518_v5 = vpop.eup %2517 }
 0xba8   :  { %v2520_v39 = vpop.eup %2519  ;;  %v1035_v47 = vmul.f32 %v2518_v5, %v1032_v33  ;;  %vm1040_vm10 = vweird.f32 %v2518_v5 }
 0xba9   :  { %v1050_v51 = vmul.f32 %v2520_v39, %v1033_v34  ;;  %vm1055_vm9 = vweird.f32 %v2520_v39  ;;  %vm1041_vm15 = vmor %vm1039_vm13, %vm1040_vm10 }
 0xbaa   :  { %v1036_v41 = vsub.f32 1.0, %v1035_v47  ;;  %vm1056_vm12 = vmor %vm1054_vm11, %vm1055_vm9 }
 0xbab   :  { %v1051_v6 = vsub.f32 1.0, %v1050_v51 }
 0xbac   :  { %v1037_v37 = vmul.f32 %v2518_v5, %v1036_v41 }
 0xbad   :  { %v1052_v50 = vmul.f32 %v2520_v39, %v1051_v6 }
 0xbae   :  { %v1038_v63 = vadd.f32 %v2518_v5, %v1037_v37 }
 0xbaf   :  { %v1053_v14 = vadd.f32 %v2520_v39, %v1052_v50 }
 0xbb0   :  { %v1042_v10 = vsel %vm1041_vm15, %v2518_v5, %v1038_v63 }
 0xbb1   :  { %v1057_v0 = vsel %vm1056_vm12, %v2520_v39, %v1053_v14  ;;  %v1047_v48 = vsel %vm1044_vm3, %v1046_v38, %v1042_v10 }
 0xbb2   :  { %v1062_v55 = vsel %vm1059_vm14, %v1061_v62, %v1057_v0  ;;  %v1066_v19 = vmul.f32 %v1047_v48, %v972_v22 }
 0xbb3   :  { %v1064_v42 = vmul.f32 2.0, %v1062_v55 }
 0xbb5   :  { %v2384_v9 = vadd.f32 -1.0, %v1064_v42 }
 0xbb7   :  { %v1067_v35 = vmul.f32 %v2384_v9, %v1047_v48 }
 0xbb9   :  { %1069 = vrot.lane.b32.xlu2 %v1067_v35, %s2625_s0 }
 0xc13   :  { %v1070_v16 = vpop.permute.xlu2 %1069 }
 0xc14   :  { %v1072_v28 = vadd.f32 %v1070_v16, %v1066_v19 }
 0xc16   :  { %2521 = vtanh.f32 %v1072_v28 }
 0xc1c   :  { %v2522_v45 = vpop.eup %2521 }
 0xc1d   :  { %v1074_v49 = vmul.f32 %v2522_v45, %v1062_v55 }
 0xc1f   :  { %1076 = vrot.lane.b32.xlu0 %v1074_v49, %s2625_s0 }
 0xc91   :  { %v1077_v36 = vpop.permute.xlu0 %1076 }
 0xc92   :  { %1079 = vst.msk [vmem:[#allocation2 + $0x38] sm:$0xff] %vm59_vm0, %v1077_v36 }
 0xc99   :  { %v1081_v13 = vld [vmem:[#allocation2 + $0x38] sm:$0xff] }
 0xc9a   :  { %1083 = vst.msk [vmem:[#allocation2] sm:$0xff] %vm1082_vm4, %v1081_v13 }
 0xc9b   :  { %1084 = vst.msk [vmem:[#allocation2 + $0x38] sm:$0xff] %vm1082_vm4, %v1080_v57 }
 0xc9c   :  { %v1119_v56 = vld [vmem:[%s3804_s4 + $0x70] sm:$0xff]  ;;  %v1120_v44 = vld [vmem:[%s3804_s4 + $0x78] sm:$0xff]  ;;  %v1117_v61 = vld [vmem:[%s3804_s4 + $0x60] sm:$0xff]  ;;  %v2626_v6 = vmov 0.0  }
 0xc9d   :  { %1160 = vmatpush.msrb.mxu0 %v1119_v56  ;;  %1201 = vmatpush.msrb.mxu1 %v1120_v44  ;;  %v1118_v58 = vld [vmem:[%s3804_s4 + $0x68] sm:$0xff]  ;;  %v1115_v17 = vld [vmem:[%s3804_s4 + $0x50] sm:$0xff]  ;;  %v1116_v53 = vld [vmem:[%s3804_s4 + $0x58] sm:$0xff] }
 0xc9e   :  { %v1113_v11 = vld [vmem:[%s3804_s4 + $0x40] sm:$0xff]  ;;  %v1114_v15 = vld [vmem:[%s3804_s4 + $0x48] sm:$0xff]  ;;  %v1111_v18 = vld [vmem:[%s3804_s4 + $0x30] sm:$0xff] }
 0xc9f   :  { %1161 = vmatpush.msrb.mxu0 %v1117_v61  ;;  %1202 = vmatpush.msrb.mxu1 %v1118_v58  ;;  %v1112_v20 = vld [vmem:[%s3804_s4 + $0x38] sm:$0xff]  ;;  %v1109_v21 = vld [vmem:[%s3804_s4 + $0x20] sm:$0xff]  ;;  %v1110_v54 = vld [vmem:[%s3804_s4 + $0x28] sm:$0xff] }
 0xca0   :  { %v1107_v12 = vld [vmem:[%s3804_s4 + $0x10] sm:$0xff]  ;;  %v1108_v22 = vld [vmem:[%s3804_s4 + $0x18] sm:$0xff]  ;;  %v1105_v23 = vld [vmem:[%s3804_s4] sm:$0xff] }
 0xca1   :  { %1162 = vmatpush.msrb.mxu0 %v1115_v17  ;;  %1203 = vmatpush.msrb.mxu1 %v1116_v53  ;;  %v1106_v24 = vld [vmem:[%s3804_s4 + $0x8] sm:$0xff]  ;;  %v1097_v25 = vld [vmem:[#allocation2] sm:$0xff]  ;;  %v3257_v59 = vld [vmem:[%s3805_s5 + $0x70] sm:$0xff] }
 0xca2   :  { %v3262_v3 = vld [vmem:[%s3805_s5 + $0x78] sm:$0xff]  ;;  %1360 = vmatpush.msra.mxu2 %v3257_v59  ;;  %v1098_v7 = vld [vmem:[#allocation2 + $0x8] sm:$0xff]  ;;  %v3271_v26 = vld [vmem:[%s3805_s5 + $0x60] sm:$0xff] }
 0xca3   :  { %1163 = vmatpush.msrb.mxu0 %v1113_v11  ;;  %1204 = vmatpush.msrb.mxu1 %v1114_v15  ;;  %v3276_v27 = vld [vmem:[%s3805_s5 + $0x68] sm:$0xff]  ;;  %v3283_v29 = vld [vmem:[%s3805_s5 + $0x50] sm:$0xff]  ;;  %v3288_v60 = vld [vmem:[%s3805_s5 + $0x58] sm:$0xff] }
 0xca4   :  { %1380 = vmatpush.msra.mxu3 %v3262_v3  ;;  %1361 = vmatpush.msra.mxu2 %v3271_v26  ;;  %v3295_v4 = vld [vmem:[%s3805_s5 + $0x40] sm:$0xff]  ;;  %v3300_v8 = vld [vmem:[%s3805_s5 + $0x48] sm:$0xff]  ;;  %v3309_v30 = vld [vmem:[%s3805_s5 + $0x30] sm:$0xff] }
 0xca5   :  { %1164 = vmatpush.msrb.mxu0 %v1111_v18  ;;  %1205 = vmatpush.msrb.mxu1 %v1112_v20  ;;  %v3314_v31 = vld [vmem:[%s3805_s5 + $0x38] sm:$0xff]  ;;  %v1099_v32 = vld [vmem:[#allocation2 + $0x10] sm:$0xff]  ;;  %v3327_v33 = vld [vmem:[%s3805_s5 + $0x20] sm:$0xff] }
 0xca6   :  { %1381 = vmatpush.msra.mxu3 %v3276_v27  ;;  %1362 = vmatpush.msra.mxu2 %v3283_v29  ;;  %v3332_v34 = vld [vmem:[%s3805_s5 + $0x28] sm:$0xff]  ;;  %v3339_v5 = vld [vmem:[%s3805_s5 + $0x10] sm:$0xff]  ;;  %v3344_v39 = vld [vmem:[%s3805_s5 + $0x18] sm:$0xff] }
 0xca7   :  { %1165 = vmatpush.msrb.mxu0 %v1109_v21  ;;  %1206 = vmatpush.msrb.mxu1 %v1110_v54  ;;  %v3351_v47 = vld [vmem:[%s3805_s5] sm:$0xff]  ;;  %v3356_v51 = vld [vmem:[%s3805_s5 + $0x8] sm:$0xff]  ;;  %v1100_v41 = vld [vmem:[#allocation2 + $0x18] sm:$0xff] }
 0xca8   :  { %1382 = vmatpush.msra.mxu3 %v3288_v60  ;;  %1363 = vmatpush.msra.mxu2 %v3295_v4  ;;  %v1101_v37 = vld [vmem:[#allocation2 + $0x20] sm:$0xff]  ;;  %v1102_v40 = vld [vmem:[#allocation2 + $0x28] sm:$0xff]  ;;  %v1103_v50 = vld [vmem:[#allocation2 + $0x30] sm:$0xff] }
 0xca9   :  { %1166 = vmatpush.msrb.mxu0 %v1107_v12  ;;  %1207 = vmatpush.msrb.mxu1 %v1108_v22  ;;  %v1104_v52 = vld [vmem:[#allocation2 + $0x38] sm:$0xff]  ;;  %v1121_v46 = vld [vmem:[%s3806_s6] sm:$0x3]  ;;  %s2627_s6 = smov 64  }
 0xcaa   :  { %1383 = vmatpush.msra.mxu3 %v3300_v8  ;;  %1364 = vmatpush.msra.mxu2 %v3309_v30  ;;  %v1123_v62 = vperm.slane %v1121_v46, 0  ;;  %v1124_v43 = vperm.slane %v1121_v46, 1 }
 0xcab   :  { %1167 = vmatpush.msrb.mxu0 %v1105_v23  ;;  %1208 = vmatpush.msrb.mxu1 %v1106_v24 }
 0xcac   :  { %2385 = vmatmul.msk.f32.vlgmr.msrb.gmra.mxu0 %vm59_vm0, %v1097_v25  ;;  %2393 = vmatmul.msk.f32.vlgmr.msrb.gmra.mxu1 %vm59_vm0, %v1097_v25 }
 0xcad   :  { %1780 = vmatpush.msra.mxu1 %v3262_v3  ;;  %1760 = vmatpush.msra.mxu0 %v3257_v59 }
 0xcae   :  { %1384 = vmatpush.msra.mxu3 %v3314_v31  ;;  %1365 = vmatpush.msra.mxu2 %v3327_v33 }
 0xcaf   :  { %1781 = vmatpush.msra.mxu1 %v3276_v27  ;;  %1761 = vmatpush.msra.mxu0 %v3271_v26 }
 0xcb0   :  { %1385 = vmatpush.msra.mxu3 %v3332_v34  ;;  %1366 = vmatpush.msra.mxu2 %v3339_v5 }
 0xcb1   :  { %1782 = vmatpush.msra.mxu1 %v3288_v60  ;;  %1762 = vmatpush.msra.mxu0 %v3283_v29 }
 0xcb2   :  { %1386 = vmatpush.msra.mxu3 %v3344_v39  ;;  %1367 = vmatpush.msra.mxu2 %v3351_v47 }
 0xcb3   :  { %1783 = vmatpush.msra.mxu1 %v3300_v8  ;;  %1763 = vmatpush.msra.mxu0 %v3295_v4 }
 0xcb4   :  { %2386 = vmatmul.msk.f32.gmra.mxu0 %vm59_vm0, %v1098_v7  ;;  %2394 = vmatmul.msk.f32.gmra.mxu1 %vm59_vm0, %v1098_v7 }
 0xcb5   :  { %1784 = vmatpush.msra.mxu1 %v3314_v31  ;;  %1764 = vmatpush.msra.mxu0 %v3309_v30 }
 0xcb6   :  { %1387 = vmatpush.msra.mxu3 %v3356_v51  ;;  %1368 = vmatmul.f32.vlgmr.msra.gmra.mxu2 %v2626_v6 }
 0xcb7   :  { %1785 = vmatpush.msra.mxu1 %v3332_v34  ;;  %1765 = vmatpush.msra.mxu0 %v3327_v33 }
 0xcb8   :  { %1388 = vmatmul.f32.vlgmr.msra.gmra.mxu3 %v2626_v6  ;;  %1460 = vmatpush.msrb.mxu2 %v3257_v59 }
 0xcb9   :  { %1480 = vmatpush.msrb.mxu3 %v3262_v3  ;;  %1786 = vmatpush.msra.mxu1 %v3344_v39 }
 0xcba   :  { %1461 = vmatpush.msrb.mxu2 %v3271_v26  ;;  %1766 = vmatpush.msra.mxu0 %v3339_v5 }
 0xcbb   :  { %1481 = vmatpush.msrb.mxu3 %v3276_v27  ;;  %1787 = vmatpush.msra.mxu1 %v3356_v51 }
 0xcbc   :  { %2387 = vmatmul.msk.f32.gmra.mxu0 %vm59_vm0, %v1099_v32  ;;  %2395 = vmatmul.msk.f32.gmra.mxu1 %vm59_vm0, %v1099_v32 }
 0xcbd   :  { %1462 = vmatpush.msrb.mxu2 %v3283_v29  ;;  %1482 = vmatpush.msrb.mxu3 %v3288_v60 }
 0xcbe   :  { %1767 = vmatpush.msra.mxu0 %v3351_v47  ;;  %1980 = vmatpush.msrb.mxu1 %v3262_v3 }
 0xcbf   :  { %1463 = vmatpush.msrb.mxu2 %v3295_v4  ;;  %1483 = vmatpush.msrb.mxu3 %v3300_v8 }
 0xcc0   :  { %1960 = vmatpush.msrb.mxu0 %v3257_v59  ;;  %1981 = vmatpush.msrb.mxu1 %v3276_v27 }
 0xcc1   :  { %1464 = vmatpush.msrb.mxu2 %v3309_v30  ;;  %1484 = vmatpush.msrb.mxu3 %v3314_v31 }
 0xcc2   :  { %1961 = vmatpush.msrb.mxu0 %v3271_v26  ;;  %1982 = vmatpush.msrb.mxu1 %v3288_v60 }
 0xcc3   :  { %1465 = vmatpush.msrb.mxu2 %v3327_v33  ;;  %1485 = vmatpush.msrb.mxu3 %v3332_v34 }
 0xcc4   :  { %2388 = vmatmul.msk.f32.gmra.mxu0 %vm59_vm0, %v1100_v41  ;;  %2396 = vmatmul.msk.f32.gmra.mxu1 %vm59_vm0, %v1100_v41 }
 0xcc5   :  { %1466 = vmatpush.msrb.mxu2 %v3339_v5  ;;  %1486 = vmatpush.msrb.mxu3 %v3344_v39 }
 0xcc6   :  { %1962 = vmatpush.msrb.mxu0 %v3283_v29  ;;  %1983 = vmatpush.msrb.mxu1 %v3300_v8 }
 0xcc7   :  { %1467 = vmatpush.msrb.mxu2 %v3351_v47  ;;  %1487 = vmatpush.msrb.mxu3 %v3356_v51 }
 0xcc8   :  { %1963 = vmatpush.msrb.mxu0 %v3295_v4  ;;  %1984 = vmatpush.msrb.mxu1 %v3314_v31 }
 0xcc9   :  { %1560 = vmatpush.msra.mxu2 %v3257_v59  ;;  %1580 = vmatpush.msra.mxu3 %v3262_v3 }
 0xcca   :  { %1964 = vmatpush.msrb.mxu0 %v3309_v30  ;;  %1985 = vmatpush.msrb.mxu1 %v3332_v34 }
 0xccb   :  { %1561 = vmatpush.msra.mxu2 %v3271_v26  ;;  %1581 = vmatpush.msra.mxu3 %v3276_v27 }
 0xccc   :  { %2389 = vmatmul.msk.f32.gmra.mxu0 %vm59_vm0, %v1101_v37  ;;  %2397 = vmatmul.msk.f32.gmra.mxu1 %vm59_vm0, %v1101_v37 }
 0xccd   :  { %1562 = vmatpush.msra.mxu2 %v3283_v29  ;;  %1582 = vmatpush.msra.mxu3 %v3288_v60 }
 0xcce   :  { %1965 = vmatpush.msrb.mxu0 %v3327_v33  ;;  %1986 = vmatpush.msrb.mxu1 %v3344_v39 }
 0xccf   :  { %1563 = vmatpush.msra.mxu2 %v3295_v4  ;;  %1583 = vmatpush.msra.mxu3 %v3300_v8 }
 0xcd0   :  { %1966 = vmatpush.msrb.mxu0 %v3339_v5  ;;  %1987 = vmatpush.msrb.mxu1 %v3356_v51 }
 0xcd1   :  { %1564 = vmatpush.msra.mxu2 %v3309_v30  ;;  %1584 = vmatpush.msra.mxu3 %v3314_v31 }
 0xcd2   :  { %1967 = vmatpush.msrb.mxu0 %v3351_v47 }
 0xcd3   :  { %1565 = vmatpush.msra.mxu2 %v3327_v33  ;;  %1585 = vmatpush.msra.mxu3 %v3332_v34 }
 0xcd4   :  { %2390 = vmatmul.msk.f32.gmra.mxu0 %vm59_vm0, %v1102_v40  ;;  %2398 = vmatmul.msk.f32.gmra.mxu1 %vm59_vm0, %v1102_v40 }
 0xcd5   :  { %1566 = vmatpush.msra.mxu2 %v3339_v5  ;;  %1586 = vmatpush.msra.mxu3 %v3344_v39 }
 0xcd7   :  { %1567 = vmatpush.msra.mxu2 %v3351_v47  ;;  %1587 = vmatpush.msra.mxu3 %v3356_v51 }
 0xcdc   :  { %2391 = vmatmul.msk.f32.gmra.mxu0 %vm59_vm0, %v1103_v50  ;;  %2399 = vmatmul.msk.f32.gmra.mxu1 %vm59_vm0, %v1103_v50 }
 0xce4   :  { %2392 = vmatmul.msk.f32.gmra.mxu0 %vm59_vm0, %v1104_v52  ;;  %2400 = vmatmul.msk.f32.gmra.mxu1 %vm59_vm0, %v1104_v52 }
 0xd29   :  { %v1169_v63 = vpop.f32.mrf.mxu0  ;;  %v1210_v14 = vpop.f32.mrf.mxu1 }
 0xd2a   :  { %v3503_v40 = vadd.f32 %v1169_v63, %v1123_v62  ;;  %v3505_v50 = vadd.f32 %v1210_v14, %v1124_v43 }
 0xd31   :  { %v1172_v0 = vpop.f32.mrf.mxu0  ;;  %v1213_v55 = vpop.f32.mrf.mxu1 }
 0xd32   :  { %v3431_v10 = vadd.f32 %v1172_v0, %v1123_v62  ;;  %v3433_v42 = vadd.f32 %v1213_v55, %v1124_v43 }
 0xd39   :  { %v1175_v38 = vpop.f32.mrf.mxu0  ;;  %v1216_v9 = vpop.f32.mrf.mxu1 }
 0xd3a   :  { %v3435_v48 = vadd.f32 %v1175_v38, %v1123_v62  ;;  %v3437_v35 = vadd.f32 %v1216_v9, %v1124_v43  ;;  %v1369_v0 = vpop.f32.mrf.mxu2 }
 0xd3b   :  { %v1389_v55 = vpop.f32.mrf.mxu3 }
 0xd41   :  { %v1178_v19 = vpop.f32.mrf.mxu0  ;;  %v1219_v16 = vpop.f32.mrf.mxu1 }
 0xd42   :  { %v3439_v28 = vadd.f32 %v1178_v19, %v1123_v62  ;;  %v3441_v45 = vadd.f32 %v1219_v16, %v1124_v43 }
 0xd49   :  { %v1181_v49 = vpop.f32.mrf.mxu0  ;;  %v1222_v36 = vpop.f32.mrf.mxu1 }
 0xd4a   :  { %v3443_v57 = vadd.f32 %v1181_v49, %v1123_v62  ;;  %v3445_v13 = vadd.f32 %v1222_v36, %v1124_v43 }
 0xd4c   :  { %v1323_v56 = vsel %vm2936_vm1, %v3439_v28, %v3443_v57  ;;  %v1324_v44 = vsel %vm2940_vm2, %v3441_v45, %v3445_v13  ;;  %v1327_v61 = vsel %vm2936_vm1, %v3443_v57, %v3439_v28  ;;  %v1328_v58 = vsel %vm2940_vm2, %v3445_v13, %v3441_v45 }
 0xd51   :  { %v1184_v17 = vpop.f32.mrf.mxu0  ;;  %v1225_v53 = vpop.f32.mrf.mxu1 }
 0xd52   :  { %v3463_v11 = vadd.f32 %v1184_v17, %v1123_v62  ;;  %v3465_v15 = vadd.f32 %v1225_v53, %v1124_v43 }
 0xd54   :  { %v1311_v18 = vsel %vm2936_vm1, %v3435_v48, %v3463_v11  ;;  %v1312_v20 = vsel %vm2940_vm2, %v3437_v35, %v3465_v15  ;;  %v1315_v21 = vsel %vm2936_vm1, %v3463_v11, %v3435_v48 }
 0xd59   :  { %v1187_v12 = vpop.f32.mrf.mxu0  ;;  %v1228_v22 = vpop.f32.mrf.mxu1 }
 0xd5a   :  { %v3483_v23 = vadd.f32 %v1187_v12, %v1123_v62  ;;  %v3485_v24 = vadd.f32 %v1228_v22, %v1124_v43 }
 0xd5c   :  { %v1299_v25 = vsel %vm2936_vm1, %v3431_v10, %v3483_v23  ;;  %v1300_v7 = vsel %vm2940_vm2, %v3433_v42, %v3485_v24 }
 0xd61   :  { %v1190_v6 = vpop.f32.mrf.mxu0  ;;  %v1231_v37 = vpop.f32.mrf.mxu1 }
 0xd62   :  { %v3507_v52 = vadd.f32 %v1190_v6, %v1123_v62  ;;  %v3509_v46 = vadd.f32 %v1231_v37, %v1124_v43 }
 0xd64   :  { %v1287_v38 = vsel %vm2936_vm1, %v3503_v40, %v3507_v52  ;;  %v1288_v9 = vsel %vm2940_vm2, %v3505_v50, %v3509_v46 }
 0xd65   :  { %v1392_v62 = vadd.f32 %v1369_v0, %v1287_v38  ;;  %v1393_v43 = vadd.f32 %v1389_v55, %v1288_v9 }
 0xd67   :  { %v2401_v19 = vmul.f32 -1.442695, %v1392_v62  ;;  %v2402_v16 = vmul.f32 -1.442695, %v1393_v43 }
 0xd69   :  { %2524 = vpow2.f32 %v2401_v19 }
 0xd6a   :  { %2526 = vpow2.f32 %v2402_v16 }
 0xd6f   :  { %v2525_v49 = vpop.eup %2524 }
 0xd70   :  { %v2527_v36 = vpop.eup %2526  ;;  %v1400_v17 = vadd.f32 1.0, %v2525_v49 }
 0xd71   :  { %v1401_v53 = vadd.f32 1.0, %v2527_v36 }
 0xd72   :  { %2528 = vrcp.f32 %v1400_v17  ;;  %v1413_v62 = vand.u32 2147483648, %v1400_v17  ;;  %vm1407_vm9 = vweird.f32 %v1400_v17  ;;  %v1411_v19 = vand.u32 2147483647, %v1400_v17 }
 0xd73   :  { %2530 = vrcp.f32 %v1401_v53  ;;  %v1428_v14 = vand.u32 2147483648, %v1401_v53  ;;  %v1426_v55 = vand.u32 2147483647, %v1401_v53  ;;  %vm1422_vm7 = vweird.f32 %v1401_v53 }
 0xd74   :  { %vm1412_vm12 = vcmp.eq.f32.partialorder %v1411_v19, 8.507059e+37 }
 0xd75   :  { %v1429_v43 = vor.u32 1.1754944e-38, %v1428_v14  ;;  %vm1427_vm10 = vcmp.eq.f32.partialorder %v1426_v55, 8.507059e+37 }
 0xd78   :  { %v2529_v12 = vpop.eup %2528 }
 0xd79   :  { %v2531_v22 = vpop.eup %2530  ;;  %v1403_v6 = vmul.f32 %v2529_v12, %v1400_v17  ;;  %vm1408_vm6 = vweird.f32 %v2529_v12 }
 0xd7a   :  { %v1418_v37 = vmul.f32 %v2531_v22, %v1401_v53  ;;  %vm1423_vm5 = vweird.f32 %v2531_v22  ;;  %vm1409_vm11 = vmor %vm1407_vm9, %vm1408_vm6 }
 0xd7b   :  { %v1404_v63 = vsub.f32 1.0, %v1403_v6  ;;  %vm1424_vm8 = vmor %vm1422_vm7, %vm1423_vm5 }
 0xd7c   :  { %v1419_v41 = vsub.f32 1.0, %v1418_v37 }
 0xd7d   :  { %v1405_v32 = vmul.f32 %v2529_v12, %v1404_v63  ;;  %v1414_v63 = vor.u32 1.1754944e-38, %v1413_v62 }
 0xd7e   :  { %v1420_v0 = vmul.f32 %v2531_v22, %v1419_v41 }
 0xd7f   :  { %v1406_v38 = vadd.f32 %v2529_v12, %v1405_v32 }
 0xd80   :  { %v1421_v9 = vadd.f32 %v2531_v22, %v1420_v0 }
 0xd81   :  { %v1410_v36 = vsel %vm1409_vm11, %v2529_v12, %v1406_v38 }
 0xd82   :  { %v1425_v16 = vsel %vm1424_vm8, %v2531_v22, %v1421_v9  ;;  %v1415_v37 = vsel %vm1412_vm12, %v1414_v63, %v1410_v36 }
 0xd83   :  { %v1430_v49 = vsel %vm1427_vm10, %v1429_v43, %v1425_v16  ;;  %v1434_v32 = vmul.f32 0.0, %v1415_v37 }
 0xd84   :  { %v1432_v6 = vmul.f32 2.0, %v1430_v49 }
 0xd86   :  { %v2403_v41 = vadd.f32 -1.0, %v1432_v6 }
 0xd88   :  { %v1435_v54 = vmul.f32 %v2403_v41, %v1415_v37 }
 0xd8a   :  { %1437 = vrot.lane.b32.xlu0 %v1435_v54, %s2627_s6 }
 0xdfc   :  { %v1438_v53 = vpop.permute.xlu0 %1437 }
 0xdfd   :  { %v3528_v0 = vadd.f32 %v1438_v53, %v1434_v32 }
 0xdff   :  { %2532 = vtanh.f32 %v3528_v0 }
 0xe05   :  { %v2533_v14 = vpop.eup %2532 }
 0xe06   :  { %v1442_v17 = vmul.f32 %v2533_v14, %v1430_v49 }
 0xe08   :  { %1444 = vrot.lane.b32.xlu0 %v1442_v17, %s2627_s6 }
 0xe7a   :  { %v1445_v12 = vpop.permute.xlu0 %1444 }
 0xe7b   :  { %1447 = vst.msk [vmem:[#allocation5] sm:$0xff] %vm59_vm0, %v1445_v12  ;;  %2404 = vmatmul.msk.f32.vlgmr.msrb.gmra.mxu2 %vm59_vm0, %v1445_v12  ;;  %2405 = vmatmul.msk.f32.vlgmr.msrb.gmra.mxu3 %vm59_vm0, %v1445_v12 }
 0xe7c   :  { %1660 = vmatpush.msrb.mxu2 %v3257_v59  ;;  %1680 = vmatpush.msrb.mxu3 %v3262_v3 }
 0xe7e   :  { %1661 = vmatpush.msrb.mxu2 %v3271_v26  ;;  %1681 = vmatpush.msrb.mxu3 %v3276_v27 }
 0xe80   :  { %1662 = vmatpush.msrb.mxu2 %v3283_v29  ;;  %1682 = vmatpush.msrb.mxu3 %v3288_v60 }
 0xe82   :  { %1663 = vmatpush.msrb.mxu2 %v3295_v4  ;;  %1683 = vmatpush.msrb.mxu3 %v3300_v8 }
 0xe84   :  { %1664 = vmatpush.msrb.mxu2 %v3309_v30  ;;  %1684 = vmatpush.msrb.mxu3 %v3314_v31 }
 0xe86   :  { %1665 = vmatpush.msrb.mxu2 %v3327_v33  ;;  %1685 = vmatpush.msrb.mxu3 %v3332_v34 }
 0xe88   :  { %1666 = vmatpush.msrb.mxu2 %v3339_v5  ;;  %1686 = vmatpush.msrb.mxu3 %v3344_v39 }
 0xe8a   :  { %1667 = vmatpush.msrb.mxu2 %v3351_v47  ;;  %1687 = vmatpush.msrb.mxu3 %v3356_v51 }
 0xefe   :  { %v1469_v54 = vpop.f32.mrf.mxu2  ;;  %v1489_v22 = vpop.f32.mrf.mxu3 }
 0xeff   :  { %v1492_v55 = vadd.f32 %v1469_v54, %v1299_v25  ;;  %v1493_v38 = vadd.f32 %v1489_v22, %v1300_v7 }
 0xf01   :  { %v2406_v9 = vmul.f32 -1.442695, %v1492_v55  ;;  %v2407_v62 = vmul.f32 -1.442695, %v1493_v38 }
 0xf03   :  { %2534 = vpow2.f32 %v2406_v9 }
 0xf04   :  { %2536 = vpow2.f32 %v2407_v62 }
 0xf09   :  { %v2535_v43 = vpop.eup %2534 }
 0xf0a   :  { %v2537_v19 = vpop.eup %2536  ;;  %v1500_v16 = vadd.f32 1.0, %v2535_v43 }
 0xf0b   :  { %v1501_v49 = vadd.f32 1.0, %v2537_v19 }
 0xf0c   :  { %2538 = vrcp.f32 %v1500_v16  ;;  %v1513_v54 = vand.u32 2147483648, %v1500_v16  ;;  %vm1507_vm5 = vweird.f32 %v1500_v16  ;;  %v1511_v55 = vand.u32 2147483647, %v1500_v16 }
 0xf0d   :  { %2540 = vrcp.f32 %v1501_v49  ;;  %v1528_v53 = vand.u32 2147483648, %v1501_v49  ;;  %v1526_v7 = vand.u32 2147483647, %v1501_v49  ;;  %vm1522_vm15 = vweird.f32 %v1501_v49 }
 0xf0e   :  { %v1514_v19 = vor.u32 1.1754944e-38, %v1513_v54  ;;  %vm1512_vm8 = vcmp.eq.f32.partialorder %v1511_v55, 8.507059e+37 }
 0xf0f   :  { %v1529_v22 = vor.u32 1.1754944e-38, %v1528_v53  ;;  %vm1527_vm6 = vcmp.eq.f32.partialorder %v1526_v7, 8.507059e+37 }
 0xf12   :  { %v2539_v36 = vpop.eup %2538 }
 0xf13   :  { %v2541_v6 = vpop.eup %2540  ;;  %v1503_v63 = vmul.f32 %v2539_v36, %v1500_v16  ;;  %vm1508_vm14 = vweird.f32 %v2539_v36 }
 0xf14   :  { %v1518_v25 = vmul.f32 %v2541_v6, %v1501_v49  ;;  %vm1523_vm13 = vweird.f32 %v2541_v6  ;;  %vm1509_vm7 = vmor %vm1507_vm5, %vm1508_vm14 }
 0xf15   :  { %v1504_v41 = vsub.f32 1.0, %v1503_v63  ;;  %vm1524_vm3 = vmor %vm1522_vm15, %vm1523_vm13 }
 0xf16   :  { %v1519_v37 = vsub.f32 1.0, %v1518_v25 }
 0xf17   :  { %v1505_v32 = vmul.f32 %v2539_v36, %v1504_v41 }
 0xf18   :  { %v1520_v14 = vmul.f32 %v2541_v6, %v1519_v37 }
 0xf19   :  { %v1506_v17 = vadd.f32 %v2539_v36, %v1505_v32 }
 0xf1a   :  { %v1521_v12 = vadd.f32 %v2541_v6, %v1520_v14 }
 0xf1b   :  { %v1510_v62 = vsel %vm1509_vm7, %v2539_v36, %v1506_v17 }
 0xf1c   :  { %v1525_v38 = vsel %vm1524_vm3, %v2541_v6, %v1521_v12  ;;  %v1515_v25 = vsel %vm1512_vm8, %v1514_v19, %v1510_v62 }
 0xf1d   :  { %v1530_v9 = vsel %vm1527_vm6, %v1529_v22, %v1525_v38  ;;  %v1534_v49 = vmul.f32 %v1515_v25, %v3528_v0 }
 0xf1e   :  { %v1532_v43 = vmul.f32 2.0, %v1530_v9 }
 0xf20   :  { %v2408_v63 = vadd.f32 -1.0, %v1532_v43 }
 0xf22   :  { %v1535_v41 = vmul.f32 %v2408_v63, %v1515_v25 }
 0xf24   :  { %1537 = vrot.lane.b32.xlu1 %v1535_v41, %s2627_s6 }
 0xf96   :  { %v1538_v37 = vpop.permute.xlu1 %1537 }
 0xf97   :  { %v3563_v32 = vadd.f32 %v1538_v37, %v1534_v49 }
 0xf99   :  { %2542 = vtanh.f32 %v3563_v32 }
 0xf9f   :  { %v2543_v16 = vpop.eup %2542 }
 0xfa0   :  { %v1542_v6 = vmul.f32 %v2543_v16, %v1530_v9 }
 0xfa2   :  { %1544 = vrot.lane.b32.xlu1 %v1542_v6, %s2627_s6 }
0x1014   :  { %v1545_v36 = vpop.permute.xlu1 %1544 }
0x1015   :  { %1547 = vst.msk [vmem:[#allocation5 + $0x8] sm:$0xff] %vm59_vm0, %v1545_v36  ;;  %2409 = vmatmul.msk.f32.vlgmr.msra.gmra.mxu2 %vm59_vm0, %v1545_v36  ;;  %2410 = vmatmul.msk.f32.vlgmr.msra.gmra.mxu3 %vm59_vm0, %v1545_v36 }
0x1016   :  { %1860 = vmatpush.msra.mxu2 %v3257_v59  ;;  %1880 = vmatpush.msra.mxu3 %v3262_v3 }
0x1018   :  { %1861 = vmatpush.msra.mxu2 %v3271_v26  ;;  %1881 = vmatpush.msra.mxu3 %v3276_v27 }
0x101a   :  { %1862 = vmatpush.msra.mxu2 %v3283_v29  ;;  %1882 = vmatpush.msra.mxu3 %v3288_v60 }
0x101c   :  { %1863 = vmatpush.msra.mxu2 %v3295_v4  ;;  %1883 = vmatpush.msra.mxu3 %v3300_v8 }
0x101e   :  { %1864 = vmatpush.msra.mxu2 %v3309_v30  ;;  %1884 = vmatpush.msra.mxu3 %v3314_v31 }
0x1020   :  { %1865 = vmatpush.msra.mxu2 %v3327_v33  ;;  %1885 = vmatpush.msra.mxu3 %v3332_v34 }
0x1022   :  { %1866 = vmatpush.msra.mxu2 %v3339_v5  ;;  %1886 = vmatpush.msra.mxu3 %v3344_v39 }
0x1024   :  { %1867 = vmatpush.msra.mxu2 %v3351_v47  ;;  %1887 = vmatpush.msra.mxu3 %v3356_v51 }
0x1098   :  { %v1569_v0 = vpop.f32.mrf.mxu2  ;;  %v1589_v53 = vpop.f32.mrf.mxu3 }
0x1099   :  { %v1592_v14 = vadd.f32 %v1569_v0, %v1311_v18  ;;  %v1593_v7 = vadd.f32 %v1589_v53, %v1312_v20 }
0x109b   :  { %v2411_v17 = vmul.f32 -1.442695, %v1592_v14  ;;  %v2412_v12 = vmul.f32 -1.442695, %v1593_v7 }
0x109d   :  { %2544 = vpow2.f32 %v2411_v17 }
0x109e   :  { %2546 = vpow2.f32 %v2412_v12 }
0x10a3   :  { %v2545_v54 = vpop.eup %2544 }
0x10a4   :  { %v2547_v22 = vpop.eup %2546  ;;  %v1600_v55 = vadd.f32 1.0, %v2545_v54 }
0x10a5   :  { %v1601_v38 = vadd.f32 1.0, %v2547_v22 }
0x10a6   :  { %2548 = vrcp.f32 %v1600_v55  ;;  %v1613_v6 = vand.u32 2147483648, %v1600_v55  ;;  %vm1607_vm13 = vweird.f32 %v1600_v55  ;;  %v1611_v0 = vand.u32 2147483647, %v1600_v55 }
0x10a7   :  { %2550 = vrcp.f32 %v1601_v38  ;;  %v1628_v41 = vand.u32 2147483648, %v1601_v38  ;;  %v1626_v20 = vand.u32 2147483647, %v1601_v38  ;;  %vm1622_vm11 = vweird.f32 %v1601_v38 }
0x10a8   :  { %v1614_v12 = vor.u32 1.1754944e-38, %v1613_v6  ;;  %vm1612_vm3 = vcmp.eq.f32.partialorder %v1611_v0, 8.507059e+37 }
0x10a9   :  { %v1629_v36 = vor.u32 1.1754944e-38, %v1628_v41  ;;  %vm1627_vm14 = vcmp.eq.f32.partialorder %v1626_v20, 8.507059e+37 }
0x10ac   :  { %v2549_v9 = vpop.eup %2548 }
0x10ad   :  { %v2551_v62 = vpop.eup %2550  ;;  %v1603_v43 = vmul.f32 %v2549_v9, %v1600_v55  ;;  %vm1608_vm10 = vweird.f32 %v2549_v9 }
0x10ae   :  { %v1618_v18 = vmul.f32 %v2551_v62, %v1601_v38  ;;  %vm1623_vm9 = vweird.f32 %v2551_v62  ;;  %vm1609_vm15 = vmor %vm1607_vm13, %vm1608_vm10 }
0x10af   :  { %v1604_v19 = vsub.f32 1.0, %v1603_v43  ;;  %vm1624_vm12 = vmor %vm1622_vm11, %vm1623_vm9 }
0x10b0   :  { %v1619_v63 = vsub.f32 1.0, %v1618_v18 }
0x10b1   :  { %v1605_v25 = vmul.f32 %v2549_v9, %v1604_v19 }
0x10b2   :  { %v1620_v49 = vmul.f32 %v2551_v62, %v1619_v63 }
0x10b3   :  { %v1606_v37 = vadd.f32 %v2549_v9, %v1605_v25 }
0x10b4   :  { %v1621_v16 = vadd.f32 %v2551_v62, %v1620_v49 }
0x10b5   :  { %v1610_v7 = vsel %vm1609_vm15, %v2549_v9, %v1606_v37 }
0x10b6   :  { %v1625_v53 = vsel %vm1624_vm12, %v2551_v62, %v1621_v16  ;;  %v1615_v22 = vsel %vm1612_vm3, %v1614_v12, %v1610_v7 }
0x10b7   :  { %v1630_v14 = vsel %vm1627_vm14, %v1629_v36, %v1625_v53  ;;  %v1634_v38 = vmul.f32 %v1615_v22, %v3563_v32 }
0x10b8   :  { %v1632_v17 = vmul.f32 2.0, %v1630_v14 }
0x10ba   :  { %v2413_v54 = vadd.f32 -1.0, %v1632_v17 }
0x10bc   :  { %v1635_v43 = vmul.f32 %v2413_v54, %v1615_v22 }
0x10be   :  { %1637 = vrot.lane.b32.xlu2 %v1635_v43, %s2627_s6 }
0x1118   :  { %v1638_v18 = vpop.permute.xlu2 %1637 }
0x1119   :  { %v3598_v19 = vadd.f32 %v1638_v18, %v1634_v38 }
0x111b   :  { %2552 = vtanh.f32 %v3598_v19 }
0x1121   :  { %v2553_v55 = vpop.eup %2552 }
0x1122   :  { %v1642_v62 = vmul.f32 %v2553_v55, %v1630_v14 }
0x1124   :  { %1644 = vrot.lane.b32.xlu2 %v1642_v62, %s2627_s6 }
0x117e   :  { %v1645_v9 = vpop.permute.xlu2 %1644 }
0x117f   :  { %1647 = vst.msk [vmem:[#allocation5 + $0x10] sm:$0xff] %vm59_vm0, %v1645_v9  ;;  %2414 = vmatmul.msk.f32.vlgmr.msrb.gmra.mxu2 %vm59_vm0, %v1645_v9  ;;  %2415 = vmatmul.msk.f32.vlgmr.msrb.gmra.mxu3 %vm59_vm0, %v1645_v9 }
0x1180   :  { %2060 = vmatpush.msrb.mxu2 %v3257_v59  ;;  %2080 = vmatpush.msrb.mxu3 %v3262_v3 }
0x1182   :  { %2061 = vmatpush.msrb.mxu2 %v3271_v26  ;;  %2081 = vmatpush.msrb.mxu3 %v3276_v27 }
0x1184   :  { %2062 = vmatpush.msrb.mxu2 %v3283_v29  ;;  %2082 = vmatpush.msrb.mxu3 %v3288_v60 }
0x1186   :  { %2063 = vmatpush.msrb.mxu2 %v3295_v4  ;;  %2083 = vmatpush.msrb.mxu3 %v3300_v8 }
0x1188   :  { %2064 = vmatpush.msrb.mxu2 %v3309_v30  ;;  %2084 = vmatpush.msrb.mxu3 %v3314_v31 }
0x118a   :  { %2065 = vmatpush.msrb.mxu2 %v3327_v33  ;;  %2085 = vmatpush.msrb.mxu3 %v3332_v34 }
0x118c   :  { %2066 = vmatpush.msrb.mxu2 %v3339_v5  ;;  %2086 = vmatpush.msrb.mxu3 %v3344_v39 }
0x118e   :  { %2067 = vmatpush.msrb.mxu2 %v3351_v47  ;;  %2087 = vmatpush.msrb.mxu3 %v3356_v51 }
0x1202   :  { %v1669_v59 = vpop.f32.mrf.mxu2  ;;  %v1689_v3 = vpop.f32.mrf.mxu3 }
0x1203   :  { %v1692_v26 = vadd.f32 %v1669_v59, %v1323_v56  ;;  %v1693_v27 = vadd.f32 %v1689_v3, %v1324_v44 }
0x1205   :  { %v2416_v29 = vmul.f32 -1.442695, %v1692_v26  ;;  %v2417_v60 = vmul.f32 -1.442695, %v1693_v27 }
0x1207   :  { %2554 = vpow2.f32 %v2416_v29 }
0x1208   :  { %2556 = vpow2.f32 %v2417_v60 }
0x120d   :  { %v2555_v4 = vpop.eup %2554 }
0x120e   :  { %v2557_v8 = vpop.eup %2556  ;;  %v1700_v30 = vadd.f32 1.0, %v2555_v4 }
0x120f   :  { %v1701_v31 = vadd.f32 1.0, %v2557_v8 }
0x1210   :  { %2558 = vrcp.f32 %v1700_v30  ;;  %v1713_v49 = vand.u32 2147483648, %v1700_v30  ;;  %vm1707_vm9 = vweird.f32 %v1700_v30  ;;  %v1711_v37 = vand.u32 2147483647, %v1700_v30 }
0x1211   :  { %2560 = vrcp.f32 %v1701_v31  ;;  %v1728_v32 = vand.u32 2147483648, %v1701_v31  ;;  %v1726_v44 = vand.u32 2147483647, %v1701_v31  ;;  %vm1722_vm7 = vweird.f32 %v1701_v31 }
0x1212   :  { %v1714_v53 = vor.u32 1.1754944e-38, %v1713_v49  ;;  %vm1712_vm12 = vcmp.eq.f32.partialorder %v1711_v37, 8.507059e+37 }
0x1213   :  { %v1729_v20 = vor.u32 1.1754944e-38, %v1728_v32  ;;  %vm1727_vm10 = vcmp.eq.f32.partialorder %v1726_v44, 8.507059e+37 }
0x1216   :  { %v2559_v33 = vpop.eup %2558 }
0x1217   :  { %v2561_v34 = vpop.eup %2560  ;;  %v1703_v5 = vmul.f32 %v2559_v33, %v1700_v30  ;;  %vm1708_vm6 = vweird.f32 %v2559_v33 }
0x1218   :  { %v1718_v39 = vmul.f32 %v2561_v34, %v1701_v31  ;;  %vm1723_vm5 = vweird.f32 %v2561_v34  ;;  %vm1709_vm11 = vmor %vm1707_vm9, %vm1708_vm6 }
0x1219   :  { %v1704_v47 = vsub.f32 1.0, %v1703_v5  ;;  %vm1724_vm8 = vmor %vm1722_vm7, %vm1723_vm5 }
0x121a   :  { %v1719_v51 = vsub.f32 1.0, %v1718_v39 }
0x121b   :  { %v1705_v56 = vmul.f32 %v2559_v33, %v1704_v47 }
0x121c   :  { %v1720_v63 = vmul.f32 %v2561_v34, %v1719_v51 }
0x121d   :  { %v1706_v25 = vadd.f32 %v2559_v33, %v1705_v56 }
0x121e   :  { %v1721_v41 = vadd.f32 %v2561_v34, %v1720_v63 }
0x121f   :  { %v1710_v36 = vsel %vm1709_vm11, %v2559_v33, %v1706_v25 }
0x1220   :  { %v1725_v16 = vsel %vm1724_vm8, %v2561_v34, %v1721_v41  ;;  %v1715_v7 = vsel %vm1712_vm12, %v1714_v53, %v1710_v36 }
0x1221   :  { %v1730_v6 = vsel %vm1727_vm10, %v1729_v20, %v1725_v16  ;;  %v1734_v12 = vmul.f32 %v1715_v7, %v3598_v19 }
0x1222   :  { %v1732_v0 = vmul.f32 2.0, %v1730_v6 }
0x1224   :  { %v2418_v14 = vadd.f32 -1.0, %v1732_v0 }
0x1226   :  { %v1735_v17 = vmul.f32 %v2418_v14, %v1715_v7 }
0x1228   :  { %1737 = vrot.lane.b32.xlu0 %v1735_v17, %s2627_s6 }
0x129a   :  { %v1738_v54 = vpop.permute.xlu0 %1737 }
0x129b   :  { %v1740_v22 = vadd.f32 %v1738_v54, %v1734_v12  ;;  %v3818_v54 = vsel %vm2940_vm2, %v3465_v15, %v3437_v35 }
0x129d   :  { %2562 = vtanh.f32 %v1740_v22 }
0x12a3   :  { %v2563_v43 = vpop.eup %2562 }
0x12a4   :  { %v1742_v38 = vmul.f32 %v2563_v43, %v1730_v6 }
0x12a6   :  { %1744 = vrot.lane.b32.xlu1 %v1742_v38, %s2627_s6 }
0x1318   :  { %v1745_v18 = vpop.permute.xlu1 %1744 }
0x1319   :  { %1747 = vst.msk [vmem:[#allocation5 + $0x18] sm:$0xff] %vm59_vm0, %v1745_v18  ;;  %2419 = vmatmul.msk.f32.vlgmr.msra.gmra.mxu0 %vm59_vm0, %v1745_v18  ;;  %2420 = vmatmul.msk.f32.vlgmr.msra.gmra.mxu1 %vm59_vm0, %v1745_v18 }
0x1320   :  { %v2161_v53 = vld [vmem:[#allocation5 + $0x18] sm:$0xff] }
0x1396   :  { %v1769_v55 = vpop.f32.mrf.mxu0  ;;  %v1789_v62 = vpop.f32.mrf.mxu1 }
0x1397   :  { %v1792_v19 = vadd.f32 %v1769_v55, %v1327_v61  ;;  %v1793_v9 = vadd.f32 %v1789_v62, %v1328_v58 }
0x1399   :  { %v2421_v59 = vmul.f32 -1.442695, %v1792_v19  ;;  %v2422_v3 = vmul.f32 -1.442695, %v1793_v9 }
0x139b   :  { %2564 = vpow2.f32 %v2421_v59 }
0x139c   :  { %2566 = vpow2.f32 %v2422_v3 }
0x13a1   :  { %v2565_v26 = vpop.eup %2564 }
0x13a2   :  { %v2567_v27 = vpop.eup %2566  ;;  %v1800_v29 = vadd.f32 1.0, %v2565_v26 }
0x13a3   :  { %v1801_v60 = vadd.f32 1.0, %v2567_v27 }
0x13a4   :  { %2568 = vrcp.f32 %v1800_v29  ;;  %v1813_v5 = vand.u32 2147483648, %v1800_v29  ;;  %vm1807_vm5 = vweird.f32 %v1800_v29  ;;  %v1811_v47 = vand.u32 2147483647, %v1800_v29 }
0x13a5   :  { %2570 = vrcp.f32 %v1801_v60  ;;  %v1828_v33 = vand.u32 2147483648, %v1801_v60  ;;  %v1826_v13 = vand.u32 2147483647, %v1801_v60  ;;  %vm1822_vm15 = vweird.f32 %v1801_v60 }
0x13a6   :  { %v1814_v44 = vor.u32 1.1754944e-38, %v1813_v5  ;;  %vm1812_vm8 = vcmp.eq.f32.partialorder %v1811_v47, 8.507059e+37 }
0x13a7   :  { %v1829_v39 = vor.u32 1.1754944e-38, %v1828_v33  ;;  %vm1827_vm6 = vcmp.eq.f32.partialorder %v1826_v13, 8.507059e+37 }
0x13aa   :  { %v2569_v4 = vpop.eup %2568 }
0x13ab   :  { %v2571_v8 = vpop.eup %2570  ;;  %v1803_v28 = vmul.f32 %v2569_v4, %v1800_v29  ;;  %vm1808_vm14 = vweird.f32 %v2569_v4 }
0x13ac   :  { %v1818_v57 = vmul.f32 %v2571_v8, %v1801_v60  ;;  %vm1823_vm13 = vweird.f32 %v2571_v8  ;;  %vm1809_vm7 = vmor %vm1807_vm5, %vm1808_vm14 }
0x13ad   :  { %v1804_v61 = vsub.f32 1.0, %v1803_v28  ;;  %vm1824_vm3 = vmor %vm1822_vm15, %vm1823_vm13 }
0x13ae   :  { %v1819_v30 = vsub.f32 1.0, %v1818_v57 }
0x13af   :  { %v1805_v31 = vmul.f32 %v2569_v4, %v1804_v61 }
0x13b0   :  { %v1820_v45 = vmul.f32 %v2571_v8, %v1819_v30 }
0x13b1   :  { %v1806_v58 = vadd.f32 %v2569_v4, %v1805_v31 }
0x13b2   :  { %v1821_v34 = vadd.f32 %v2571_v8, %v1820_v45 }
0x13b3   :  { %v1810_v32 = vsel %vm1809_vm7, %v2569_v4, %v1806_v58 }
0x13b4   :  { %v1825_v51 = vsel %vm1824_vm3, %v2571_v8, %v1821_v34  ;;  %v1815_v41 = vsel %vm1812_vm8, %v1814_v44, %v1810_v32  ;;  %v2157_v32 = vld [vmem:[#allocation5 + $0x10] sm:$0xff] }
0x13b5   :  { %v1830_v56 = vsel %vm1827_vm6, %v1829_v39, %v1825_v51  ;;  %v1834_v20 = vmul.f32 %v1815_v41, %v1740_v22 }
0x13b6   :  { %v1832_v63 = vmul.f32 2.0, %v1830_v56 }
0x13b8   :  { %v2423_v25 = vadd.f32 -1.0, %v1832_v63 }
0x13ba   :  { %v1835_v49 = vmul.f32 %v2423_v25, %v1815_v41  ;;  %v3819_v41 = vsel %vm2936_vm1, %v3483_v23, %v3431_v10 }
0x13bc   :  { %1837 = vrot.lane.b32.xlu2 %v1835_v49, %s2627_s6 }
0x1416   :  { %v1838_v37 = vpop.permute.xlu2 %1837 }
0x1417   :  { %v1840_v16 = vadd.f32 %v1838_v37, %v1834_v20  ;;  %v3820_v20 = vsel %vm2940_vm2, %v3485_v24, %v3433_v42 }
0x1419   :  { %2572 = vtanh.f32 %v1840_v16 }
0x141f   :  { %v2573_v6 = vpop.eup %2572 }
0x1420   :  { %v1842_v36 = vmul.f32 %v2573_v6, %v1830_v56 }
0x1422   :  { %1844 = vrot.lane.b32.xlu0 %v1842_v36, %s2627_s6 }
0x1494   :  { %v1845_v0 = vpop.permute.xlu0 %1844 }
0x1495   :  { %1847 = vst.msk [vmem:[#allocation5 + $0x20] sm:$0xff] %vm59_vm0, %v1845_v0  ;;  %2424 = vmatmul.msk.f32.vlgmr.msra.gmra.mxu2 %vm59_vm0, %v1845_v0  ;;  %2425 = vmatmul.msk.f32.vlgmr.msra.gmra.mxu3 %vm59_vm0, %v1845_v0 }
0x149c   :  { %v2162_v14 = vld [vmem:[#allocation5 + $0x20] sm:$0xff] }
0x149d   :  { %2163 = vst.msk [vmem:[#allocation5 + $0x18] sm:$0xff] %vm1082_vm4, %v2162_v14 }
0x149e   :  { %2164 = vst.msk [vmem:[#allocation5 + $0x20] sm:$0xff] %vm1082_vm4, %v2161_v53 }
0x1518   :  { %v1869_v7 = vpop.f32.mrf.mxu2  ;;  %v1889_v17 = vpop.f32.mrf.mxu3 }
0x1519   :  { %v1892_v12 = vadd.f32 %v1869_v7, %v1315_v21  ;;  %v1893_v22 = vadd.f32 %v1889_v17, %v3818_v54 }
0x151b   :  { %v2426_v43 = vmul.f32 -1.442695, %v1892_v12  ;;  %v2427_v38 = vmul.f32 -1.442695, %v1893_v22 }
0x151d   :  { %2574 = vpow2.f32 %v2426_v43 }
0x151e   :  { %2576 = vpow2.f32 %v2427_v38 }
0x1523   :  { %v2575_v18 = vpop.eup %2574 }
0x1524   :  { %v2577_v55 = vpop.eup %2576  ;;  %v1900_v62 = vadd.f32 1.0, %v2575_v18 }
0x1525   :  { %v1901_v19 = vadd.f32 1.0, %v2577_v55 }
0x1526   :  { %2578 = vrcp.f32 %v1900_v62  ;;  %v1913_v4 = vand.u32 2147483648, %v1900_v62  ;;  %vm1907_vm13 = vweird.f32 %v1900_v62  ;;  %v1911_v28 = vand.u32 2147483647, %v1900_v62 }
0x1527   :  { %2580 = vrcp.f32 %v1901_v19  ;;  %v1928_v27 = vand.u32 2147483648, %v1901_v19  ;;  %v1926_v15 = vand.u32 2147483647, %v1901_v19  ;;  %vm1922_vm11 = vweird.f32 %v1901_v19 }
0x1528   :  { %v1914_v33 = vor.u32 1.1754944e-38, %v1913_v4  ;;  %vm1912_vm3 = vcmp.eq.f32.partialorder %v1911_v28, 8.507059e+37  ;;  %v3691_v28 = vld [vmem:[#allocation5 + $0x20] sm:$0xff] }
0x1529   :  { %v1929_v8 = vor.u32 1.1754944e-38, %v1928_v27  ;;  %vm1927_vm14 = vcmp.eq.f32.partialorder %v1926_v15, 8.507059e+37 }
0x152c   :  { %v2579_v9 = vpop.eup %2578 }
0x152d   :  { %v2581_v59 = vpop.eup %2580  ;;  %v1903_v48 = vmul.f32 %v2579_v9, %v1900_v62  ;;  %vm1908_vm10 = vweird.f32 %v2579_v9 }
0x152e   :  { %v1918_v11 = vmul.f32 %v2581_v59, %v1901_v19  ;;  %vm1923_vm9 = vweird.f32 %v2581_v59  ;;  %vm1909_vm15 = vmor %vm1907_vm13, %vm1908_vm10 }
0x152f   :  { %v1904_v21 = vsub.f32 1.0, %v1903_v48  ;;  %vm1924_vm12 = vmor %vm1922_vm11, %vm1923_vm9 }
0x1530   :  { %v1919_v3 = vsub.f32 1.0, %v1918_v11 }
0x1531   :  { %v1905_v26 = vmul.f32 %v2579_v9, %v1904_v21 }
0x1532   :  { %v1920_v35 = vmul.f32 %v2581_v59, %v1919_v3 }
0x1533   :  { %v1906_v29 = vadd.f32 %v2579_v9, %v1905_v26 }
0x1534   :  { %v1921_v60 = vadd.f32 %v2581_v59, %v1920_v35 }
0x1535   :  { %v1910_v30 = vsel %vm1909_vm15, %v2579_v9, %v1906_v29 }
0x1536   :  { %v1925_v57 = vsel %vm1924_vm12, %v2581_v59, %v1921_v60  ;;  %v1915_v13 = vsel %vm1912_vm3, %v1914_v33, %v1910_v30 }
0x1537   :  { %v1930_v61 = vsel %vm1927_vm14, %v1929_v8, %v1925_v57  ;;  %v1934_v34 = vmul.f32 %v1915_v13, %v1840_v16  ;;  %v3689_v8 = vld [vmem:[%s3807_s7] ss:$0 sm:$0xff] }
0x1538   :  { %v1932_v31 = vmul.f32 2.0, %v1930_v61  ;;  %v2181_v57 = vmul.f32 %v3689_v8, %v3691_v28 }
0x153a   :  { %v2428_v45 = vadd.f32 -1.0, %v1932_v31  ;;  %v2153_v31 = vld [vmem:[#allocation5 + $0x8] sm:$0xff] }
0x153c   :  { %v1935_v58 = vmul.f32 %v2428_v45, %v1915_v13 }
0x153e   :  { %1937 = vrot.lane.b32.xlu1 %v1935_v58, %s2627_s6  ;;  %v3821_v58 = vsel %vm2936_vm1, %v3507_v52, %v3503_v40 }
0x15b0   :  { %v1938_v5 = vpop.permute.xlu1 %1937 }
0x15b1   :  { %v1940_v39 = vadd.f32 %v1938_v5, %v1934_v34  ;;  %v3822_v5 = vsel %vm2940_vm2, %v3509_v46, %v3505_v50 }
0x15b3   :  { %2582 = vtanh.f32 %v1940_v39 }
0x15b9   :  { %v2583_v47 = vpop.eup %2582 }
0x15ba   :  { %v1942_v51 = vmul.f32 %v2583_v47, %v1930_v61  ;;  %v2197_v61 = vsel %vm59_vm0, %v2181_v57, 0.0 }
0x15bc   :  { %1944 = vrot.lane.b32.xlu2 %v1942_v51, %s2627_s6 }
0x1616   :  { %v1945_v56 = vpop.permute.xlu2 %1944 }
0x1617   :  { %1947 = vst.msk [vmem:[#allocation5 + $0x28] sm:$0xff] %vm59_vm0, %v1945_v56  ;;  %2429 = vmatmul.msk.f32.vlgmr.msrb.gmra.mxu0 %vm59_vm0, %v1945_v56  ;;  %2430 = vmatmul.msk.f32.vlgmr.msrb.gmra.mxu1 %vm59_vm0, %v1945_v56 }
0x161e   :  { %v2158_v63 = vld [vmem:[#allocation5 + $0x28] sm:$0xff] }
0x161f   :  { %2159 = vst.msk [vmem:[#allocation5 + $0x10] sm:$0xff] %vm1082_vm4, %v2158_v63 }
0x1620   :  { %2160 = vst.msk [vmem:[#allocation5 + $0x28] sm:$0xff] %vm1082_vm4, %v2157_v32 }
0x1694   :  { %v1969_v44 = vpop.f32.mrf.mxu0  ;;  %v1989_v25 = vpop.f32.mrf.mxu1 }
0x1695   :  { %v1992_v49 = vadd.f32 %v1969_v44, %v3819_v41  ;;  %v1993_v37 = vadd.f32 %v1989_v25, %v3820_v20 }
0x1697   :  { %v2431_v16 = vmul.f32 -1.442695, %v1992_v49  ;;  %v2432_v6 = vmul.f32 -1.442695, %v1993_v37 }
0x1699   :  { %2584 = vpow2.f32 %v2431_v16 }
0x169a   :  { %2586 = vpow2.f32 %v2432_v6 }
0x169f   :  { %v2585_v36 = vpop.eup %2584 }
0x16a0   :  { %v2587_v0 = vpop.eup %2586  ;;  %v2000_v53 = vadd.f32 1.0, %v2585_v36 }
0x16a1   :  { %v2001_v14 = vadd.f32 1.0, %v2587_v0 }
0x16a2   :  { %2588 = vrcp.f32 %v2000_v53  ;;  %v2013_v55 = vand.u32 2147483648, %v2000_v53  ;;  %vm2007_vm9 = vweird.f32 %v2000_v53  ;;  %v2011_v19 = vand.u32 2147483647, %v2000_v53 }
0x16a3   :  { %2590 = vrcp.f32 %v2001_v14  ;;  %v2028_v43 = vand.u32 2147483648, %v2001_v14  ;;  %v2026_v24 = vand.u32 2147483647, %v2001_v14  ;;  %vm2022_vm7 = vweird.f32 %v2001_v14 }
0x16a4   :  { %v2014_v21 = vor.u32 1.1754944e-38, %v2013_v55  ;;  %vm2012_vm12 = vcmp.eq.f32.partialorder %v2011_v19, 8.507059e+37  ;;  %v3722_v55 = vld [vmem:[#allocation5 + $0x28] sm:$0xff] }
0x16a5   :  { %v2029_v62 = vor.u32 1.1754944e-38, %v2028_v43  ;;  %vm2027_vm10 = vcmp.eq.f32.partialorder %v2026_v24, 8.507059e+37  ;;  %v3717_v24 = vld [vmem:[#allocation5 + $0x18] sm:$0xff] }
0x16a8   :  { %v2589_v7 = vpop.eup %2588 }
0x16a9   :  { %v2591_v17 = vpop.eup %2590  ;;  %v2003_v10 = vmul.f32 %v2589_v7, %v2000_v53  ;;  %vm2008_vm6 = vweird.f32 %v2589_v7 }
0x16aa   :  { %v2018_v23 = vmul.f32 %v2591_v17, %v2001_v14  ;;  %vm2023_vm5 = vweird.f32 %v2591_v17  ;;  %vm2009_vm11 = vmor %vm2007_vm9, %vm2008_vm6 }
0x16ab   :  { %v2004_v12 = vsub.f32 1.0, %v2003_v10  ;;  %vm2024_vm8 = vmor %vm2022_vm7, %vm2023_vm5 }
0x16ac   :  { %v2019_v54 = vsub.f32 1.0, %v2018_v23 }
0x16ad   :  { %v2005_v22 = vmul.f32 %v2589_v7, %v2004_v12 }
0x16ae   :  { %v2020_v42 = vmul.f32 %v2591_v17, %v2019_v54 }
0x16af   :  { %v2006_v38 = vadd.f32 %v2589_v7, %v2005_v22 }
0x16b0   :  { %v2021_v18 = vadd.f32 %v2591_v17, %v2020_v42 }
0x16b1   :  { %v2010_v48 = vsel %vm2009_vm11, %v2589_v7, %v2006_v38  ;;  %v2180_v38 = vmul.f32 %v3689_v8, %v3717_v24 }
0x16b2   :  { %v2025_v9 = vsel %vm2024_vm8, %v2591_v17, %v2021_v18  ;;  %v2015_v26 = vsel %vm2012_vm12, %v2014_v21, %v2010_v48 }
0x16b3   :  { %v2030_v59 = vsel %vm2027_vm10, %v2029_v62, %v2025_v9  ;;  %v2034_v35 = vmul.f32 %v2015_v26, %v1940_v39  ;;  %v2194_v18 = vsel %vm59_vm0, %v2180_v38, 0.0  ;;  %v2182_v62 = vmul.f32 %v3689_v8, %v3722_v55 }
0x16b4   :  { %v2032_v11 = vmul.f32 2.0, %v2030_v59 }
0x16b5   :  { %v2200_v19 = vsel %vm59_vm0, %v2182_v62, 0.0 }
0x16b6   :  { %v2433_v3 = vadd.f32 -1.0, %v2032_v11 }
0x16b8   :  { %v2035_v27 = vmul.f32 %v2433_v3, %v2015_v26  ;;  %v3729_v3 = vld [vmem:[#allocation5 + $0x10] sm:$0xff] }
0x16b9   :  { %v2179_v26 = vmul.f32 %v3689_v8, %v3729_v3 }
0x16ba   :  { %2037 = vrot.lane.b32.xlu0 %v2035_v27, %s2627_s6 }
0x16bb   :  { %v2191_v27 = vsel %vm59_vm0, %v2179_v26, 0.0 }
0x172c   :  { %v2038_v15 = vpop.permute.xlu0 %2037 }
0x172d   :  { %v3682_v29 = vadd.f32 %v2038_v15, %v2034_v35 }
0x172f   :  { %2592 = vtanh.f32 %v3682_v29 }
0x1735   :  { %v2593_v60 = vpop.eup %2592 }
0x1736   :  { %v2042_v4 = vmul.f32 %v2593_v60, %v2030_v59 }
0x1738   :  { %2044 = vrot.lane.b32.xlu1 %v2042_v4, %s2627_s6  ;;  %v2148_v4 = vld [vmem:[#allocation5] sm:$0xff] }
0x1762   :  { %2198 = vadd.xlane.f32.xlu1 %v2197_v61 }
0x17aa   :  { %v2045_v30 = vpop.permute.xlu1 %2044 }
0x17ab   :  { %2047 = vst.msk [vmem:[#allocation5 + $0x30] sm:$0xff] %vm59_vm0, %v2045_v30  ;;  %2434 = vmatmul.msk.f32.vlgmr.msrb.gmra.mxu2 %vm59_vm0, %v2045_v30  ;;  %2435 = vmatmul.msk.f32.vlgmr.msrb.gmra.mxu3 %vm59_vm0, %v2045_v30 }
0x17b2   :  { %v2154_v33 = vld [vmem:[#allocation5 + $0x30] sm:$0xff] }
0x17b3   :  { %2155 = vst.msk [vmem:[#allocation5 + $0x8] sm:$0xff] %vm1082_vm4, %v2154_v33 }
0x17b4   :  { %2156 = vst.msk [vmem:[#allocation5 + $0x30] sm:$0xff] %vm1082_vm4, %v2153_v31 }
0x17ba   :  { %v3712_v22 = vld [vmem:[#allocation5 + $0x8] sm:$0xff] }
0x17bb   :  { %v2178_v43 = vmul.f32 %v3689_v8, %v3712_v22  ;;  %v3734_v35 = vld [vmem:[#allocation5 + $0x30] sm:$0xff] }
0x17bc   :  { %v2183_v15 = vmul.f32 %v3689_v8, %v3734_v35 }
0x17bd   :  { %v2188_v42 = vsel %vm59_vm0, %v2178_v43, 0.0 }
0x182e   :  { %v2069_v45 = vpop.f32.mrf.mxu2  ;;  %v2089_v13 = vpop.f32.mrf.mxu3 }
0x182f   :  { %v2092_v34 = vadd.f32 %v2069_v45, %v3821_v58  ;;  %v2093_v39 = vadd.f32 %v2089_v13, %v3822_v5 }
0x1831   :  { %v2436_v47 = vmul.f32 -1.442695, %v2092_v34  ;;  %v2437_v51 = vmul.f32 -1.442695, %v2093_v39  ;;  %v2199_v34 = vpop.xlane.xlu1 %2198 }
0x1833   :  { %2594 = vpow2.f32 %v2436_v47 }
0x1834   :  { %2596 = vpow2.f32 %v2437_v51 }
0x1839   :  { %v2595_v56 = vpop.eup %2594 }
0x183a   :  { %v2597_v32 = vpop.eup %2596  ;;  %v2100_v63 = vadd.f32 1.0, %v2595_v56 }
0x183b   :  { %v2101_v44 = vadd.f32 1.0, %v2597_v32 }
0x183c   :  { %2598 = vrcp.f32 %v2100_v63  ;;  %v2113_v6 = vand.u32 2147483648, %v2100_v63  ;;  %vm2107_vm15 = vweird.f32 %v2100_v63  ;;  %v2111_v0 = vand.u32 2147483647, %v2100_v63 }
0x183d   :  { %2600 = vrcp.f32 %v2101_v44  ;;  %v2128_v20 = vand.u32 2147483648, %v2101_v44  ;;  %v2126_v46 = vand.u32 2147483647, %v2101_v44  ;;  %vm2122_vm13 = vweird.f32 %v2101_v44 }
0x183e   :  { %v2114_v10 = vor.u32 1.1754944e-38, %v2113_v6  ;;  %vm2112_vm6 = vcmp.eq.f32.partialorder %v2111_v0, 8.507059e+37 }
0x183f   :  { %v2129_v36 = vor.u32 1.1754944e-38, %v2128_v20  ;;  %vm2127_vm3 = vcmp.eq.f32.partialorder %v2126_v46, 8.507059e+37 }
0x1842   :  { %v2599_v1 = vpop.eup %2598 }
0x1843   :  { %v2601_v25 = vpop.eup %2600  ;;  %v2103_v40 = vmul.f32 %v2599_v1, %v2100_v63  ;;  %vm2108_vm2 = vweird.f32 %v2599_v1 }
0x1844   :  { %v2118_v52 = vmul.f32 %v2601_v25, %v2101_v44  ;;  %vm2123_vm1 = vweird.f32 %v2601_v25  ;;  %vm2109_vm5 = vmor %vm2107_vm15, %vm2108_vm2 }
0x1845   :  { %v2104_v41 = vsub.f32 1.0, %v2103_v40  ;;  %vm2124_vm14 = vmor %vm2122_vm13, %vm2123_vm1 }
0x1846   :  { %v2119_v2 = vsub.f32 1.0, %v2118_v52 }
0x1847   :  { %v2105_v49 = vmul.f32 %v2599_v1, %v2104_v41 }
0x1848   :  { %v2120_v50 = vmul.f32 %v2601_v25, %v2119_v2 }
0x1849   :  { %v2106_v37 = vadd.f32 %v2599_v1, %v2105_v49 }
0x184a   :  { %v2121_v16 = vadd.f32 %v2601_v25, %v2120_v50 }
0x184b   :  { %v2110_v7 = vsel %vm2109_vm5, %v2599_v1, %v2106_v37 }
0x184c   :  { %v2125_v53 = vsel %vm2124_vm14, %v2601_v25, %v2121_v16  ;;  %v2115_v12 = vsel %vm2112_vm6, %v2114_v10, %v2110_v7 }
0x184d   :  { %v2130_v14 = vsel %vm2127_vm3, %v2129_v36, %v2125_v53  ;;  %v2134_v9 = vmul.f32 %v2115_v12, %v3682_v29  ;;  %v2203_v29 = vsel %vm59_vm0, %v2183_v15, 0.0 }
0x184e   :  { %v2132_v17 = vmul.f32 2.0, %v2130_v14 }
0x1850   :  { %v2438_v23 = vadd.f32 -1.0, %v2132_v17 }
0x1852   :  { %v2135_v54 = vmul.f32 %v2438_v23, %v2115_v12 }
0x1854   :  { %2137 = vrot.lane.b32.xlu2 %v2135_v54, %s2627_s6 }
0x187d   :  { %2189 = vadd.xlane.f32.xlu2 %v2188_v42 }
0x1885   :  { %2195 = vadd.xlane.f32.xlu2 %v2194_v18 }
0x188d   :  { %2201 = vadd.xlane.f32.xlu2 %v2200_v19 }
0x18ae   :  { %v2138_v59 = vpop.permute.xlu2 %2137 }
0x18af   :  { %v2140_v48 = vadd.f32 %v2138_v59, %v2134_v9 }
0x18b1   :  { %2602 = vtanh.f32 %v2140_v48 }
0x18b7   :  { %v2603_v11 = vpop.eup %2602 }
0x18b8   :  { %v2142_v21 = vmul.f32 %v2603_v11, %v2130_v14 }
0x18ba   :  { %2144 = vrot.lane.b32.xlu0 %v2142_v21, %s2627_s6 }
0x18e4   :  { %2192 = vadd.xlane.f32.xlu0 %v2191_v27 }
0x18ec   :  { %2204 = vadd.xlane.f32.xlu0 %v2203_v29 }
0x18f0   :  { %v2190_v58 = vpop.xlane.xlu2 %2189 }
0x18f8   :  { %v2196_v5 = vpop.xlane.xlu2 %2195 }
0x1900   :  { %v2202_v51 = vpop.xlane.xlu2 %2201 }
0x1901   :  { %v2210_v44 = vmax.f32 %v2190_v58, %v2202_v51 }
0x192c   :  { %v2145_v60 = vpop.permute.xlu0 %2144 }
0x192d   :  { %2147 = vst.msk [vmem:[#allocation5 + $0x38] sm:$0xff] %vm59_vm0, %v2145_v60 }
0x1934   :  { %v2149_v57 = vld [vmem:[#allocation5 + $0x38] sm:$0xff] }
0x1935   :  { %2151 = vst.msk [vmem:[#allocation5] sm:$0xff] %vm1082_vm4, %v2149_v57 }
0x1936   :  { %2152 = vst.msk [vmem:[#allocation5 + $0x38] sm:$0xff] %vm1082_vm4, %v2148_v4 }
0x193c   :  { %v3742_v61 = vld [vmem:[#allocation5] sm:$0xff] }
0x193d   :  { %v2177_v30 = vmul.f32 %v3689_v8, %v3742_v61  ;;  %v3747_v33 = vld [vmem:[#allocation5 + $0x38] sm:$0xff] }
0x193e   :  { %v2184_v45 = vmul.f32 %v3689_v8, %v3747_v33 }
0x193f   :  { %v2185_v31 = vsel %vm59_vm0, %v2177_v30, 0.0 }
0x1940   :  { %2186 = vadd.xlane.f32.xlu1 %v2185_v31  ;;  %v2206_v13 = vsel %vm59_vm0, %v2184_v45, 0.0 }
0x1948   :  { %2207 = vadd.xlane.f32.xlu1 %v2206_v13 }
0x1957   :  { %v2193_v39 = vpop.xlane.xlu0 %2192 }
0x195f   :  { %v2205_v56 = vpop.xlane.xlu0 %2204 }
0x1960   :  { %v2211_v1 = vmax.f32 %v2193_v39, %v2205_v56 }
0x19b3   :  { %v2187_v47 = vpop.xlane.xlu1 %2186 }
0x19b4   :  { %v2209_v32 = vmax.f32 %v2187_v47, %v2199_v34 }
0x19b6   :  { %v2213_v40 = vmax.f32 %v2209_v32, %v2210_v44 }
0x19bb   :  { %v2208_v63 = vpop.xlane.xlu1 %2207 }
0x19bc   :  { %v2212_v25 = vmax.f32 %v2196_v5, %v2208_v63 }
0x19be   :  { %v2214_v52 = vmax.f32 %v2211_v1, %v2212_v25 }
0x19c0   :  { %v2215_v41 = vmax.f32 %v2213_v40, %v2214_v52 }
0x19c2   :  { %v2216_v2 = vsub.f32 %v2187_v47, %v2215_v41  ;;  %v2217_v8 = vsub.f32 %v2190_v58, %v2215_v41  ;;  %v2218_v49 = vsub.f32 %v2193_v39, %v2215_v41  ;;  %v2219_v20 = vsub.f32 %v2196_v5, %v2215_v41 }
0x19c3   :  { %v2220_v37 = vsub.f32 %v2199_v34, %v2215_v41  ;;  %v2221_v6 = vsub.f32 %v2202_v51, %v2215_v41  ;;  %v2222_v0 = vsub.f32 %v2205_v56, %v2215_v41  ;;  %v2223_v14 = vsub.f32 %v2208_v63, %v2215_v41 }
0x19c4   :  { %v2224_v50 = vmul.f32 1.442695, %v2216_v2  ;;  %v2226_v46 = vmul.f32 1.442695, %v2217_v8  ;;  %v2228_v16 = vmul.f32 1.442695, %v2218_v49 }
0x19c5   :  { %v2230_v36 = vmul.f32 1.442695, %v2219_v20  ;;  %v2232_v53 = vmul.f32 1.442695, %v2220_v37  ;;  %v2234_v7 = vmul.f32 1.442695, %v2221_v6 }
0x19c6   :  { %2604 = vpow2.f32 %v2224_v50  ;;  %v2236_v23 = vmul.f32 1.442695, %v2222_v0  ;;  %v2238_v43 = vmul.f32 1.442695, %v2223_v14 }
0x19c7   :  { %2606 = vpow2.f32 %v2226_v46 }
0x19c8   :  { %2608 = vpow2.f32 %v2228_v16 }
0x19c9   :  { %2610 = vpow2.f32 %v2230_v36 }
0x19ca   :  { %2612 = vpow2.f32 %v2232_v53 }
0x19cb   :  { %2614 = vpow2.f32 %v2234_v7 }
0x19cc   :  { %v2605_v17 = vpop.eup %2604  ;;  %2616 = vpow2.f32 %v2236_v23 }
0x19cd   :  { %v2607_v10 = vpop.eup %2606  ;;  %2618 = vpow2.f32 %v2238_v43 }
0x19ce   :  { %v2240_v12 = vadd.f32 %v2607_v10, %v2605_v17  ;;  %v2609_v54 = vpop.eup %2608 }
0x19cf   :  { %v2611_v38 = vpop.eup %2610 }
0x19d0   :  { %v2241_v42 = vadd.f32 %v2609_v54, %v2240_v12  ;;  %v2613_v62 = vpop.eup %2612 }
0x19d1   :  { %v2615_v9 = vpop.eup %2614 }
0x19d2   :  { %v2242_v18 = vadd.f32 %v2611_v38, %v2241_v42  ;;  %v2617_v48 = vpop.eup %2616 }
0x19d3   :  { %v2619_v21 = vpop.eup %2618 }
0x19d4   :  { %v2243_v19 = vadd.f32 %v2613_v62, %v2242_v18 }
0x19d6   :  { %v2244_v59 = vadd.f32 %v2615_v9, %v2243_v19 }
0x19d8   :  { %v2245_v11 = vadd.f32 %v2617_v48, %v2244_v59 }
0x19da   :  { %v2246_v26 = vadd.f32 %v2619_v21, %v2245_v11 }
0x19dc   :  { %2620 = vrcp.f32 %v2246_v26  ;;  %v2258_v60 = vand.u32 2147483648, %v2246_v26  ;;  %v2256_v57 = vand.u32 2147483647, %v2246_v26  ;;  %vm2252_vm7 = vweird.f32 %v2246_v26 }
0x19de   :  { %v2259_v31 = vor.u32 1.1754944e-38, %v2258_v60  ;;  %vm2257_vm9 = vcmp.eq.f32.partialorder %v2256_v57, 8.507059e+37 }
0x19e2   :  { %v2621_v27 = vpop.eup %2620 }
0x19e3   :  { %v2248_v15 = vmul.f32 %v2621_v27, %v2246_v26  ;;  %vm2253_vm4 = vweird.f32 %v2621_v27 }
0x19e4   :  { %vm2254_vm8 = vmor %vm2252_vm7, %vm2253_vm4 }
0x19e5   :  { %v2249_v29 = vsub.f32 1.0, %v2248_v15 }
0x19e7   :  { %v2250_v4 = vmul.f32 %v2621_v27, %v2249_v29 }
0x19e9   :  { %v2251_v30 = vadd.f32 %v2621_v27, %v2250_v4 }
0x19eb   :  { %v2255_v45 = vsel %vm2254_vm8, %v2621_v27, %v2251_v30 }
0x19ec   :  { %v2260_v13 = vsel %vm2257_vm9, %v2259_v31, %v2255_v45 }
0x19ed   :  { %v2261_v58 = vmul.f32 %v2605_v17, %v2260_v13  ;;  %v2262_v34 = vmul.f32 %v2607_v10, %v2260_v13  ;;  %v2263_v5 = vmul.f32 %v2609_v54, %v2260_v13  ;;  %v2264_v39 = vmul.f32 %v2611_v38, %v2260_v13 }
0x19ee   :  { %v2265_v47 = vmul.f32 %v2613_v62, %v2260_v13  ;;  %v2266_v51 = vmul.f32 %v2615_v9, %v2260_v13  ;;  %v2267_v1 = vmul.f32 %v2617_v48, %v2260_v13  ;;  %v2268_v2 = vmul.f32 %v2619_v21, %v2260_v13 }
0x19ef   :  { %v2269_v56 = vmul.f32 %v2261_v58, %v3742_v61  ;;  %v2270_v32 = vmul.f32 %v2262_v34, %v3712_v22  ;;  %v2271_v63 = vmul.f32 %v2263_v5, %v3729_v3  ;;  %v2272_v44 = vmul.f32 %v2264_v39, %v3717_v24 }
0x19f0   :  { %v2273_v25 = vmul.f32 %v2265_v47, %v3691_v28  ;;  %v2274_v8 = vmul.f32 %v2266_v51, %v3722_v55  ;;  %v2275_v22 = vmul.f32 %v2267_v1, %v3734_v35  ;;  %v2276_v28 = vmul.f32 %v2268_v2, %v3747_v33 }
0x19f1   :  { %v2277_v40 = vmul.f32 %v2269_v56, %v2269_v56  ;;  %v2278_v52 = vmul.f32 %v2270_v32, %v2270_v32  ;;  %v2279_v41 = vmul.f32 %v2271_v63, %v2271_v63  ;;  %v2280_v49 = vmul.f32 %v2272_v44, %v2272_v44 }
0x19f2   :  { %v2281_v3 = vmul.f32 %v2273_v25, %v2273_v25  ;;  %v2282_v37 = vmul.f32 %v2274_v8, %v2274_v8  ;;  %v2283_v36 = vmul.f32 %v2275_v22, %v2275_v22  ;;  %v2284_v53 = vmul.f32 %v2276_v28, %v2276_v28 }
0x19f3   :  { %v2285_v20 = vsel %vm59_vm0, %v2277_v40, 0.0  ;;  %v2286_v61 = vsel %vm59_vm0, %v2278_v52, 0.0  ;;  %v2288_v24 = vsel %vm59_vm0, %v2279_v41, 0.0  ;;  %v2290_v16 = vsel %vm59_vm0, %v2280_v49, 0.0 }
0x19f4   :  { %v2287_v50 = vadd.f32 %v2286_v61, %v2285_v20  ;;  %v2292_v55 = vsel %vm59_vm0, %v2281_v3, 0.0  ;;  %v2294_v14 = vsel %vm59_vm0, %v2282_v37, 0.0  ;;  %v2296_v35 = vsel %vm59_vm0, %v2283_v36, 0.0 }
0x19f5   :  { %v2298_v10 = vsel %vm59_vm0, %v2284_v53, 0.0 }
0x19f6   :  { %v2289_v46 = vadd.f32 %v2288_v24, %v2287_v50 }
0x19f8   :  { %v2291_v6 = vadd.f32 %v2290_v16, %v2289_v46 }
0x19fa   :  { %v2293_v0 = vadd.f32 %v2292_v55, %v2291_v6 }
0x19fc   :  { %v2295_v7 = vadd.f32 %v2294_v14, %v2293_v0 }
0x19fe   :  { %v2297_v17 = vadd.f32 %v2296_v35, %v2295_v7 }
0x1a00   :  { %v2299_v23 = vadd.f32 %v2298_v10, %v2297_v17 }
0x1a02   :  { %v2300_v12 = vmax.f32 %v2299_v23, 1e-24 }
0x1a04   :  { %2622 = vrsqrt.f32 %v2300_v12  ;;  %vm2307_vm11 = vweird.f32 %v2300_v12 }
0x1a0a   :  { %v2623_v33 = vpop.eup %2622 }
0x1a0b   :  { %v2302_v54 = vmul.f32 %v2623_v33, %v2300_v12  ;;  %vm2308_vm10 = vweird.f32 %v2623_v33 }
0x1a0c   :  { %vm2309_vm12 = vmor %vm2307_vm11, %vm2308_vm10 }
0x1a0d   :  { %v2303_v43 = vmul.f32 %v2623_v33, %v2302_v54 }
0x1a0f   :  { %v2304_v42 = vmul.f32 0.5, %v2303_v43 }
0x1a11   :  { %v2305_v38 = vsub.f32 1.5, %v2304_v42 }
0x1a13   :  { %v2306_v18 = vmul.f32 %v2623_v33, %v2305_v38 }
0x1a15   :  { %v2310_v62 = vsel %vm2309_vm12, %v2623_v33, %v2306_v18 }
0x1a16   :  { %v2311_v19 = vmul.f32 %v2310_v62, %v2269_v56  ;;  %v2312_v9 = vmul.f32 %v2310_v62, %v2270_v32  ;;  %v2313_v59 = vmul.f32 %v2310_v62, %v2271_v63  ;;  %v2314_v48 = vmul.f32 %v2310_v62, %v2272_v44 }
0x1a17   :  { %v2315_v11 = vmul.f32 %v2310_v62, %v2273_v25  ;;  %v2316_v21 = vmul.f32 %v2310_v62, %v2274_v8  ;;  %v2317_v26 = vmul.f32 %v2310_v62, %v2275_v22  ;;  %v2318_v27 = vmul.f32 %v2310_v62, %v2276_v28 }
0x1a18   :  { %2319 = vst.msk [vmem:[%s3808_s8] sm:$0xff] %vm59_vm0, %v2311_v19 }
0x1a19   :  { %2320 = vst.msk [vmem:[%s3808_s8 + $0x8] sm:$0xff] %vm59_vm0, %v2312_v9 }
0x1a1a   :  { %2321 = vst.msk [vmem:[%s3808_s8 + $0x10] sm:$0xff] %vm59_vm0, %v2313_v59 }
0x1a1b   :  { %2322 = vst.msk [vmem:[%s3808_s8 + $0x18] sm:$0xff] %vm59_vm0, %v2314_v48 }
0x1a1c   :  { %2323 = vst.msk [vmem:[%s3808_s8 + $0x20] sm:$0xff] %vm59_vm0, %v2315_v11 }
0x1a1d   :  { %2324 = vst.msk [vmem:[%s3808_s8 + $0x28] sm:$0xff] %vm59_vm0, %v2316_v21 }
0x1a1e   :  { %2325 = vst.msk [vmem:[%s3808_s8 + $0x30] sm:$0xff] %vm59_vm0, %v2317_v26 }
0x1a1f   :  { %2326 = vst.msk [vmem:[%s3808_s8 + $0x38] sm:$0xff] %vm59_vm0, %v2318_v27 }

</bundles_post_ra>
